<compile_context>
chip_gen: v7x
topology: tpu7x:2x2x1
jax: 0.10.0
libtpu: 0.0.40
codegen_flags: <defaults>
</compile_context>

<pallas_src>
import functools

import jax
import jax.numpy as jnp
from jax.experimental import pallas as pl
from jax.experimental.pallas import tpu as pltpu

_EPS = 1e-5


# ----------------------------------------------------------------------------
# Host-side parameter preparation
# ----------------------------------------------------------------------------

def _block_diag_mask(C, groups):
    """(C, C) f32 mask, A[i, j] = 1 iff channels i and j are in the same group."""
    cpg = C // groups
    gid = jnp.arange(C, dtype=jnp.int32) // cpg
    return (gid[:, None] == gid[None, :]).astype(jnp.float32)


def _pack_vectors(named_vecs):
    """Pack 1-D per-channel params into one (P, 1) array with 8-aligned segments."""
    chunks, offs, off = [], {}, 0
    for name, v in named_vecs:
        L = int(v.shape[0])
        Lp = -(-L // 8) * 8
        chunks.append(jnp.zeros((Lp,), jnp.float32).at[:L].set(v.astype(jnp.float32)))
        offs[name] = (off, L)
        off += Lp
    return jnp.concatenate(chunks).reshape(-1, 1), offs


def prepare(params, dim, gn_groups):
    """Convert torch-style params into kernel inputs + a static plan."""
    blocks = params["blocks"]

    gn_sizes = []
    for blk in blocks:
        gn_sizes += [int(blk["gn0"]["g"].shape[0]), int(blk["gn1"]["g"].shape[0])]
    gn_sizes.append(int(params["gn"]["g"].shape[0]))
    for C in gn_sizes:
        assert C % gn_groups == 0, (
            f"GroupNorm channel count {C} not divisible by gn_groups={gn_groups}")

    distinct = sorted(set(gn_sizes))
    a_index = {C: i for i, C in enumerate(distinct)}
    a_mats = [_block_diag_mask(C, gn_groups) for C in distinct]

    # fc_p split: W_p stays in the kernel, W_c @ c + b becomes a tiny wrapper matmul.
    W_fcp = params["fc_p"]["W"]
    Wp, Wc = W_fcp[:, :dim], W_fcp[:, dim:]

    mats = [Wp.astype(jnp.bfloat16)]
    vec_list = []
    block_plan = []
    for bi, blk in enumerate(blocks):
        c_in = int(blk["gn0"]["g"].shape[0])
        c_h = int(blk["gn1"]["g"].shape[0])
        vec_list += [
            (f"b{bi}.gn0.g", blk["gn0"]["g"]), (f"b{bi}.gn0.b", blk["gn0"]["b"]),
            (f"b{bi}.c0.b", blk["conv0"]["b"]),
            (f"b{bi}.gn1.g", blk["gn1"]["g"]), (f"b{bi}.gn1.b", blk["gn1"]["b"]),
            (f"b{bi}.c1.b", blk["conv1"]["b"]),
        ]
        mats.append(blk["conv0"]["W"].astype(jnp.bfloat16))
        mats.append(blk["conv1"]["W"].astype(jnp.bfloat16))
        has_sc = blk["shortcut"] is not None
        if has_sc:
            # Shortcut weight kept SEPARATE (two accumulating dots in-kernel,
            # no axis-0 concat of [h ; net]).
            mats.append(blk["shortcut"]["W"].astype(jnp.bfloat16))
        block_plan.append(dict(a0=a_index[c_in], a1=a_index[c_h],
                               cpg_in=c_in // gn_groups, cpg_h=c_h // gn_groups,
                               shortcut=has_sc))

    vec_list += [("gn.g", params["gn"]["g"]), ("gn.b", params["gn"]["b"]),
                 ("fco.b", params["fc_out"]["b"])]
    mats.append(params["fc_out"]["W"].astype(jnp.bfloat16))

    packed, offs = _pack_vectors(vec_list)
    c_f = int(params["gn"]["g"].shape[0])
    plan = dict(blocks=tuple(block_plan), vec_offs=offs,
                num_a=len(a_mats), num_mats=len(mats),
                a_final=a_index[c_f], cpg_final=c_f // gn_groups)
    return Wc, params["fc_p"]["b"], mats, a_mats, packed, plan


# ----------------------------------------------------------------------------
# Kernel
# ----------------------------------------------------------------------------

def _decoder_kernel(plan, *refs):
    n_a, n_m = plan["num_a"], plan["num_mats"]
    p_ref, lat_ref, vec_ref = refs[0], refs[1], refs[2]
    a_refs = refs[3:3 + n_a]
    m_refs = refs[3 + n_a:3 + n_a + n_m]
    o_ref = refs[-1]

    def vec(name):
        off, length = plan["vec_offs"][name]
        return vec_ref[off:off + length, :]                       # (C, 1) f32, static slice

    def mm(w_ref, x_bf16):
        # 1x1 conv == matmul; bf16 MXU operands, f32 accumulation.  Activations
        # arrive already in bf16 (cast fused into gn_relu's output).
        return jnp.dot(w_ref[...], x_bf16, preferred_element_type=jnp.float32)

    def gn_relu_bf16(x, a_idx, cpg, gname):
        """torch.nn.GroupNorm + ReLU, folded to one FMA per element; emits bf16."""
        C, T = x.shape
        s1 = jnp.sum(x, axis=1, keepdims=True)                    # (C, 1) per-channel sum
        s2 = jnp.sum(x * x, axis=1, keepdims=True)                # (C, 1) per-channel sumsq
        # Aggregate per-channel sums into per-group sums with a precomputed
        # block-diagonal 0/1 mask.  Two tiny (C,C)x(C,1) dots (no lane concat);
        # statistics stay f32 / HIGHEST — precision critical, cost is noise.
        A = a_refs[a_idx][...]
        gs1 = jnp.dot(A, s1, precision=jax.lax.Precision.HIGHEST,
                      preferred_element_type=jnp.float32)         # (C, 1)
        gs2 = jnp.dot(A, s2, precision=jax.lax.Precision.HIGHEST,
                      preferred_element_type=jnp.float32)         # (C, 1)
        n = float(cpg * T)
        mean = gs1 / n
        var = jnp.maximum(gs2 / n - mean * mean, 0.0)             # clamp: E[x^2]-m^2 can go <0
        inv = jax.lax.rsqrt(var + _EPS)
        scale = vec(gname + ".g") * inv
        shift = vec(gname + ".b") - mean * scale
        # fused affine + ReLU + bf16 cast (next consumer is always an MXU conv)
        return jnp.maximum(x * scale + shift, 0.0).astype(jnp.bfloat16)

    # fc_p : W_p (h0, dim) contracted against the T-major point tile (T, dim)
    # on the MXU (A @ B^T, contraction on the last dims) — no HBM transpose of
    # p in the wrapper.  The latent contribution (W_c @ c + b) is precomputed.
    net = jax.lax.dot_general(
        m_refs[0][...], p_ref[...].astype(jnp.bfloat16),
        dimension_numbers=(((1,), (1,)), ((), ())),
        preferred_element_type=jnp.float32) + lat_ref[...]        # (h0, T) f32

    mi = 1
    for bi, blk in enumerate(plan["blocks"]):
        h = gn_relu_bf16(net, blk["a0"], blk["cpg_in"], f"b{bi}.gn0")
        h = mm(m_refs[mi], h) + vec(f"b{bi}.c0.b")
        mi += 1
        h = gn_relu_bf16(h, blk["a1"], blk["cpg_h"], f"b{bi}.gn1")
        dx = mm(m_refs[mi], h) + vec(f"b{bi}.c1.b")
        mi += 1
        if blk["shortcut"]:
            # conv_1(h) + shortcut(net): two accumulating dots, no concat.
            net = mm(m_refs[mi], net.astype(jnp.bfloat16)) + dx
            mi += 1
        else:
            net = net + dx

    h = gn_relu_bf16(net, plan["a_final"], plan["cpg_final"], "gn")
    o_ref[...] = mm(m_refs[mi], h) + vec("fco.b")                 # (1, T)


# ----------------------------------------------------------------------------
# Wrapper
# ----------------------------------------------------------------------------

def _vmem_budget_bytes():
    """Generation-aware VMEM ceiling: ~70% of physical capacity (~44 MiB on
    v7x, ~90 MiB on v5e/v6e)."""
    try:
        cap = int(pltpu.get_tpu_info().vmem_capacity_bytes)
    except Exception:
        cap = 64 << 20                       # conservative fallback (v7x per-TC)
    return int(cap * 0.7)


def _estimate_vmem_bytes(T, dim, h0, mats, a_mats, vec_packed):
    act = 8 * h0 * T * 4                                 # fused activation live set (~2 KB/pt @ h0=64)
    io = 2 * (T * dim + h0 + T) * 4                      # double-buffered p / lat / out tiles
    wts = 2 * (sum(int(m.size) * 2 for m in mats)        # bf16 weights (double-buffered bound)
               + sum(int(a.size) * 4 for a in a_mats)    # f32 group masks
               + int(vec_packed.size) * 4)               # packed per-channel vectors
    return act + io + wts + (2 << 20)                    # + Mosaic internal scratch margin


def nasa_group_norm_decoder(p, c, params, gn_groups):
    """p: (B, T, dim) query points, c: (B, c_dim) latent code  ->  (B, T)."""
    B, T, dim = p.shape
    Wc, b_fcp, mats, a_mats, vec_packed, plan = prepare(params, dim, gn_groups)
    h0 = int(b_fcp.shape[0])

    # Tiny wrapper glue: fold the latent into a (B, h0, 1) bias instead of
    # materializing a (B, c_dim, T) broadcast in HBM.  p is passed T-major,
    # untouched (no HBM transpose).
    lat = jnp.dot(c.astype(jnp.bfloat16), Wc.T.astype(jnp.bfloat16),
                  preferred_element_type=jnp.float32) + b_fcp[None, :]
    lat = lat[:, :, None]                                          # (B, h0, 1)
    p = p.astype(jnp.float32)

    # Generation-aware VMEM budget + explicit guard (no silent spill for big T).
    ceiling = _vmem_budget_bytes()
    est = _estimate_vmem_bytes(T, dim, h0, mats, a_mats, vec_packed)
    if est > ceiling:
        raise ValueError(
            f"Estimated per-step VMEM {est >> 20} MiB exceeds budget "
            f"{ceiling >> 20} MiB for T={T}; split the call over smaller T "
            "chunks. TODO(synk): T-tiled two-pass GroupNorm for large T.")

    kernel = functools.partial(_decoder_kernel, plan)

    in_specs = [pl.BlockSpec((None, T, dim), lambda b: (b, 0, 0)),   # p, T-major
                pl.BlockSpec((None, h0, 1), lambda b: (b, 0, 0)),    # latent bias
                pl.BlockSpec(vec_packed.shape, lambda b: (0, 0))]    # packed vecs
    in_specs += [pl.BlockSpec(a.shape, lambda b: (0, 0)) for a in a_mats]
    in_specs += [pl.BlockSpec(m.shape, lambda b: (0, 0)) for m in mats]
    out_specs = pl.BlockSpec((None, 1, T), lambda b: (b, 0, 0))

    out = pl.pallas_call(
        kernel,
        out_shape=jax.ShapeDtypeStruct((B, 1, T), jnp.float32),
        grid_spec=pltpu.PrefetchScalarGridSpec(
            num_scalar_prefetch=0,
            grid=(B,),
            in_specs=in_specs,
            out_specs=out_specs,
        ),
        compiler_params=pltpu.CompilerParams(
            dimension_semantics=("parallel",),       # batch across TCs (megacore)
            vmem_limit_bytes=ceiling),
    )(p, lat, vec_packed, *a_mats, *mats)
    return out[:, 0, :]                                            # torch .squeeze(1)


# ----------------------------------------------------------------------------
# Pure-JAX reference (torch module structure, no Pallas)
# ----------------------------------------------------------------------------

def reference_forward(p, c, params, gn_groups, eps=_EPS):
    """Matmul operands are cast to bf16 (f32 accumulate) to match the kernel's
    MXU numerics; all other math is f32 with torch GroupNorm semantics."""
    B, T, _ = p.shape
    x = jnp.transpose(p, (0, 2, 1))
    cb = jnp.broadcast_to(c[:, :, None], (B, c.shape[1], T))
    x = jnp.concatenate([x, cb], axis=1)

    def conv1x1(x, W, b=None):
        y = jnp.einsum("oc,bct->bot", W.astype(jnp.bfloat16), x.astype(jnp.bfloat16),
                       preferred_element_type=jnp.float32)
        return y if b is None else y + b[None, :, None]

    def group_norm(x, gamma, beta, groups):
        Bb, C, Tt = x.shape
        xg = x.reshape(Bb, groups, (C // groups) * Tt)
        mean = jnp.mean(xg, axis=-1, keepdims=True)
        var = jnp.var(xg, axis=-1, keepdims=True)
        xn = ((xg - mean) * jax.lax.rsqrt(var + eps)).reshape(Bb, C, Tt)
        return xn * gamma[None, :, None] + beta[None, :, None]

    relu = jax.nn.relu
    net = conv1x1(x, params["fc_p"]["W"], params["fc_p"]["b"])
    for blk in params["blocks"]:
        h = conv1x1(relu(group_norm(net, blk["gn0"]["g"], blk["gn0"]["b"], gn_groups)),
                    blk["conv0"]["W"], blk["conv0"]["b"])
        dx = conv1x1(relu(group_norm(h, blk["gn1"]["g"], blk["gn1"]["b"], gn_groups)),
                     blk["conv1"]["W"], blk["conv1"]["b"])
        xs = net if blk["shortcut"] is None else conv1x1(net, blk["shortcut"]["W"])
        net = xs + dx
    h = relu(group_norm(net, params["gn"]["g"], params["gn"]["b"], gn_groups))
    out = conv1x1(h, params["fc_out"]["W"], params["fc_out"]["b"])
    return out[:, 0, :]


# ----------------------------------------------------------------------------
# Deterministic synthetic parameters (shapes implied by __init__)
# ----------------------------------------------------------------------------

def init_params(key, dim=3, c_dim=32, hidden_size=64, gn_groups=8, out_dim=1):
    keys = iter(jax.random.split(key, 64))

    def conv(cin, cout, bias=True):
        W = jax.random.normal(next(keys), (cout, cin), jnp.float32) / jnp.sqrt(cin)
        d = {"W": W}
        if bias:
            d["b"] = 0.1 * jax.random.normal(next(keys), (cout,), jnp.float32)
        return d

    def gn(C):
        return {"g": 1.0 + 0.1 * jax.random.normal(next(keys), (C,), jnp.float32),
                "b": 0.1 * jax.random.normal(next(keys), (C,), jnp.float32)}

    h = hidden_size
    params = {"fc_p": conv(dim + c_dim, h)}
    blocks = []
    s_in = h
    for i in range(4):
        s_out = s_in // 2 if i < 3 else s_in          # block3 keeps its width
        s_h = min(s_in, s_out)
        blocks.append({"gn0": gn(s_in), "conv0": conv(s_in, s_h),
                       "gn1": gn(s_h), "conv1": conv(s_h, s_out),
                       "shortcut": conv(s_in, s_out, bias=False) if s_in != s_out else None})
        s_in = s_out
    params["blocks"] = blocks
    params["gn"] = gn(s_in)
    params["fc_out"] = conv(s_in, out_dim)
    return params


if __name__ == "__main__":
    B, T = 2, 128
    dim, c_dim = 3, 32
    hidden_size, gn_groups = 64, 8

    key = jax.random.PRNGKey(0)
    kp, kc, kw = jax.random.split(key, 3)
    p = jax.random.normal(kp, (B, T, dim), jnp.float32)   # query points (B, T, dim)
    c = jax.random.normal(kc, (B, c_dim), jnp.float32)    # latent code  (B, c_dim)
    params = init_params(kw, dim, c_dim, hidden_size, gn_groups, out_dim=1)

    out = nasa_group_norm_decoder(p, c, params, gn_groups)
    out = jax.block_until_ready(out)
    assert out.shape == (B, T)

    ref = reference_forward(p, c, params, gn_groups)
    err = float(jnp.max(jnp.abs(out - ref)))
    # Tolerance accounts for bf16 MXU operands + differing accumulation order
    # between the fused kernel and the unfused reference (same MXU numerics).
    assert jnp.allclose(out, ref, atol=5e-3, rtol=5e-3), err

    print("KERNEL_OK")
</pallas_src>

<mosaic_0001>
module attributes {stable_mosaic.version = 11 : i64} {
  func.func @_decoder_kernel(%arg0: i32, %arg1: memref<1x128x3xf32, #tpu.memory_space<vmem>>, %arg2: memref<1x64x1xf32, #tpu.memory_space<vmem>>, %arg3: memref<520x1xf32, #tpu.memory_space<vmem>>, %arg4: memref<8x8xf32, #tpu.memory_space<vmem>>, %arg5: memref<16x16xf32, #tpu.memory_space<vmem>>, %arg6: memref<32x32xf32, #tpu.memory_space<vmem>>, %arg7: memref<64x64xf32, #tpu.memory_space<vmem>>, %arg8: memref<64x3xbf16, #tpu.memory_space<vmem>>, %arg9: memref<32x64xbf16, #tpu.memory_space<vmem>>, %arg10: memref<32x32xbf16, #tpu.memory_space<vmem>>, %arg11: memref<32x64xbf16, #tpu.memory_space<vmem>>, %arg12: memref<16x32xbf16, #tpu.memory_space<vmem>>, %arg13: memref<16x16xbf16, #tpu.memory_space<vmem>>, %arg14: memref<16x32xbf16, #tpu.memory_space<vmem>>, %arg15: memref<8x16xbf16, #tpu.memory_space<vmem>>, %arg16: memref<8x8xbf16, #tpu.memory_space<vmem>>, %arg17: memref<8x16xbf16, #tpu.memory_space<vmem>>, %arg18: memref<8x8xbf16, #tpu.memory_space<vmem>>, %arg19: memref<8x8xbf16, #tpu.memory_space<vmem>>, %arg20: memref<1x8xbf16, #tpu.memory_space<vmem>>, %arg21: memref<1x1x128xf32, #tpu.memory_space<vmem>>) attributes {dimension_semantics = [#tpu.dimension_semantics<parallel>], iteration_bounds = array<i64: 2>, scalar_prefetch = 0 : i64, scratch_operands = 0 : i64, tpu.core_type = #tpu.core_type<tc>, window_params = [{transform_indices = @transform_0, window_bounds = array<i64: 1, 128, 3>}, {transform_indices = @transform_1, window_bounds = array<i64: 1, 64, 1>}, {pipeline_mode = #tpu.pipeline_mode<synchronous>, transform_indices = @transform_2, window_bounds = array<i64: 520, 1>}, {pipeline_mode = #tpu.pipeline_mode<synchronous>, transform_indices = @transform_3, window_bounds = array<i64: 8, 8>}, {pipeline_mode = #tpu.pipeline_mode<synchronous>, transform_indices = @transform_4, window_bounds = array<i64: 16, 16>}, {pipeline_mode = #tpu.pipeline_mode<synchronous>, transform_indices = @transform_5, window_bounds = array<i64: 32, 32>}, {pipeline_mode = #tpu.pipeline_mode<synchronous>, transform_indices = @transform_6, window_bounds = array<i64: 64, 64>}, {pipeline_mode = #tpu.pipeline_mode<synchronous>, transform_indices = @transform_7, window_bounds = array<i64: 64, 3>}, {pipeline_mode = #tpu.pipeline_mode<synchronous>, transform_indices = @transform_8, window_bounds = array<i64: 32, 64>}, {pipeline_mode = #tpu.pipeline_mode<synchronous>, transform_indices = @transform_9, window_bounds = array<i64: 32, 32>}, {pipeline_mode = #tpu.pipeline_mode<synchronous>, transform_indices = @transform_10, window_bounds = array<i64: 32, 64>}, {pipeline_mode = #tpu.pipeline_mode<synchronous>, transform_indices = @transform_11, window_bounds = array<i64: 16, 32>}, {pipeline_mode = #tpu.pipeline_mode<synchronous>, transform_indices = @transform_12, window_bounds = array<i64: 16, 16>}, {pipeline_mode = #tpu.pipeline_mode<synchronous>, transform_indices = @transform_13, window_bounds = array<i64: 16, 32>}, {pipeline_mode = #tpu.pipeline_mode<synchronous>, transform_indices = @transform_14, window_bounds = array<i64: 8, 16>}, {pipeline_mode = #tpu.pipeline_mode<synchronous>, transform_indices = @transform_15, window_bounds = array<i64: 8, 8>}, {pipeline_mode = #tpu.pipeline_mode<synchronous>, transform_indices = @transform_16, window_bounds = array<i64: 8, 16>}, {pipeline_mode = #tpu.pipeline_mode<synchronous>, transform_indices = @transform_17, window_bounds = array<i64: 8, 8>}, {pipeline_mode = #tpu.pipeline_mode<synchronous>, transform_indices = @transform_18, window_bounds = array<i64: 8, 8>}, {pipeline_mode = #tpu.pipeline_mode<synchronous>, transform_indices = @transform_19, window_bounds = array<i64: 1, 8>}, {transform_indices = @transform_20, window_bounds = array<i64: 1, 1, 128>}]} {
    %c0 = arith.constant 0 : index
    %c0_0 = arith.constant 0 : index
    %0 = vector.load %arg8[%c0, %c0_0] : memref<64x3xbf16, #tpu.memory_space<vmem>>, vector<64x3xbf16>
    %c0_1 = arith.constant 0 : index
    %c0_2 = arith.constant 0 : index
    %c0_3 = arith.constant 0 : index
    %1 = vector.load %arg1[%c0_1, %c0_2, %c0_3] : memref<1x128x3xf32, #tpu.memory_space<vmem>>, vector<1x128x3xf32>
    %2 = vector.shape_cast %1 : vector<1x128x3xf32> to vector<128x3xf32>
    %3 = arith.truncf %2 : vector<128x3xf32> to vector<128x3xbf16>
    %cst = arith.constant dense<0.000000e+00> : vector<64x128xf32>
    %4 = tpu.matmul %0, %3, %cst {dimension_numbers = #tpu.dot_dimension_numbers<[1], [1], [0], [0], [0, 0, 1, 0], [], []>} : vector<64x3xbf16>, vector<128x3xbf16>, vector<64x128xf32> -> vector<64x128xf32>
    %c0_4 = arith.constant 0 : index
    %c0_5 = arith.constant 0 : index
    %c0_6 = arith.constant 0 : index
    %5 = vector.load %arg2[%c0_4, %c0_5, %c0_6] : memref<1x64x1xf32, #tpu.memory_space<vmem>>, vector<1x64x1xf32>
    %6 = vector.shape_cast %5 : vector<1x64x1xf32> to vector<64x1xf32>
    %7 = vector.broadcast %6 : vector<64x1xf32> to vector<64x128xf32>
    %8 = arith.addf %4, %7 : vector<64x128xf32>
    %cst_7 = arith.constant dense<0.000000e+00> : vector<64xf32>
    %9 = vector.multi_reduction <add>, %8, %cst_7 [1] : vector<64x128xf32> to vector<64xf32>
    %10 = vector.shape_cast %9 : vector<64xf32> to vector<64x1xf32>
    %11 = arith.mulf %8, %8 : vector<64x128xf32>
    %cst_8 = arith.constant dense<0.000000e+00> : vector<64xf32>
    %12 = vector.multi_reduction <add>, %11, %cst_8 [1] : vector<64x128xf32> to vector<64xf32>
    %13 = vector.shape_cast %12 : vector<64xf32> to vector<64x1xf32>
    %c0_9 = arith.constant 0 : index
    %c0_10 = arith.constant 0 : index
    %14 = vector.load %arg7[%c0_9, %c0_10] : memref<64x64xf32, #tpu.memory_space<vmem>>, vector<64x64xf32>
    %cst_11 = arith.constant dense<0.000000e+00> : vector<64x1xf32>
    %15 = tpu.matmul %14, %10, %cst_11 {dimension_numbers = #tpu.dot_dimension_numbers<[1], [0], [0], [1], [0, 0, 1, 1], [], []>, precision = #tpu.contract_precision<fp32>} : vector<64x64xf32>, vector<64x1xf32>, vector<64x1xf32> -> vector<64x1xf32>
    %cst_12 = arith.constant dense<0.000000e+00> : vector<64x1xf32>
    %16 = tpu.matmul %14, %13, %cst_12 {dimension_numbers = #tpu.dot_dimension_numbers<[1], [0], [0], [1], [0, 0, 1, 1], [], []>, precision = #tpu.contract_precision<fp32>} : vector<64x64xf32>, vector<64x1xf32>, vector<64x1xf32> -> vector<64x1xf32>
    %cst_13 = arith.constant 1.024000e+03 : f32
    %17 = vector.broadcast %cst_13 : f32 to vector<64x1xf32>
    %18 = arith.divf %15, %17 : vector<64x1xf32>
    %cst_14 = arith.constant 1.024000e+03 : f32
    %19 = vector.broadcast %cst_14 : f32 to vector<64x1xf32>
    %20 = arith.divf %16, %19 : vector<64x1xf32>
    %21 = arith.mulf %18, %18 : vector<64x1xf32>
    %22 = arith.subf %20, %21 : vector<64x1xf32>
    %cst_15 = arith.constant 0.000000e+00 : f32
    %23 = vector.broadcast %cst_15 : f32 to vector<64x1xf32>
    %24 = arith.maximumf %22, %23 : vector<64x1xf32>
    %cst_16 = arith.constant 9.99999974E-6 : f32
    %25 = vector.broadcast %cst_16 : f32 to vector<64x1xf32>
    %26 = arith.addf %24, %25 : vector<64x1xf32>
    %27 = math.rsqrt %26 : vector<64x1xf32>
    %c0_17 = arith.constant 0 : index
    %c0_18 = arith.constant 0 : index
    %28 = vector.load %arg3[%c0_17, %c0_18] : memref<520x1xf32, #tpu.memory_space<vmem>>, vector<64x1xf32>
    %29 = arith.mulf %28, %27 : vector<64x1xf32>
    %c64 = arith.constant 64 : index
    %c0_19 = arith.constant 0 : index
    %30 = vector.load %arg3[%c64, %c0_19] : memref<520x1xf32, #tpu.memory_space<vmem>>, vector<64x1xf32>
    %31 = arith.mulf %18, %29 : vector<64x1xf32>
    %32 = arith.subf %30, %31 : vector<64x1xf32>
    %33 = vector.broadcast %29 : vector<64x1xf32> to vector<64x128xf32>
    %34 = arith.mulf %8, %33 : vector<64x128xf32>
    %35 = vector.broadcast %32 : vector<64x1xf32> to vector<64x128xf32>
    %36 = arith.addf %34, %35 : vector<64x128xf32>
    %cst_20 = arith.constant 0.000000e+00 : f32
    %37 = vector.broadcast %cst_20 : f32 to vector<64x128xf32>
    %38 = arith.maximumf %36, %37 : vector<64x128xf32>
    %39 = arith.truncf %38 : vector<64x128xf32> to vector<64x128xbf16>
    %c0_21 = arith.constant 0 : index
    %c0_22 = arith.constant 0 : index
    %40 = vector.load %arg9[%c0_21, %c0_22] : memref<32x64xbf16, #tpu.memory_space<vmem>>, vector<32x64xbf16>
    %cst_23 = arith.constant dense<0.000000e+00> : vector<32x128xf32>
    %41 = tpu.matmul %40, %39, %cst_23 {dimension_numbers = #tpu.dot_dimension_numbers<[1], [0], [0], [1], [0, 0, 1, 1], [], []>} : vector<32x64xbf16>, vector<64x128xbf16>, vector<32x128xf32> -> vector<32x128xf32>
    %c128 = arith.constant 128 : index
    %c0_24 = arith.constant 0 : index
    %42 = vector.load %arg3[%c128, %c0_24] : memref<520x1xf32, #tpu.memory_space<vmem>>, vector<32x1xf32>
    %43 = vector.broadcast %42 : vector<32x1xf32> to vector<32x128xf32>
    %44 = arith.addf %41, %43 : vector<32x128xf32>
    %cst_25 = arith.constant dense<0.000000e+00> : vector<32xf32>
    %45 = vector.multi_reduction <add>, %44, %cst_25 [1] : vector<32x128xf32> to vector<32xf32>
    %46 = vector.shape_cast %45 : vector<32xf32> to vector<32x1xf32>
    %47 = arith.mulf %44, %44 : vector<32x128xf32>
    %cst_26 = arith.constant dense<0.000000e+00> : vector<32xf32>
    %48 = vector.multi_reduction <add>, %47, %cst_26 [1] : vector<32x128xf32> to vector<32xf32>
    %49 = vector.shape_cast %48 : vector<32xf32> to vector<32x1xf32>
    %c0_27 = arith.constant 0 : index
    %c0_28 = arith.constant 0 : index
    %50 = vector.load %arg6[%c0_27, %c0_28] : memref<32x32xf32, #tpu.memory_space<vmem>>, vector<32x32xf32>
    %cst_29 = arith.constant dense<0.000000e+00> : vector<32x1xf32>
    %51 = tpu.matmul %50, %46, %cst_29 {dimension_numbers = #tpu.dot_dimension_numbers<[1], [0], [0], [1], [0, 0, 1, 1], [], []>, precision = #tpu.contract_precision<fp32>} : vector<32x32xf32>, vector<32x1xf32>, vector<32x1xf32> -> vector<32x1xf32>
    %cst_30 = arith.constant dense<0.000000e+00> : vector<32x1xf32>
    %52 = tpu.matmul %50, %49, %cst_30 {dimension_numbers = #tpu.dot_dimension_numbers<[1], [0], [0], [1], [0, 0, 1, 1], [], []>, precision = #tpu.contract_precision<fp32>} : vector<32x32xf32>, vector<32x1xf32>, vector<32x1xf32> -> vector<32x1xf32>
    %cst_31 = arith.constant 5.120000e+02 : f32
    %53 = vector.broadcast %cst_31 : f32 to vector<32x1xf32>
    %54 = arith.divf %51, %53 : vector<32x1xf32>
    %cst_32 = arith.constant 5.120000e+02 : f32
    %55 = vector.broadcast %cst_32 : f32 to vector<32x1xf32>
    %56 = arith.divf %52, %55 : vector<32x1xf32>
    %57 = arith.mulf %54, %54 : vector<32x1xf32>
    %58 = arith.subf %56, %57 : vector<32x1xf32>
    %cst_33 = arith.constant 0.000000e+00 : f32
    %59 = vector.broadcast %cst_33 : f32 to vector<32x1xf32>
    %60 = arith.maximumf %58, %59 : vector<32x1xf32>
    %cst_34 = arith.constant 9.99999974E-6 : f32
    %61 = vector.broadcast %cst_34 : f32 to vector<32x1xf32>
    %62 = arith.addf %60, %61 : vector<32x1xf32>
    %63 = math.rsqrt %62 : vector<32x1xf32>
    %c160 = arith.constant 160 : index
    %c0_35 = arith.constant 0 : index
    %64 = vector.load %arg3[%c160, %c0_35] : memref<520x1xf32, #tpu.memory_space<vmem>>, vector<32x1xf32>
    %65 = arith.mulf %64, %63 : vector<32x1xf32>
    %c192 = arith.constant 192 : index
    %c0_36 = arith.constant 0 : index
    %66 = vector.load %arg3[%c192, %c0_36] : memref<520x1xf32, #tpu.memory_space<vmem>>, vector<32x1xf32>
    %67 = arith.mulf %54, %65 : vector<32x1xf32>
    %68 = arith.subf %66, %67 : vector<32x1xf32>
    %69 = vector.broadcast %65 : vector<32x1xf32> to vector<32x128xf32>
    %70 = arith.mulf %44, %69 : vector<32x128xf32>
    %71 = vector.broadcast %68 : vector<32x1xf32> to vector<32x128xf32>
    %72 = arith.addf %70, %71 : vector<32x128xf32>
    %cst_37 = arith.constant 0.000000e+00 : f32
    %73 = vector.broadcast %cst_37 : f32 to vector<32x128xf32>
    %74 = arith.maximumf %72, %73 : vector<32x128xf32>
    %75 = arith.truncf %74 : vector<32x128xf32> to vector<32x128xbf16>
    %c0_38 = arith.constant 0 : index
    %c0_39 = arith.constant 0 : index
    %76 = vector.load %arg10[%c0_38, %c0_39] : memref<32x32xbf16, #tpu.memory_space<vmem>>, vector<32x32xbf16>
    %cst_40 = arith.constant dense<0.000000e+00> : vector<32x128xf32>
    %77 = tpu.matmul %76, %75, %cst_40 {dimension_numbers = #tpu.dot_dimension_numbers<[1], [0], [0], [1], [0, 0, 1, 1], [], []>} : vector<32x32xbf16>, vector<32x128xbf16>, vector<32x128xf32> -> vector<32x128xf32>
    %c224 = arith.constant 224 : index
    %c0_41 = arith.constant 0 : index
    %78 = vector.load %arg3[%c224, %c0_41] : memref<520x1xf32, #tpu.memory_space<vmem>>, vector<32x1xf32>
    %79 = vector.broadcast %78 : vector<32x1xf32> to vector<32x128xf32>
    %80 = arith.addf %77, %79 : vector<32x128xf32>
    %81 = arith.truncf %8 : vector<64x128xf32> to vector<64x128xbf16>
    %c0_42 = arith.constant 0 : index
    %c0_43 = arith.constant 0 : index
    %82 = vector.load %arg11[%c0_42, %c0_43] : memref<32x64xbf16, #tpu.memory_space<vmem>>, vector<32x64xbf16>
    %cst_44 = arith.constant dense<0.000000e+00> : vector<32x128xf32>
    %83 = tpu.matmul %82, %81, %cst_44 {dimension_numbers = #tpu.dot_dimension_numbers<[1], [0], [0], [1], [0, 0, 1, 1], [], []>} : vector<32x64xbf16>, vector<64x128xbf16>, vector<32x128xf32> -> vector<32x128xf32>
    %84 = arith.addf %83, %80 : vector<32x128xf32>
    %cst_45 = arith.constant dense<0.000000e+00> : vector<32xf32>
    %85 = vector.multi_reduction <add>, %84, %cst_45 [1] : vector<32x128xf32> to vector<32xf32>
    %86 = vector.shape_cast %85 : vector<32xf32> to vector<32x1xf32>
    %87 = arith.mulf %84, %84 : vector<32x128xf32>
    %cst_46 = arith.constant dense<0.000000e+00> : vector<32xf32>
    %88 = vector.multi_reduction <add>, %87, %cst_46 [1] : vector<32x128xf32> to vector<32xf32>
    %89 = vector.shape_cast %88 : vector<32xf32> to vector<32x1xf32>
    %c0_47 = arith.constant 0 : index
    %c0_48 = arith.constant 0 : index
    %90 = vector.load %arg6[%c0_47, %c0_48] : memref<32x32xf32, #tpu.memory_space<vmem>>, vector<32x32xf32>
    %cst_49 = arith.constant dense<0.000000e+00> : vector<32x1xf32>
    %91 = tpu.matmul %90, %86, %cst_49 {dimension_numbers = #tpu.dot_dimension_numbers<[1], [0], [0], [1], [0, 0, 1, 1], [], []>, precision = #tpu.contract_precision<fp32>} : vector<32x32xf32>, vector<32x1xf32>, vector<32x1xf32> -> vector<32x1xf32>
    %cst_50 = arith.constant dense<0.000000e+00> : vector<32x1xf32>
    %92 = tpu.matmul %90, %89, %cst_50 {dimension_numbers = #tpu.dot_dimension_numbers<[1], [0], [0], [1], [0, 0, 1, 1], [], []>, precision = #tpu.contract_precision<fp32>} : vector<32x32xf32>, vector<32x1xf32>, vector<32x1xf32> -> vector<32x1xf32>
    %cst_51 = arith.constant 5.120000e+02 : f32
    %93 = vector.broadcast %cst_51 : f32 to vector<32x1xf32>
    %94 = arith.divf %91, %93 : vector<32x1xf32>
    %cst_52 = arith.constant 5.120000e+02 : f32
    %95 = vector.broadcast %cst_52 : f32 to vector<32x1xf32>
    %96 = arith.divf %92, %95 : vector<32x1xf32>
    %97 = arith.mulf %94, %94 : vector<32x1xf32>
    %98 = arith.subf %96, %97 : vector<32x1xf32>
    %cst_53 = arith.constant 0.000000e+00 : f32
    %99 = vector.broadcast %cst_53 : f32 to vector<32x1xf32>
    %100 = arith.maximumf %98, %99 : vector<32x1xf32>
    %cst_54 = arith.constant 9.99999974E-6 : f32
    %101 = vector.broadcast %cst_54 : f32 to vector<32x1xf32>
    %102 = arith.addf %100, %101 : vector<32x1xf32>
    %103 = math.rsqrt %102 : vector<32x1xf32>
    %c256 = arith.constant 256 : index
    %c0_55 = arith.constant 0 : index
    %104 = vector.load %arg3[%c256, %c0_55] : memref<520x1xf32, #tpu.memory_space<vmem>>, vector<32x1xf32>
    %105 = arith.mulf %104, %103 : vector<32x1xf32>
    %c288 = arith.constant 288 : index
    %c0_56 = arith.constant 0 : index
    %106 = vector.load %arg3[%c288, %c0_56] : memref<520x1xf32, #tpu.memory_space<vmem>>, vector<32x1xf32>
    %107 = arith.mulf %94, %105 : vector<32x1xf32>
    %108 = arith.subf %106, %107 : vector<32x1xf32>
    %109 = vector.broadcast %105 : vector<32x1xf32> to vector<32x128xf32>
    %110 = arith.mulf %84, %109 : vector<32x128xf32>
    %111 = vector.broadcast %108 : vector<32x1xf32> to vector<32x128xf32>
    %112 = arith.addf %110, %111 : vector<32x128xf32>
    %cst_57 = arith.constant 0.000000e+00 : f32
    %113 = vector.broadcast %cst_57 : f32 to vector<32x128xf32>
    %114 = arith.maximumf %112, %113 : vector<32x128xf32>
    %115 = arith.truncf %114 : vector<32x128xf32> to vector<32x128xbf16>
    %c0_58 = arith.constant 0 : index
    %c0_59 = arith.constant 0 : index
    %116 = vector.load %arg12[%c0_58, %c0_59] : memref<16x32xbf16, #tpu.memory_space<vmem>>, vector<16x32xbf16>
    %cst_60 = arith.constant dense<0.000000e+00> : vector<16x128xf32>
    %117 = tpu.matmul %116, %115, %cst_60 {dimension_numbers = #tpu.dot_dimension_numbers<[1], [0], [0], [1], [0, 0, 1, 1], [], []>} : vector<16x32xbf16>, vector<32x128xbf16>, vector<16x128xf32> -> vector<16x128xf32>
    %c320 = arith.constant 320 : index
    %c0_61 = arith.constant 0 : index
    %118 = vector.load %arg3[%c320, %c0_61] : memref<520x1xf32, #tpu.memory_space<vmem>>, vector<16x1xf32>
    %119 = vector.broadcast %118 : vector<16x1xf32> to vector<16x128xf32>
    %120 = arith.addf %117, %119 : vector<16x128xf32>
    %cst_62 = arith.constant dense<0.000000e+00> : vector<16xf32>
    %121 = vector.multi_reduction <add>, %120, %cst_62 [1] : vector<16x128xf32> to vector<16xf32>
    %122 = vector.shape_cast %121 : vector<16xf32> to vector<16x1xf32>
    %123 = arith.mulf %120, %120 : vector<16x128xf32>
    %cst_63 = arith.constant dense<0.000000e+00> : vector<16xf32>
    %124 = vector.multi_reduction <add>, %123, %cst_63 [1] : vector<16x128xf32> to vector<16xf32>
    %125 = vector.shape_cast %124 : vector<16xf32> to vector<16x1xf32>
    %c0_64 = arith.constant 0 : index
    %c0_65 = arith.constant 0 : index
    %126 = vector.load %arg5[%c0_64, %c0_65] : memref<16x16xf32, #tpu.memory_space<vmem>>, vector<16x16xf32>
    %cst_66 = arith.constant dense<0.000000e+00> : vector<16x1xf32>
    %127 = tpu.matmul %126, %122, %cst_66 {dimension_numbers = #tpu.dot_dimension_numbers<[1], [0], [0], [1], [0, 0, 1, 1], [], []>, precision = #tpu.contract_precision<fp32>} : vector<16x16xf32>, vector<16x1xf32>, vector<16x1xf32> -> vector<16x1xf32>
    %cst_67 = arith.constant dense<0.000000e+00> : vector<16x1xf32>
    %128 = tpu.matmul %126, %125, %cst_67 {dimension_numbers = #tpu.dot_dimension_numbers<[1], [0], [0], [1], [0, 0, 1, 1], [], []>, precision = #tpu.contract_precision<fp32>} : vector<16x16xf32>, vector<16x1xf32>, vector<16x1xf32> -> vector<16x1xf32>
    %cst_68 = arith.constant 2.560000e+02 : f32
    %129 = vector.broadcast %cst_68 : f32 to vector<16x1xf32>
    %130 = arith.divf %127, %129 : vector<16x1xf32>
    %cst_69 = arith.constant 2.560000e+02 : f32
    %131 = vector.broadcast %cst_69 : f32 to vector<16x1xf32>
    %132 = arith.divf %128, %131 : vector<16x1xf32>
    %133 = arith.mulf %130, %130 : vector<16x1xf32>
    %134 = arith.subf %132, %133 : vector<16x1xf32>
    %cst_70 = arith.constant 0.000000e+00 : f32
    %135 = vector.broadcast %cst_70 : f32 to vector<16x1xf32>
    %136 = arith.maximumf %134, %135 : vector<16x1xf32>
    %cst_71 = arith.constant 9.99999974E-6 : f32
    %137 = vector.broadcast %cst_71 : f32 to vector<16x1xf32>
    %138 = arith.addf %136, %137 : vector<16x1xf32>
    %139 = math.rsqrt %138 : vector<16x1xf32>
    %c336 = arith.constant 336 : index
    %c0_72 = arith.constant 0 : index
    %140 = vector.load %arg3[%c336, %c0_72] : memref<520x1xf32, #tpu.memory_space<vmem>>, vector<16x1xf32>
    %141 = arith.mulf %140, %139 : vector<16x1xf32>
    %c352 = arith.constant 352 : index
    %c0_73 = arith.constant 0 : index
    %142 = vector.load %arg3[%c352, %c0_73] : memref<520x1xf32, #tpu.memory_space<vmem>>, vector<16x1xf32>
    %143 = arith.mulf %130, %141 : vector<16x1xf32>
    %144 = arith.subf %142, %143 : vector<16x1xf32>
    %145 = vector.broadcast %141 : vector<16x1xf32> to vector<16x128xf32>
    %146 = arith.mulf %120, %145 : vector<16x128xf32>
    %147 = vector.broadcast %144 : vector<16x1xf32> to vector<16x128xf32>
    %148 = arith.addf %146, %147 : vector<16x128xf32>
    %cst_74 = arith.constant 0.000000e+00 : f32
    %149 = vector.broadcast %cst_74 : f32 to vector<16x128xf32>
    %150 = arith.maximumf %148, %149 : vector<16x128xf32>
    %151 = arith.truncf %150 : vector<16x128xf32> to vector<16x128xbf16>
    %c0_75 = arith.constant 0 : index
    %c0_76 = arith.constant 0 : index
    %152 = vector.load %arg13[%c0_75, %c0_76] : memref<16x16xbf16, #tpu.memory_space<vmem>>, vector<16x16xbf16>
    %cst_77 = arith.constant dense<0.000000e+00> : vector<16x128xf32>
    %153 = tpu.matmul %152, %151, %cst_77 {dimension_numbers = #tpu.dot_dimension_numbers<[1], [0], [0], [1], [0, 0, 1, 1], [], []>} : vector<16x16xbf16>, vector<16x128xbf16>, vector<16x128xf32> -> vector<16x128xf32>
    %c368 = arith.constant 368 : index
    %c0_78 = arith.constant 0 : index
    %154 = vector.load %arg3[%c368, %c0_78] : memref<520x1xf32, #tpu.memory_space<vmem>>, vector<16x1xf32>
    %155 = vector.broadcast %154 : vector<16x1xf32> to vector<16x128xf32>
    %156 = arith.addf %153, %155 : vector<16x128xf32>
    %157 = arith.truncf %84 : vector<32x128xf32> to vector<32x128xbf16>
    %c0_79 = arith.constant 0 : index
    %c0_80 = arith.constant 0 : index
    %158 = vector.load %arg14[%c0_79, %c0_80] : memref<16x32xbf16, #tpu.memory_space<vmem>>, vector<16x32xbf16>
    %cst_81 = arith.constant dense<0.000000e+00> : vector<16x128xf32>
    %159 = tpu.matmul %158, %157, %cst_81 {dimension_numbers = #tpu.dot_dimension_numbers<[1], [0], [0], [1], [0, 0, 1, 1], [], []>} : vector<16x32xbf16>, vector<32x128xbf16>, vector<16x128xf32> -> vector<16x128xf32>
    %160 = arith.addf %159, %156 : vector<16x128xf32>
    %cst_82 = arith.constant dense<0.000000e+00> : vector<16xf32>
    %161 = vector.multi_reduction <add>, %160, %cst_82 [1] : vector<16x128xf32> to vector<16xf32>
    %162 = vector.shape_cast %161 : vector<16xf32> to vector<16x1xf32>
    %163 = arith.mulf %160, %160 : vector<16x128xf32>
    %cst_83 = arith.constant dense<0.000000e+00> : vector<16xf32>
    %164 = vector.multi_reduction <add>, %163, %cst_83 [1] : vector<16x128xf32> to vector<16xf32>
    %165 = vector.shape_cast %164 : vector<16xf32> to vector<16x1xf32>
    %c0_84 = arith.constant 0 : index
    %c0_85 = arith.constant 0 : index
    %166 = vector.load %arg5[%c0_84, %c0_85] : memref<16x16xf32, #tpu.memory_space<vmem>>, vector<16x16xf32>
    %cst_86 = arith.constant dense<0.000000e+00> : vector<16x1xf32>
    %167 = tpu.matmul %166, %162, %cst_86 {dimension_numbers = #tpu.dot_dimension_numbers<[1], [0], [0], [1], [0, 0, 1, 1], [], []>, precision = #tpu.contract_precision<fp32>} : vector<16x16xf32>, vector<16x1xf32>, vector<16x1xf32> -> vector<16x1xf32>
    %cst_87 = arith.constant dense<0.000000e+00> : vector<16x1xf32>
    %168 = tpu.matmul %166, %165, %cst_87 {dimension_numbers = #tpu.dot_dimension_numbers<[1], [0], [0], [1], [0, 0, 1, 1], [], []>, precision = #tpu.contract_precision<fp32>} : vector<16x16xf32>, vector<16x1xf32>, vector<16x1xf32> -> vector<16x1xf32>
    %cst_88 = arith.constant 2.560000e+02 : f32
    %169 = vector.broadcast %cst_88 : f32 to vector<16x1xf32>
    %170 = arith.divf %167, %169 : vector<16x1xf32>
    %cst_89 = arith.constant 2.560000e+02 : f32
    %171 = vector.broadcast %cst_89 : f32 to vector<16x1xf32>
    %172 = arith.divf %168, %171 : vector<16x1xf32>
    %173 = arith.mulf %170, %170 : vector<16x1xf32>
    %174 = arith.subf %172, %173 : vector<16x1xf32>
    %cst_90 = arith.constant 0.000000e+00 : f32
    %175 = vector.broadcast %cst_90 : f32 to vector<16x1xf32>
    %176 = arith.maximumf %174, %175 : vector<16x1xf32>
    %cst_91 = arith.constant 9.99999974E-6 : f32
    %177 = vector.broadcast %cst_91 : f32 to vector<16x1xf32>
    %178 = arith.addf %176, %177 : vector<16x1xf32>
    %179 = math.rsqrt %178 : vector<16x1xf32>
    %c384 = arith.constant 384 : index
    %c0_92 = arith.constant 0 : index
    %180 = vector.load %arg3[%c384, %c0_92] : memref<520x1xf32, #tpu.memory_space<vmem>>, vector<16x1xf32>
    %181 = arith.mulf %180, %179 : vector<16x1xf32>
    %c400 = arith.constant 400 : index
    %c0_93 = arith.constant 0 : index
    %182 = vector.load %arg3[%c400, %c0_93] : memref<520x1xf32, #tpu.memory_space<vmem>>, vector<16x1xf32>
    %183 = arith.mulf %170, %181 : vector<16x1xf32>
    %184 = arith.subf %182, %183 : vector<16x1xf32>
    %185 = vector.broadcast %181 : vector<16x1xf32> to vector<16x128xf32>
    %186 = arith.mulf %160, %185 : vector<16x128xf32>
    %187 = vector.broadcast %184 : vector<16x1xf32> to vector<16x128xf32>
    %188 = arith.addf %186, %187 : vector<16x128xf32>
    %cst_94 = arith.constant 0.000000e+00 : f32
    %189 = vector.broadcast %cst_94 : f32 to vector<16x128xf32>
    %190 = arith.maximumf %188, %189 : vector<16x128xf32>
    %191 = arith.truncf %190 : vector<16x128xf32> to vector<16x128xbf16>
    %c0_95 = arith.constant 0 : index
    %c0_96 = arith.constant 0 : index
    %192 = vector.load %arg15[%c0_95, %c0_96] : memref<8x16xbf16, #tpu.memory_space<vmem>>, vector<8x16xbf16>
    %cst_97 = arith.constant dense<0.000000e+00> : vector<8x128xf32>
    %193 = tpu.matmul %192, %191, %cst_97 {dimension_numbers = #tpu.dot_dimension_numbers<[1], [0], [0], [1], [0, 0, 1, 1], [], []>} : vector<8x16xbf16>, vector<16x128xbf16>, vector<8x128xf32> -> vector<8x128xf32>
    %c416 = arith.constant 416 : index
    %c0_98 = arith.constant 0 : index
    %194 = vector.load %arg3[%c416, %c0_98] : memref<520x1xf32, #tpu.memory_space<vmem>>, vector<8x1xf32>
    %195 = vector.broadcast %194 : vector<8x1xf32> to vector<8x128xf32>
    %196 = arith.addf %193, %195 : vector<8x128xf32>
    %cst_99 = arith.constant dense<0.000000e+00> : vector<8xf32>
    %197 = vector.multi_reduction <add>, %196, %cst_99 [1] : vector<8x128xf32> to vector<8xf32>
    %198 = vector.shape_cast %197 : vector<8xf32> to vector<8x1xf32>
    %199 = arith.mulf %196, %196 : vector<8x128xf32>
    %cst_100 = arith.constant dense<0.000000e+00> : vector<8xf32>
    %200 = vector.multi_reduction <add>, %199, %cst_100 [1] : vector<8x128xf32> to vector<8xf32>
    %201 = vector.shape_cast %200 : vector<8xf32> to vector<8x1xf32>
    %c0_101 = arith.constant 0 : index
    %c0_102 = arith.constant 0 : index
    %202 = vector.load %arg4[%c0_101, %c0_102] : memref<8x8xf32, #tpu.memory_space<vmem>>, vector<8x8xf32>
    %cst_103 = arith.constant dense<0.000000e+00> : vector<8x1xf32>
    %203 = tpu.matmul %202, %198, %cst_103 {dimension_numbers = #tpu.dot_dimension_numbers<[1], [0], [0], [1], [0, 0, 1, 1], [], []>, precision = #tpu.contract_precision<fp32>} : vector<8x8xf32>, vector<8x1xf32>, vector<8x1xf32> -> vector<8x1xf32>
    %cst_104 = arith.constant dense<0.000000e+00> : vector<8x1xf32>
    %204 = tpu.matmul %202, %201, %cst_104 {dimension_numbers = #tpu.dot_dimension_numbers<[1], [0], [0], [1], [0, 0, 1, 1], [], []>, precision = #tpu.contract_precision<fp32>} : vector<8x8xf32>, vector<8x1xf32>, vector<8x1xf32> -> vector<8x1xf32>
    %cst_105 = arith.constant 1.280000e+02 : f32
    %205 = vector.broadcast %cst_105 : f32 to vector<8x1xf32>
    %206 = arith.divf %203, %205 : vector<8x1xf32>
    %cst_106 = arith.constant 1.280000e+02 : f32
    %207 = vector.broadcast %cst_106 : f32 to vector<8x1xf32>
    %208 = arith.divf %204, %207 : vector<8x1xf32>
    %209 = arith.mulf %206, %206 : vector<8x1xf32>
    %210 = arith.subf %208, %209 : vector<8x1xf32>
    %cst_107 = arith.constant 0.000000e+00 : f32
    %211 = vector.broadcast %cst_107 : f32 to vector<8x1xf32>
    %212 = arith.maximumf %210, %211 : vector<8x1xf32>
    %cst_108 = arith.constant 9.99999974E-6 : f32
    %213 = vector.broadcast %cst_108 : f32 to vector<8x1xf32>
    %214 = arith.addf %212, %213 : vector<8x1xf32>
    %215 = math.rsqrt %214 : vector<8x1xf32>
    %c424 = arith.constant 424 : index
    %c0_109 = arith.constant 0 : index
    %216 = vector.load %arg3[%c424, %c0_109] : memref<520x1xf32, #tpu.memory_space<vmem>>, vector<8x1xf32>
    %217 = arith.mulf %216, %215 : vector<8x1xf32>
    %c432 = arith.constant 432 : index
    %c0_110 = arith.constant 0 : index
    %218 = vector.load %arg3[%c432, %c0_110] : memref<520x1xf32, #tpu.memory_space<vmem>>, vector<8x1xf32>
    %219 = arith.mulf %206, %217 : vector<8x1xf32>
    %220 = arith.subf %218, %219 : vector<8x1xf32>
    %221 = vector.broadcast %217 : vector<8x1xf32> to vector<8x128xf32>
    %222 = arith.mulf %196, %221 : vector<8x128xf32>
    %223 = vector.broadcast %220 : vector<8x1xf32> to vector<8x128xf32>
    %224 = arith.addf %222, %223 : vector<8x128xf32>
    %cst_111 = arith.constant 0.000000e+00 : f32
    %225 = vector.broadcast %cst_111 : f32 to vector<8x128xf32>
    %226 = arith.maximumf %224, %225 : vector<8x128xf32>
    %227 = arith.truncf %226 : vector<8x128xf32> to vector<8x128xbf16>
    %c0_112 = arith.constant 0 : index
    %c0_113 = arith.constant 0 : index
    %228 = vector.load %arg16[%c0_112, %c0_113] : memref<8x8xbf16, #tpu.memory_space<vmem>>, vector<8x8xbf16>
    %cst_114 = arith.constant dense<0.000000e+00> : vector<8x128xf32>
    %229 = tpu.matmul %228, %227, %cst_114 {dimension_numbers = #tpu.dot_dimension_numbers<[1], [0], [0], [1], [0, 0, 1, 1], [], []>} : vector<8x8xbf16>, vector<8x128xbf16>, vector<8x128xf32> -> vector<8x128xf32>
    %c440 = arith.constant 440 : index
    %c0_115 = arith.constant 0 : index
    %230 = vector.load %arg3[%c440, %c0_115] : memref<520x1xf32, #tpu.memory_space<vmem>>, vector<8x1xf32>
    %231 = vector.broadcast %230 : vector<8x1xf32> to vector<8x128xf32>
    %232 = arith.addf %229, %231 : vector<8x128xf32>
    %233 = arith.truncf %160 : vector<16x128xf32> to vector<16x128xbf16>
    %c0_116 = arith.constant 0 : index
    %c0_117 = arith.constant 0 : index
    %234 = vector.load %arg17[%c0_116, %c0_117] : memref<8x16xbf16, #tpu.memory_space<vmem>>, vector<8x16xbf16>
    %cst_118 = arith.constant dense<0.000000e+00> : vector<8x128xf32>
    %235 = tpu.matmul %234, %233, %cst_118 {dimension_numbers = #tpu.dot_dimension_numbers<[1], [0], [0], [1], [0, 0, 1, 1], [], []>} : vector<8x16xbf16>, vector<16x128xbf16>, vector<8x128xf32> -> vector<8x128xf32>
    %236 = arith.addf %235, %232 : vector<8x128xf32>
    %cst_119 = arith.constant dense<0.000000e+00> : vector<8xf32>
    %237 = vector.multi_reduction <add>, %236, %cst_119 [1] : vector<8x128xf32> to vector<8xf32>
    %238 = vector.shape_cast %237 : vector<8xf32> to vector<8x1xf32>
    %239 = arith.mulf %236, %236 : vector<8x128xf32>
    %cst_120 = arith.constant dense<0.000000e+00> : vector<8xf32>
    %240 = vector.multi_reduction <add>, %239, %cst_120 [1] : vector<8x128xf32> to vector<8xf32>
    %241 = vector.shape_cast %240 : vector<8xf32> to vector<8x1xf32>
    %c0_121 = arith.constant 0 : index
    %c0_122 = arith.constant 0 : index
    %242 = vector.load %arg4[%c0_121, %c0_122] : memref<8x8xf32, #tpu.memory_space<vmem>>, vector<8x8xf32>
    %cst_123 = arith.constant dense<0.000000e+00> : vector<8x1xf32>
    %243 = tpu.matmul %242, %238, %cst_123 {dimension_numbers = #tpu.dot_dimension_numbers<[1], [0], [0], [1], [0, 0, 1, 1], [], []>, precision = #tpu.contract_precision<fp32>} : vector<8x8xf32>, vector<8x1xf32>, vector<8x1xf32> -> vector<8x1xf32>
    %cst_124 = arith.constant dense<0.000000e+00> : vector<8x1xf32>
    %244 = tpu.matmul %242, %241, %cst_124 {dimension_numbers = #tpu.dot_dimension_numbers<[1], [0], [0], [1], [0, 0, 1, 1], [], []>, precision = #tpu.contract_precision<fp32>} : vector<8x8xf32>, vector<8x1xf32>, vector<8x1xf32> -> vector<8x1xf32>
    %cst_125 = arith.constant 1.280000e+02 : f32
    %245 = vector.broadcast %cst_125 : f32 to vector<8x1xf32>
    %246 = arith.divf %243, %245 : vector<8x1xf32>
    %cst_126 = arith.constant 1.280000e+02 : f32
    %247 = vector.broadcast %cst_126 : f32 to vector<8x1xf32>
    %248 = arith.divf %244, %247 : vector<8x1xf32>
    %249 = arith.mulf %246, %246 : vector<8x1xf32>
    %250 = arith.subf %248, %249 : vector<8x1xf32>
    %cst_127 = arith.constant 0.000000e+00 : f32
    %251 = vector.broadcast %cst_127 : f32 to vector<8x1xf32>
    %252 = arith.maximumf %250, %251 : vector<8x1xf32>
    %cst_128 = arith.constant 9.99999974E-6 : f32
    %253 = vector.broadcast %cst_128 : f32 to vector<8x1xf32>
    %254 = arith.addf %252, %253 : vector<8x1xf32>
    %255 = math.rsqrt %254 : vector<8x1xf32>
    %c448 = arith.constant 448 : index
    %c0_129 = arith.constant 0 : index
    %256 = vector.load %arg3[%c448, %c0_129] : memref<520x1xf32, #tpu.memory_space<vmem>>, vector<8x1xf32>
    %257 = arith.mulf %256, %255 : vector<8x1xf32>
    %c456 = arith.constant 456 : index
    %c0_130 = arith.constant 0 : index
    %258 = vector.load %arg3[%c456, %c0_130] : memref<520x1xf32, #tpu.memory_space<vmem>>, vector<8x1xf32>
    %259 = arith.mulf %246, %257 : vector<8x1xf32>
    %260 = arith.subf %258, %259 : vector<8x1xf32>
    %261 = vector.broadcast %257 : vector<8x1xf32> to vector<8x128xf32>
    %262 = arith.mulf %236, %261 : vector<8x128xf32>
    %263 = vector.broadcast %260 : vector<8x1xf32> to vector<8x128xf32>
    %264 = arith.addf %262, %263 : vector<8x128xf32>
    %cst_131 = arith.constant 0.000000e+00 : f32
    %265 = vector.broadcast %cst_131 : f32 to vector<8x128xf32>
    %266 = arith.maximumf %264, %265 : vector<8x128xf32>
    %267 = arith.truncf %266 : vector<8x128xf32> to vector<8x128xbf16>
    %c0_132 = arith.constant 0 : index
    %c0_133 = arith.constant 0 : index
    %268 = vector.load %arg18[%c0_132, %c0_133] : memref<8x8xbf16, #tpu.memory_space<vmem>>, vector<8x8xbf16>
    %cst_134 = arith.constant dense<0.000000e+00> : vector<8x128xf32>
    %269 = tpu.matmul %268, %267, %cst_134 {dimension_numbers = #tpu.dot_dimension_numbers<[1], [0], [0], [1], [0, 0, 1, 1], [], []>} : vector<8x8xbf16>, vector<8x128xbf16>, vector<8x128xf32> -> vector<8x128xf32>
    %c464 = arith.constant 464 : index
    %c0_135 = arith.constant 0 : index
    %270 = vector.load %arg3[%c464, %c0_135] : memref<520x1xf32, #tpu.memory_space<vmem>>, vector<8x1xf32>
    %271 = vector.broadcast %270 : vector<8x1xf32> to vector<8x128xf32>
    %272 = arith.addf %269, %271 : vector<8x128xf32>
    %cst_136 = arith.constant dense<0.000000e+00> : vector<8xf32>
    %273 = vector.multi_reduction <add>, %272, %cst_136 [1] : vector<8x128xf32> to vector<8xf32>
    %274 = vector.shape_cast %273 : vector<8xf32> to vector<8x1xf32>
    %275 = arith.mulf %272, %272 : vector<8x128xf32>
    %cst_137 = arith.constant dense<0.000000e+00> : vector<8xf32>
    %276 = vector.multi_reduction <add>, %275, %cst_137 [1] : vector<8x128xf32> to vector<8xf32>
    %277 = vector.shape_cast %276 : vector<8xf32> to vector<8x1xf32>
    %c0_138 = arith.constant 0 : index
    %c0_139 = arith.constant 0 : index
    %278 = vector.load %arg4[%c0_138, %c0_139] : memref<8x8xf32, #tpu.memory_space<vmem>>, vector<8x8xf32>
    %cst_140 = arith.constant dense<0.000000e+00> : vector<8x1xf32>
    %279 = tpu.matmul %278, %274, %cst_140 {dimension_numbers = #tpu.dot_dimension_numbers<[1], [0], [0], [1], [0, 0, 1, 1], [], []>, precision = #tpu.contract_precision<fp32>} : vector<8x8xf32>, vector<8x1xf32>, vector<8x1xf32> -> vector<8x1xf32>
    %cst_141 = arith.constant dense<0.000000e+00> : vector<8x1xf32>
    %280 = tpu.matmul %278, %277, %cst_141 {dimension_numbers = #tpu.dot_dimension_numbers<[1], [0], [0], [1], [0, 0, 1, 1], [], []>, precision = #tpu.contract_precision<fp32>} : vector<8x8xf32>, vector<8x1xf32>, vector<8x1xf32> -> vector<8x1xf32>
    %cst_142 = arith.constant 1.280000e+02 : f32
    %281 = vector.broadcast %cst_142 : f32 to vector<8x1xf32>
    %282 = arith.divf %279, %281 : vector<8x1xf32>
    %cst_143 = arith.constant 1.280000e+02 : f32
    %283 = vector.broadcast %cst_143 : f32 to vector<8x1xf32>
    %284 = arith.divf %280, %283 : vector<8x1xf32>
    %285 = arith.mulf %282, %282 : vector<8x1xf32>
    %286 = arith.subf %284, %285 : vector<8x1xf32>
    %cst_144 = arith.constant 0.000000e+00 : f32
    %287 = vector.broadcast %cst_144 : f32 to vector<8x1xf32>
    %288 = arith.maximumf %286, %287 : vector<8x1xf32>
    %cst_145 = arith.constant 9.99999974E-6 : f32
    %289 = vector.broadcast %cst_145 : f32 to vector<8x1xf32>
    %290 = arith.addf %288, %289 : vector<8x1xf32>
    %291 = math.rsqrt %290 : vector<8x1xf32>
    %c472 = arith.constant 472 : index
    %c0_146 = arith.constant 0 : index
    %292 = vector.load %arg3[%c472, %c0_146] : memref<520x1xf32, #tpu.memory_space<vmem>>, vector<8x1xf32>
    %293 = arith.mulf %292, %291 : vector<8x1xf32>
    %c480 = arith.constant 480 : index
    %c0_147 = arith.constant 0 : index
    %294 = vector.load %arg3[%c480, %c0_147] : memref<520x1xf32, #tpu.memory_space<vmem>>, vector<8x1xf32>
    %295 = arith.mulf %282, %293 : vector<8x1xf32>
    %296 = arith.subf %294, %295 : vector<8x1xf32>
    %297 = vector.broadcast %293 : vector<8x1xf32> to vector<8x128xf32>
    %298 = arith.mulf %272, %297 : vector<8x128xf32>
    %299 = vector.broadcast %296 : vector<8x1xf32> to vector<8x128xf32>
    %300 = arith.addf %298, %299 : vector<8x128xf32>
    %cst_148 = arith.constant 0.000000e+00 : f32
    %301 = vector.broadcast %cst_148 : f32 to vector<8x128xf32>
    %302 = arith.maximumf %300, %301 : vector<8x128xf32>
    %303 = arith.truncf %302 : vector<8x128xf32> to vector<8x128xbf16>
    %c0_149 = arith.constant 0 : index
    %c0_150 = arith.constant 0 : index
    %304 = vector.load %arg19[%c0_149, %c0_150] : memref<8x8xbf16, #tpu.memory_space<vmem>>, vector<8x8xbf16>
    %cst_151 = arith.constant dense<0.000000e+00> : vector<8x128xf32>
    %305 = tpu.matmul %304, %303, %cst_151 {dimension_numbers = #tpu.dot_dimension_numbers<[1], [0], [0], [1], [0, 0, 1, 1], [], []>} : vector<8x8xbf16>, vector<8x128xbf16>, vector<8x128xf32> -> vector<8x128xf32>
    %c488 = arith.constant 488 : index
    %c0_152 = arith.constant 0 : index
    %306 = vector.load %arg3[%c488, %c0_152] : memref<520x1xf32, #tpu.memory_space<vmem>>, vector<8x1xf32>
    %307 = vector.broadcast %306 : vector<8x1xf32> to vector<8x128xf32>
    %308 = arith.addf %305, %307 : vector<8x128xf32>
    %309 = arith.addf %236, %308 : vector<8x128xf32>
    %cst_153 = arith.constant dense<0.000000e+00> : vector<8xf32>
    %310 = vector.multi_reduction <add>, %309, %cst_153 [1] : vector<8x128xf32> to vector<8xf32>
    %311 = vector.shape_cast %310 : vector<8xf32> to vector<8x1xf32>
    %312 = arith.mulf %309, %309 : vector<8x128xf32>
    %cst_154 = arith.constant dense<0.000000e+00> : vector<8xf32>
    %313 = vector.multi_reduction <add>, %312, %cst_154 [1] : vector<8x128xf32> to vector<8xf32>
    %314 = vector.shape_cast %313 : vector<8xf32> to vector<8x1xf32>
    %c0_155 = arith.constant 0 : index
    %c0_156 = arith.constant 0 : index
    %315 = vector.load %arg4[%c0_155, %c0_156] : memref<8x8xf32, #tpu.memory_space<vmem>>, vector<8x8xf32>
    %cst_157 = arith.constant dense<0.000000e+00> : vector<8x1xf32>
    %316 = tpu.matmul %315, %311, %cst_157 {dimension_numbers = #tpu.dot_dimension_numbers<[1], [0], [0], [1], [0, 0, 1, 1], [], []>, precision = #tpu.contract_precision<fp32>} : vector<8x8xf32>, vector<8x1xf32>, vector<8x1xf32> -> vector<8x1xf32>
    %cst_158 = arith.constant dense<0.000000e+00> : vector<8x1xf32>
    %317 = tpu.matmul %315, %314, %cst_158 {dimension_numbers = #tpu.dot_dimension_numbers<[1], [0], [0], [1], [0, 0, 1, 1], [], []>, precision = #tpu.contract_precision<fp32>} : vector<8x8xf32>, vector<8x1xf32>, vector<8x1xf32> -> vector<8x1xf32>
    %cst_159 = arith.constant 1.280000e+02 : f32
    %318 = vector.broadcast %cst_159 : f32 to vector<8x1xf32>
    %319 = arith.divf %316, %318 : vector<8x1xf32>
    %cst_160 = arith.constant 1.280000e+02 : f32
    %320 = vector.broadcast %cst_160 : f32 to vector<8x1xf32>
    %321 = arith.divf %317, %320 : vector<8x1xf32>
    %322 = arith.mulf %319, %319 : vector<8x1xf32>
    %323 = arith.subf %321, %322 : vector<8x1xf32>
    %cst_161 = arith.constant 0.000000e+00 : f32
    %324 = vector.broadcast %cst_161 : f32 to vector<8x1xf32>
    %325 = arith.maximumf %323, %324 : vector<8x1xf32>
    %cst_162 = arith.constant 9.99999974E-6 : f32
    %326 = vector.broadcast %cst_162 : f32 to vector<8x1xf32>
    %327 = arith.addf %325, %326 : vector<8x1xf32>
    %328 = math.rsqrt %327 : vector<8x1xf32>
    %c496 = arith.constant 496 : index
    %c0_163 = arith.constant 0 : index
    %329 = vector.load %arg3[%c496, %c0_163] : memref<520x1xf32, #tpu.memory_space<vmem>>, vector<8x1xf32>
    %330 = arith.mulf %329, %328 : vector<8x1xf32>
    %c504 = arith.constant 504 : index
    %c0_164 = arith.constant 0 : index
    %331 = vector.load %arg3[%c504, %c0_164] : memref<520x1xf32, #tpu.memory_space<vmem>>, vector<8x1xf32>
    %332 = arith.mulf %319, %330 : vector<8x1xf32>
    %333 = arith.subf %331, %332 : vector<8x1xf32>
    %334 = vector.broadcast %330 : vector<8x1xf32> to vector<8x128xf32>
    %335 = arith.mulf %309, %334 : vector<8x128xf32>
    %336 = vector.broadcast %333 : vector<8x1xf32> to vector<8x128xf32>
    %337 = arith.addf %335, %336 : vector<8x128xf32>
    %cst_165 = arith.constant 0.000000e+00 : f32
    %338 = vector.broadcast %cst_165 : f32 to vector<8x128xf32>
    %339 = arith.maximumf %337, %338 : vector<8x128xf32>
    %340 = arith.truncf %339 : vector<8x128xf32> to vector<8x128xbf16>
    %c0_166 = arith.constant 0 : index
    %c0_167 = arith.constant 0 : index
    %341 = vector.load %arg20[%c0_166, %c0_167] : memref<1x8xbf16, #tpu.memory_space<vmem>>, vector<1x8xbf16>
    %cst_168 = arith.constant dense<0.000000e+00> : vector<1x128xf32>
    %342 = tpu.matmul %341, %340, %cst_168 {dimension_numbers = #tpu.dot_dimension_numbers<[1], [0], [0], [1], [0, 0, 1, 1], [], []>} : vector<1x8xbf16>, vector<8x128xbf16>, vector<1x128xf32> -> vector<1x128xf32>
    %c512 = arith.constant 512 : index
    %c0_169 = arith.constant 0 : index
    %343 = vector.load %arg3[%c512, %c0_169] : memref<520x1xf32, #tpu.memory_space<vmem>>, vector<1x1xf32>
    %344 = vector.broadcast %343 : vector<1x1xf32> to vector<1x128xf32>
    %345 = arith.addf %342, %344 : vector<1x128xf32>
    %c0_170 = arith.constant 0 : index
    %c0_171 = arith.constant 0 : index
    %c0_172 = arith.constant 0 : index
    %346 = vector.load %arg21[%c0_170, %c0_171, %c0_172] : memref<1x1x128xf32, #tpu.memory_space<vmem>>, vector<1x1x128xf32>
    %347 = vector.shape_cast %346 : vector<1x1x128xf32> to vector<1x128xf32>
    %348 = vector.shape_cast %345 : vector<1x128xf32> to vector<1x1x128xf32>
    tpu.vector_store %arg21[%c0_170, %c0_171, %c0_172], %348 {strides = array<i32>} : memref<1x1x128xf32, #tpu.memory_space<vmem>>, vector<1x1x128xf32>,
    return
  }
  func.func @transform_0(%arg0: i32) -> (i32, i32, i32) {
    %c0_i32 = arith.constant 0 : i32
    %c0_i32_0 = arith.constant 0 : i32
    %c0_i32_1 = arith.constant 0 : i32
    return %arg0, %c0_i32, %c0_i32_0 : i32, i32, i32
  }
  func.func @transform_1(%arg0: i32) -> (i32, i32, i32) {
    %c0_i32 = arith.constant 0 : i32
    %c0_i32_0 = arith.constant 0 : i32
    %c0_i32_1 = arith.constant 0 : i32
    return %arg0, %c0_i32, %c0_i32_0 : i32, i32, i32
  }
  func.func @transform_2(%arg0: i32) -> (i32, i32) {
    %c0_i32 = arith.constant 0 : i32
    %c0_i32_0 = arith.constant 0 : i32
    %c0_i32_1 = arith.constant 0 : i32
    return %c0_i32, %c0_i32_0 : i32, i32
  }
  func.func @transform_3(%arg0: i32) -> (i32, i32) {
    %c0_i32 = arith.constant 0 : i32
    %c0_i32_0 = arith.constant 0 : i32
    %c0_i32_1 = arith.constant 0 : i32
    return %c0_i32, %c0_i32_0 : i32, i32
  }
  func.func @transform_4(%arg0: i32) -> (i32, i32) {
    %c0_i32 = arith.constant 0 : i32
    %c0_i32_0 = arith.constant 0 : i32
    %c0_i32_1 = arith.constant 0 : i32
    return %c0_i32, %c0_i32_0 : i32, i32
  }
  func.func @transform_5(%arg0: i32) -> (i32, i32) {
    %c0_i32 = arith.constant 0 : i32
    %c0_i32_0 = arith.constant 0 : i32
    %c0_i32_1 = arith.constant 0 : i32
    return %c0_i32, %c0_i32_0 : i32, i32
  }
  func.func @transform_6(%arg0: i32) -> (i32, i32) {
    %c0_i32 = arith.constant 0 : i32
    %c0_i32_0 = arith.constant 0 : i32
    %c0_i32_1 = arith.constant 0 : i32
    return %c0_i32, %c0_i32_0 : i32, i32
  }
  func.func @transform_7(%arg0: i32) -> (i32, i32) {
    %c0_i32 = arith.constant 0 : i32
    %c0_i32_0 = arith.constant 0 : i32
    %c0_i32_1 = arith.constant 0 : i32
    return %c0_i32, %c0_i32_0 : i32, i32
  }
  func.func @transform_8(%arg0: i32) -> (i32, i32) {
    %c0_i32 = arith.constant 0 : i32
    %c0_i32_0 = arith.constant 0 : i32
    %c0_i32_1 = arith.constant 0 : i32
    return %c0_i32, %c0_i32_0 : i32, i32
  }
  func.func @transform_9(%arg0: i32) -> (i32, i32) {
    %c0_i32 = arith.constant 0 : i32
    %c0_i32_0 = arith.constant 0 : i32
    %c0_i32_1 = arith.constant 0 : i32
    return %c0_i32, %c0_i32_0 : i32, i32
  }
  func.func @transform_10(%arg0: i32) -> (i32, i32) {
    %c0_i32 = arith.constant 0 : i32
    %c0_i32_0 = arith.constant 0 : i32
    %c0_i32_1 = arith.constant 0 : i32
    return %c0_i32, %c0_i32_0 : i32, i32
  }
  func.func @transform_11(%arg0: i32) -> (i32, i32) {
    %c0_i32 = arith.constant 0 : i32
    %c0_i32_0 = arith.constant 0 : i32
    %c0_i32_1 = arith.constant 0 : i32
    return %c0_i32, %c0_i32_0 : i32, i32
  }
  func.func @transform_12(%arg0: i32) -> (i32, i32) {
    %c0_i32 = arith.constant 0 : i32
    %c0_i32_0 = arith.constant 0 : i32
    %c0_i32_1 = arith.constant 0 : i32
    return %c0_i32, %c0_i32_0 : i32, i32
  }
  func.func @transform_13(%arg0: i32) -> (i32, i32) {
    %c0_i32 = arith.constant 0 : i32
    %c0_i32_0 = arith.constant 0 : i32
    %c0_i32_1 = arith.constant 0 : i32
    return %c0_i32, %c0_i32_0 : i32, i32
  }
  func.func @transform_14(%arg0: i32) -> (i32, i32) {
    %c0_i32 = arith.constant 0 : i32
    %c0_i32_0 = arith.constant 0 : i32
    %c0_i32_1 = arith.constant 0 : i32
    return %c0_i32, %c0_i32_0 : i32, i32
  }
  func.func @transform_15(%arg0: i32) -> (i32, i32) {
    %c0_i32 = arith.constant 0 : i32
    %c0_i32_0 = arith.constant 0 : i32
    %c0_i32_1 = arith.constant 0 : i32
    return %c0_i32, %c0_i32_0 : i32, i32
  }
  func.func @transform_16(%arg0: i32) -> (i32, i32) {
    %c0_i32 = arith.constant 0 : i32
    %c0_i32_0 = arith.constant 0 : i32
    %c0_i32_1 = arith.constant 0 : i32
    return %c0_i32, %c0_i32_0 : i32, i32
  }
  func.func @transform_17(%arg0: i32) -> (i32, i32) {
    %c0_i32 = arith.constant 0 : i32
    %c0_i32_0 = arith.constant 0 : i32
    %c0_i32_1 = arith.constant 0 : i32
    return %c0_i32, %c0_i32_0 : i32, i32
  }
  func.func @transform_18(%arg0: i32) -> (i32, i32) {
    %c0_i32 = arith.constant 0 : i32
    %c0_i32_0 = arith.constant 0 : i32
    %c0_i32_1 = arith.constant 0 : i32
    return %c0_i32, %c0_i32_0 : i32, i32
  }
  func.func @transform_19(%arg0: i32) -> (i32, i32) {
    %c0_i32 = arith.constant 0 : i32
    %c0_i32_0 = arith.constant 0 : i32
    %c0_i32_1 = arith.constant 0 : i32
    return %c0_i32, %c0_i32_0 : i32, i32
  }
  func.func @transform_20(%arg0: i32) -> (i32, i32, i32) {
    %c0_i32 = arith.constant 0 : i32
    %c0_i32_0 = arith.constant 0 : i32
    %c0_i32_1 = arith.constant 0 : i32
    return %arg0, %c0_i32, %c0_i32_0 : i32, i32, i32
  }
}

</mosaic_0001>

<bundles_post_ra>
// kernel: tpu_custom_call.1
= control target key start
LH: loop header
LB: loop body
LE: loop exit
PB: predicated region body
PF: predicated region fallthrough
CT: control target
= control target key end

     0   :  { %s16779_s0 = inlined_call_operand.vmem [shape: f32[2,128,3], index: 0, kind: input, shape index: {}]   ;;  %s16780_s1 = inlined_call_operand.vmem [shape: f32[2,64,1], index: 1, kind: input, shape index: {}]   ;;  %s16781_s2 = inlined_call_operand.vmem [shape: f32[520,1], index: 2, kind: input, shape index: {}]   ;;  %s16782_s3 = inlined_call_operand.vmem [shape: f32[8,8], index: 3, kind: input, shape index: {}]   ;;  %s16783_s4 = inlined_call_operand.vmem [shape: f32[16,16], index: 4, kind: input, shape index: {}]   ;;  %s16784_s5 = inlined_call_operand.vmem [shape: f32[32,32], index: 5, kind: input, shape index: {}]   ;;  %s16785_s6 = inlined_call_operand.vmem [shape: f32[64,64], index: 6, kind: input, shape index: {}]   ;;  %s16786_s7 = inlined_call_operand.vmem [shape: bf16[64,3], index: 7, kind: input, shape index: {}]   ;;  %s16787_s8 = inlined_call_operand.vmem [shape: bf16[32,64], index: 8, kind: input, shape index: {}]   ;;  %s16788_s9 = inlined_call_operand.vmem [shape: bf16[32,32], index: 9, kind: input, shape index: {}]   ;;  %s16789_s10 = inlined_call_operand.vmem [shape: bf16[32,64], index: 10, kind: input, shape index: {}]   ;;  %s16790_s11 = inlined_call_operand.vmem [shape: bf16[16,32], index: 11, kind: input, shape index: {}]   ;;  %s16791_s12 = inlined_call_operand.vmem [shape: bf16[16,16], index: 12, kind: input, shape index: {}]   ;;  %s16792_s13 = inlined_call_operand.vmem [shape: bf16[16,32], index: 13, kind: input, shape index: {}]   ;;  %s16793_s14 = inlined_call_operand.vmem [shape: bf16[8,16], index: 14, kind: input, shape index: {}]   ;;  %s16794_s15 = inlined_call_operand.vmem [shape: bf16[8,8], index: 15, kind: input, shape index: {}]   ;;  %s16795_s16 = inlined_call_operand.vmem [shape: bf16[8,16], index: 16, kind: input, shape index: {}]   ;;  %s16796_s17 = inlined_call_operand.vmem [shape: bf16[8,8], index: 17, kind: input, shape index: {}]   ;;  %s16797_s18 = inlined_call_operand.vmem [shape: bf16[8,8], index: 18, kind: input, shape index: {}]   ;;  %s16798_s19 = inlined_call_operand.vmem [shape: bf16[1,8], index: 19, kind: input, shape index: {}]   ;;  %s16799_s20 = inlined_call_operand.hbm [shape: f32[2,1,128], index: 20, kind: output, shape index: {}]  }
   0x1   :  { %16846 = sst [smem:[#allocation26_spill]] %s16779_s0 }
   0x2   :  { %16847 = sst [smem:[#allocation27_spill]] %s16780_s1 }
   0x3   :  { %16848 = sst [smem:[#allocation28_spill]] %s16781_s2 }
   0x4   :  { %16849 = sst [smem:[#allocation29_spill]] %s16782_s3 }
   0x5   :  { %16850 = sst [smem:[#allocation30_spill]] %s16783_s4 }
   0x6   :  { %16851 = sst [smem:[#allocation31_spill]] %s16784_s5 }
   0x7   :  { %25 = vsyncpa [#allocation3], 0 }
   0x8   :  { %27 = vsyncpa [#allocation3 + $0x1], 0  ;;  %s15116_s1 = smov 0   ;;  %s15118_s22 = smov 0  }
   0x9   :  { %s15120_s23 = smov 0   ;;  %s15122_s24 = smov 0  }
   0xa LB: > { %16852 = sst [smem:[#allocation5_spill]] %s15001_s23  ;;  %s15137_s2 = sadd.s32 4294967295, %s15005_s24   ;;  %s15005_s24 = sphi %s15122_s24, %s16928_s24   ;;  %s15001_s23 = sphi %s15120_s23, %s16930_s23   ;;  %s14997_s22 = sphi %s15118_s22, %s16932_s22   ;;  %s14993_s1 = sphi %s15116_s1, %s16931_s1  }
   0xb   : > { %s12188_s25 = sadd.s32 4294967294, %s15005_s24   ;;  %s15141_s3 = sadd.s32 1, %s15005_s24  }
   0xc   : > { %16853 = sst [smem:[#allocation6_spill]] %s15141_s3  ;;  %s470_s26 = sadd.s32 1, %s15001_s23 }
   0xd   : > { %s467_s27 = ssub.s32 %s15005_s24, %s15141_s3  ;;  %p480_p0 = scmp.ne.s32.totalorder %s15001_s23, %s14997_s22 }
   0xe   : > { %p468_p1 = scmp.eq.s32.totalorder %s467_s27, 0  ;;  %p481_p2 = scmp.eq.s32.totalorder %s15137_s2, 1 }
   0xf   : > { %p486_p3 = scmp.ne.s32.totalorder %s14997_s22, %s14993_s1  ;;  %p487_p4 = scmp.eq.s32.totalorder %s12188_s25, 1 }
  0x10   : > { %s15152_s28 = scalar_select %p468_p1, %s15001_s23, %s470_s26  }
  0x11   : > { %p15154_p5 = por %p481_p2, %p480_p0  ;;  %p15158_p6 = por %p487_p4, %p486_p3 }
  0x12   : > { %16854 = sst [smem:[#allocation7_spill]] %s15152_s28  ;;  %p12191_p7 = scmp.ge.s32.totalorder %s15005_s24, 1 }
  0x13   : > { %s16856_s29 = scalar_select %p15158_p6, 1, 0 }
  0x14   : > { %p575_p8 = scmp.lt.s32.totalorder %s15005_s24, 3 }
  0x15   : > { %16857 = sst [smem:[#allocation8_spill]] %s16856_s29 }
  0x16   : > { %p576_p9 = pnand %p12191_p7, %p575_p8 }
  0x18   : > { %579 = sbr.rel (%p576_p9) target bundleno = 7600 (0x1db0), region = 100 }
  0x1f   : > { %p637_p10 = scmp.lt.s32.totalorder %s15137_s2, 1  ;;  %v14882_v0 = vld [vmem:[%s16786_s7] sm:$0xff]   ;;  %vm748_vm0 = vcmask 23552   ;;  %v15007_v1 = vmov 0   ;;  %s16858_s23 = sld [smem:[#allocation26_spill]]  ;;  %v14883_v42 = vld [vmem:[%s16786_s7 + $0x8] sm:$0xff]  }
  0x20   : > { %14881 = vset.pattern.permute.xlu1 %v15007_v1  ;;  %14880 = vset.pattern.permute.xlu0 %v15007_v1  ;;  %v14884_v43 = vld [vmem:[%s16786_s7 + $0x10] sm:$0xff]   ;;  %v14885_v44 = vld [vmem:[%s16786_s7 + $0x18] sm:$0xff]   ;;  %vm898_vm1 = vcmask 523264   ;;  %s16924_s5 = sld [smem:[#allocation31_spill]]  ;;  %vm2921_vm2 = vcmask 261120   ;;  %vm15009_vm3 = vmmov 0  }
  0x21   : > { %s638_s21 = scalar_select %p637_p10, %s15137_s2, 1  ;;  %12873 = vmatprep.mubr.msk.bf16.mxu0 %vm748_vm0, %v14882_v0  ;;  %vm5856_vm4 = vcmask 130048   ;;  %vm8156_vm5 = vcmask 64512   ;;  %vm9089_vm6 = vcmask 1043456  }
  0x22   : > { %s635_s30 = sand.u32 1, %s14997_s22   ;;  %s12228_s0 = sshll.u32 %s15137_s2, 4 }
  0x23   : > { %s12231_s25 = sshll.u32 %s638_s21, 7  ;;  %s12232_s26 = sshll.u32 %s638_s21, 6 }
  0x24   : > { %s16859_s21 = sld [smem:[#allocation27_spill]]  ;;  %s12109_s2 = scalar_lea.sflag [#allocation3], %s635_s30 }
  0x25   : > { %s15173_s3 = scalar_lea.vmem %s16858_s23, %s12231_s25  ;;  %s16926_s25 = sld [smem:[#allocation29_spill]] }
  0x26   : > { %v656_v2 = vld [vmem:[%s15173_s3] sm:$0xff]  ;;  %v657_v3 = vld [vmem:[%s15173_s3 + $0x8] sm:$0xff]  ;;  %v658_v4 = vld [vmem:[%s15173_s3 + $0x10] sm:$0xff]  ;;  %s15010_s27 = smov [#allocation2]  }
  0x27   : > { %v672_v5 = vpack.c.bf16 %v657_v3, %v656_v2  ;;  %v659_v6 = vld [vmem:[%s15173_s3 + $0x18] sm:$0xff]  ;;  %v660_v11 = vld [vmem:[%s15173_s3 + $0x20] sm:$0xff]  ;;  %v661_v12 = vld [vmem:[%s15173_s3 + $0x28] sm:$0xff] }
  0x28   : > { %v673_v7 = vpack.c.bf16 %v659_v6, %v658_v4  ;;  %v674_v16 = vpack.c.bf16 %v661_v12, %v660_v11  ;;  %v662_v19 = vld [vmem:[%s15173_s3 + $0x30] sm:$0xff]  ;;  %v663_v20 = vld [vmem:[%s15173_s3 + $0x38] sm:$0xff]  ;;  %v664_v25 = vld [vmem:[%s15173_s3 + $0x40] sm:$0xff] }
  0x29   : > { %14830 = vmatprep.subr.msk.bf16.mxu0 %vm748_vm0, %v672_v5  ;;  %v762_v8 = vsel %vm748_vm0, %v672_v5, 0  ;;  %v675_v24 = vpack.c.bf16 %v663_v20, %v662_v19  ;;  %v665_v26 = vld [vmem:[%s15173_s3 + $0x48] sm:$0xff]  ;;  %v666_v29 = vld [vmem:[%s15173_s3 + $0x50] sm:$0xff]  ;;  %v667_v30 = vld [vmem:[%s15173_s3 + $0x58] sm:$0xff] }
  0x2a   : > { %s646_s29 = scalar_lea.vmem %s16859_s21, %s12232_s26  ;;  %12858 = vmatpush3.bf16.xpose.msra.mxu0 %v762_v8  ;;  %v765_v15 = vsel %vm748_vm0, %v673_v7, 0  ;;  %v768_v23 = vsel %vm748_vm0, %v674_v16, 0  ;;  %v676_v28 = vpack.c.bf16 %v665_v26, %v664_v25  ;;  %v677_v32 = vpack.c.bf16 %v667_v30, %v666_v29  ;;  %v668_v33 = vld [vmem:[%s15173_s3 + $0x60] sm:$0xff]  ;;  %v669_v34 = vld [vmem:[%s15173_s3 + $0x68] sm:$0xff]  ;;  %v670_v37 = vld [vmem:[%s15173_s3 + $0x70] sm:$0xff]  ;;  %s636_s21 = scalar_lea.vmem [#allocation2], %s635_s30 }
  0x2b   : > { %14831 = vmatprep.subr.msk.bf16.mxu0 %vm748_vm0, %v673_v7  ;;  %v682_v9 = vld [vmem:[%s646_s29 + $0x10] sm:$0xff]  ;;  %v680_v10 = vld [vmem:[%s646_s29] sm:$0xff]  ;;  %v683_v13 = vld [vmem:[%s646_s29 + $0x18] sm:$0xff]  ;;  %v771_v27 = vsel %vm748_vm0, %v675_v24, 0  ;;  %v678_v36 = vpack.c.bf16 %v669_v34, %v668_v33  ;;  %s12121_s23 = sshll.u32 %s636_s21, 4  ;;  %s16739_s23 = int_to_ptr.vmem [resolvable:$true] %s12121_s23 }
  0x2c   : > { %700 = vperm.xlu1 %14881, %v682_v9   ;;  %690 = vperm.xlu0 %14880, %v680_v10   ;;  %v681_v14 = vld [vmem:[%s646_s29 + $0x8] sm:$0xff]  ;;  %v684_v18 = vld [vmem:[%s646_s29 + $0x20] sm:$0xff]  ;;  %v687_v21 = vld [vmem:[%s646_s29 + $0x38] sm:$0xff]  ;;  %v774_v31 = vsel %vm748_vm0, %v676_v28, 0  ;;  %v777_v35 = vsel %vm748_vm0, %v677_v32, 0  ;;  %s14943_s26 = scalar_lea.vmem %s16739_s23, 16 }
  0x2d   : > { %v685_v17 = vld [vmem:[%s646_s29 + $0x28] sm:$0xff]  ;;  %v686_v22 = vld [vmem:[%s646_s29 + $0x30] sm:$0xff]  ;;  %v671_v38 = vld [vmem:[%s15173_s3 + $0x78] sm:$0xff]  ;;  %v780_v39 = vsel %vm748_vm0, %v678_v36, 0  ;;  %s16915_s3 = sld [smem:[#allocation28_spill]]  ;;  %s16925_s29 = sld [smem:[#allocation30_spill]] }
  0x2e   : > { %v679_v40 = vpack.c.bf16 %v671_v38, %v670_v37  ;;  %v891_v20 = vld [vmem:[%s16785_s6 + $0x8] sm:$0xff]  ;;  %v893_v26 = vld [vmem:[%s16785_s6 + $0x18] sm:$0xff]  ;;  %p14944_p11 = scmp.ne.s32.totalorder %s16739_s23, %s14943_s26 }
  0x2f   : > { %v909_v30 = vsel %vm898_vm1, %v893_v26, 0  ;;  %v895_v33 = vld [vmem:[%s16785_s6 + $0x28] sm:$0xff] }
  0x30   : > { %705 = vperm.xlu1 %14881, %v683_v13   ;;  %695 = vperm.xlu0 %14880, %v681_v14   ;;  %v783_v41 = vsel %vm748_vm0, %v679_v40, 0  ;;  %v890_v13 = vld [vmem:[%s16785_s6] sm:$0xff]  ;;  %v15300_v34 = vand.u32 4294901760, %v909_v30  ;;  %p14945_p12 = pnand %p14944_p11, %p15154_p5 }
  0x31   : > { %v900_v14 = vsel %vm898_vm1, %v890_v13, 0 }
  0x32   : > { %12860 = vmatpush3.bf16.xpose.msra.mxu0 %v765_v15  ;;  %v15266_v15 = vand.u32 4294901760, %v900_v14  ;;  %p14946_p13 = pneg %p14945_p12 }
  0x33   : > { %14832 = vmatprep.subr.msk.bf16.mxu0 %vm748_vm0, %v674_v16 }
  0x34   : > { %715 = vperm.xlu1 %14881, %v685_v17   ;;  %710 = vperm.xlu0 %14880, %v684_v18   ;;  %v15269_v16 = vsub.f32 %v900_v14, %v15266_v15 }
  0x36   : > { %v15272_v17 = vand.u32 4294901760, %v15269_v16 }
  0x38   : > { %725 = vperm.xlu1 %14881, %v687_v21   ;;  %720 = vperm.xlu0 %14880, %v686_v22   ;;  %16868 = vst [vmem:[#allocation17_spill] sm:$0xff] %v15272_v17  ;;  %v999_v18 = vsub.f32 %v15269_v16, %v15272_v17  ;;  %v892_v21 = vld [vmem:[%s16785_s6 + $0x10] sm:$0xff] }
  0x39   : > { %v906_v25 = vsel %vm898_vm1, %v892_v21, 0 }
  0x3a   : > { %12862 = vmatpush3.bf16.xpose.msra.mxu0 %v768_v23  ;;  %v1000_v19 = vand.u32 4294901760, %v999_v18  ;;  %v15291_v29 = vand.u32 4294901760, %v906_v25 }
  0x3b   : > { %14833 = vmatprep.subr.msk.bf16.mxu0 %vm748_vm0, %v675_v24  ;;  %v903_v24 = vsel %vm898_vm1, %v891_v20, 0 }
  0x3c   : > { %12897 = vmatprep.mubr.f32.mxu1 %v1000_v19  ;;  %v15306_v37 = vsub.f32 %v906_v25, %v15291_v29 }
  0x42   : > { %12864 = vmatpush3.bf16.xpose.msra.mxu0 %v771_v27 }
  0x43   : > { %14834 = vmatprep.subr.msk.bf16.mxu0 %vm748_vm0, %v676_v28  ;;  %v15289_v28 = vand.u32 4294901760, %v903_v24 }
  0x4a   : > { %12866 = vmatpush3.bf16.xpose.msra.mxu0 %v774_v31 }
  0x4b   : > { %14835 = vmatprep.subr.msk.bf16.mxu0 %vm748_vm0, %v677_v32  ;;  %v894_v32 = vld [vmem:[%s16785_s6 + $0x20] sm:$0xff] }
  0x4c   : > { %v912_v38 = vsel %vm898_vm1, %v894_v32, 0 }
  0x52   : > { %12868 = vmatpush3.bf16.xpose.msra.mxu0 %v777_v35 }
  0x53   : > { %14836 = vmatprep.subr.msk.bf16.mxu0 %vm748_vm0, %v678_v36  ;;  %v15303_v36 = vsub.f32 %v903_v24, %v15289_v28 }
  0x5a   : > { %12870 = vmatpush3.bf16.xpose.msra.mxu0 %v780_v39 }
  0x5b   : > { %14837 = vmatprep.subr.msk.bf16.mxu0 %vm748_vm0, %v679_v40 }
  0x62   : > { %12872 = vmatpush3.bf16.xpose.msra.mxu0 %v783_v41 }
  0x69   : > { %12874 = vmatmul.mubr.msk.bf16.vlgmr.msra.gmra.mrb[0].mxu0 %vm748_vm0, %v14883_v42 }
  0x6a   : > { %12877 = vmatprep.mubr.msk.bf16.mxu0 %vm748_vm0, %v14884_v43  ;;  %v915_v43 = vsel %vm898_vm1, %v895_v33, 0 }
  0x71   : > { %12878 = vmatmul.mubr.msk.bf16.gmra.mrb[4].mxu0 %vm748_vm0, %v14885_v44 }
  0x72   : > { %13065 = vmatprep.mubr.f32.mxu0 %v1000_v19 }
  0xab   : > { %v691_v45 = vpop.permute.xlu0 %690  ;;  %v701_v46 = vpop.permute.xlu1 %700 }
  0xaf   : > { %v696_v47 = vpop.permute.xlu0 %695  ;;  %v706_v54 = vpop.permute.xlu1 %705 }
  0xb3   : > { %v711_v56 = vpop.permute.xlu0 %710  ;;  %v716_v3 = vpop.permute.xlu1 %715 }
  0xb7   : > { %v721_v0 = vpop.permute.xlu0 %720  ;;  %v726_v6 = vpop.permute.xlu1 %725 }
 0x13c   : > { %v12875_v48 = vpop.f32.mrb[0].mxu0 }
 0x13d   : > { %v15222_v49 = vadd.f32 %v12875_v48, %v701_v46  ;;  %v819_v50 = vpop.f32.mrb[1].mxu0  ;;  %v15313_v46 = vsub.f32 %v909_v30, %v15300_v34  ;;  %v896_v48 = vld [vmem:[%s16785_s6 + $0x30] sm:$0xff] }
 0x13e   : > { %v15224_v51 = vadd.f32 %v819_v50, %v691_v45  ;;  %v12876_v52 = vpop.f32.mrb[2].mxu0 }
 0x13f   : > { %16860 = vst [vmem:[#allocation9_spill] sm:$0xff] %v15222_v49  ;;  %854 = vadd.xlane.f32.xlu1 %v15222_v49  ;;  %v822_v53 = vpop.f32.mrb[3].mxu0  ;;  %v868_v55 = vmul.f32 %v15222_v49, %v15222_v49  ;;  %v15230_v57 = vadd.f32 %v12876_v52, %v706_v54  ;;  %v15323_v52 = vand.u32 4294901760, %v15303_v36 }
 0x140   : > { %16861 = vst [vmem:[#allocation10_spill] sm:$0xff] %v15224_v51  ;;  %850 = vadd.xlane.f32.xlu0 %v15224_v51  ;;  %v15233_v59 = vadd.f32 %v822_v53, %v696_v47  ;;  %v866_v62 = vmul.f32 %v15224_v51, %v15224_v51  ;;  %v15315_v47 = vand.u32 4294901760, %v912_v38  ;;  %v15325_v53 = vand.u32 4294901760, %v915_v43 }
 0x141   : > { %16862 = vst [vmem:[#allocation11_spill] sm:$0xff] %v15230_v57  ;;  %v869_v2 = vmul.f32 %v15230_v57, %v15230_v57  ;;  %16869 = vst [vmem:[#allocation18_spill] sm:$0xff] %v15323_v52 }
 0x142   : > { %16863 = vst [vmem:[#allocation12_spill] sm:$0xff] %v15233_v59  ;;  %v867_v5 = vmul.f32 %v15233_v59, %v15233_v59 }
 0x143   : > { %878 = vadd.xlane.f32.xlu1 %v868_v55 }
 0x144   : > { %v12879_v58 = vpop.f32.mrb[4].mxu0  ;;  %856 = vadd.xlane.f32.xlu0 %v15230_v57 }
 0x145   : > { %v835_v60 = vpop.f32.mrb[5].mxu0  ;;  %v15238_v1 = vadd.f32 %v12879_v58, %v721_v0  ;;  %v918_v58 = vsel %vm898_vm1, %v896_v48, 0  ;;  %v1009_v0 = vsub.f32 %v15303_v36, %v15323_v52 }
 0x146   : > { %v12880_v61 = vpop.f32.mrb[6].mxu0  ;;  %v15243_v4 = vadd.f32 %v835_v60, %v711_v56  ;;  %v15331_v56 = vand.u32 4294901760, %v15306_v37  ;;  %v897_v60 = vld [vmem:[%s16785_s6 + $0x38] sm:$0xff] }
 0x147   : > { %v838_v63 = vpop.f32.mrb[7].mxu0  ;;  %852 = vadd.xlane.f32.xlu1 %v15233_v59  ;;  %16864 = vst [vmem:[#allocation13_spill] sm:$0xff] %v15238_v1  ;;  %v15250_v8 = vadd.f32 %v12880_v61, %v726_v6  ;;  %v872_v9 = vmul.f32 %v15238_v1, %v15238_v1  ;;  %v15340_v61 = vand.u32 4294901760, %v15313_v46 }
 0x148   : > { %874 = vadd.xlane.f32.xlu0 %v866_v62  ;;  %16865 = vst [vmem:[#allocation14_spill] sm:$0xff] %v15243_v4  ;;  %v870_v7 = vmul.f32 %v15243_v4, %v15243_v4  ;;  %v15255_v10 = vadd.f32 %v838_v63, %v716_v3  ;;  %16870 = vst [vmem:[#allocation19_spill] sm:$0xff] %v15331_v56  ;;  %v15343_v62 = vsub.f32 %v912_v38, %v15315_v47 }
 0x149   : > { %16866 = vst [vmem:[#allocation15_spill] sm:$0xff] %v15250_v8  ;;  %v873_v12 = vmul.f32 %v15250_v8, %v15250_v8  ;;  %16871 = vst [vmem:[#allocation20_spill] sm:$0xff] %v15340_v61  ;;  %v1029_v20 = vsub.f32 %v15313_v46, %v15340_v61 }
 0x14a   : > { %16867 = vst [vmem:[#allocation16_spill] sm:$0xff] %v15255_v10  ;;  %v871_v11 = vmul.f32 %v15255_v10, %v15255_v10  ;;  %v15366_v21 = vand.u32 4294901760, %v15343_v62 }
 0x14b   : > { %862 = vadd.xlane.f32.xlu1 %v15238_v1 }
 0x14c   : > { %880 = vadd.xlane.f32.xlu0 %v869_v2  ;;  %v15350_v2 = vsub.f32 %v915_v43, %v15325_v53 }
 0x14f   : > { %858 = vadd.xlane.f32.xlu1 %v15243_v4 }
 0x150   : > { %876 = vadd.xlane.f32.xlu0 %v867_v5 }
 0x153   : > { %882 = vadd.xlane.f32.xlu1 %v870_v7  ;;  %v1019_v7 = vsub.f32 %v15306_v37, %v15331_v56 }
 0x154   : > { %864 = vadd.xlane.f32.xlu0 %v15250_v8 }
 0x157   : > { %886 = vadd.xlane.f32.xlu1 %v872_v9  ;;  %v15356_v9 = vand.u32 4294901760, %v918_v58 }
 0x158   : > { %860 = vadd.xlane.f32.xlu0 %v15255_v10 }
 0x159   : > { %v15390_v43 = vsub.f32 %v918_v58, %v15356_v9 }
 0x15c   : > { %884 = vadd.xlane.f32.xlu0 %v871_v11  ;;  %v921_v11 = vsel %vm898_vm1, %v897_v60, 0  ;;  %v15398_v60 = vand.u32 4294901760, %v1029_v20 }
 0x15d   : > { %v15374_v25 = vand.u32 4294901760, %v921_v11 }
 0x160   : > { %888 = vadd.xlane.f32.xlu0 %v873_v12 }
 0x1cc   : > { %v855_v22 = vpop.xlane.xlu1 %854 }
 0x1cd   : > { %v851_v23 = vpop.xlane.xlu0 %850  ;;  %v930_v44 = vand.u32 4294901760, %v855_v22 }
 0x1ce   : > { %v924_v39 = vand.u32 4294901760, %v851_v23 }
 0x1cf   : > { %v15345_v63 = vsub.f32 %v855_v22, %v930_v44 }
 0x1d0   : > { %v15287_v27 = vpop.xlane.xlu1 %878  ;;  %v15359_v12 = vsub.f32 %v851_v23, %v924_v39  ;;  %v15372_v23 = vand.u32 4294901760, %v15350_v2 }
 0x1d1   : > { %v857_v31 = vpop.xlane.xlu0 %856  ;;  %v1768_v19 = vand.u32 4294901760, %v15287_v27  ;;  %v16806_v22 = vand.u32 4294901760, %v15345_v63 }
 0x1d2   : > { %v933_v40 = vand.u32 4294901760, %v857_v31  ;;  %16872 = vst [vmem:[#allocation21_spill] sm:$0xff] %v15372_v23  ;;  %v16810_v38 = vand.u32 4294901760, %v15359_v12 }
 0x1d4   : > { %v853_v35 = vpop.xlane.xlu1 %852  ;;  %v15327_v54 = vpack.c.bf16 %v933_v40, %v930_v44  ;;  %v15376_v26 = vsub.f32 %v857_v31, %v933_v40  ;;  %v15393_v31 = vsub.f32 %v15287_v27, %v1768_v19  ;;  %v1080_v27 = vsub.f32 %v15359_v12, %v16810_v38 }
 0x1d5   : > { %v927_v41 = vand.u32 4294901760, %v853_v35  ;;  %v875_v42 = vpop.xlane.xlu0 %874 }
 0x1d6   : > { %v1762_v13 = vand.u32 4294901760, %v875_v42 }
 0x1d7   : > { %v15310_v45 = vpack.c.bf16 %v927_v41, %v924_v39  ;;  %v15352_v3 = vsub.f32 %v853_v35, %v927_v41  ;;  %v15381_v35 = vand.u32 4294901760, %v1009_v0  ;;  %v15387_v41 = vand.u32 4294901760, %v1019_v7 }
 0x1d8   : > { %v15320_v50 = vpop.xlane.xlu1 %862  ;;  %v15395_v40 = vsub.f32 %v875_v42, %v1762_v13  ;;  %v15404_v0 = vsub.f32 %v15345_v63, %v16806_v22  ;;  %v15411_v42 = vsub.f32 %v921_v11, %v15374_v25  ;;  %v15424_v11 = vand.u32 4294901760, %v15390_v43 }
 0x1d9   : > { %14052 = vmatprep.subr.bf16.mxu1 %v15310_v45  ;;  %v881_v55 = vpop.xlane.xlu0 %880  ;;  %v16807_v30 = vand.u32 4294901760, %v15352_v3 }
 0x1da   : > { %14054 = vmatpush3.bf16.msra.mxu1 %v15310_v45  ;;  %v1771_v14 = vand.u32 4294901760, %v881_v55  ;;  %16873 = vst [vmem:[#allocation22_spill] sm:$0xff] %v15424_v11  ;;  %v1095_v38 = vand.u32 4294901760, %v15404_v0  ;;  %v16877_v1 = vand.u32 4294901760, %v15395_v40 }
 0x1db   : > { %14056 = vmatprep.subr.bf16.mxu1 %v15327_v54 }
 0x1dc   : > { %v859_v5 = vpop.xlane.xlu1 %858  ;;  %v15384_v39 = vpack.c.bf16 %v1771_v14, %v1768_v19  ;;  %v15414_v7 = vsub.f32 %v881_v55, %v1771_v14  ;;  %v1087_v19 = vsub.f32 %v15352_v3, %v16807_v30  ;;  %v942_v14 = vand.u32 4294901760, %v15320_v50 }
 0x1dd   : > { %v877_v6 = vpop.xlane.xlu0 %876  ;;  %v936_v44 = vand.u32 4294901760, %v859_v5  ;;  %v16874_v55 = vand.u32 4294901760, %v15376_v26 }
 0x1de   : > { %v1765_v18 = vand.u32 4294901760, %v877_v6  ;;  %14058 = vmatpush3.bf16.msra.mxu1 %v15327_v54  ;;  %v1088_v58 = vand.u32 4294901760, %v1087_v19  ;;  %v16879_v56 = vand.u32 4294901760, %v15414_v7 }
 0x1df   : > { %v1101_v57 = vsub.f32 %v15376_v26, %v16874_v55  ;;  %v1081_v55 = vand.u32 4294901760, %v1080_v27 }
 0x1e0   : > { %v15369_v24 = vpack.c.bf16 %v1765_v18, %v1762_v13  ;;  %v15379_v32 = vsub.f32 %v877_v6, %v1765_v18  ;;  %v883_v48 = vpop.xlane.xlu1 %882  ;;  %v15429_v13 = vsub.f32 %v859_v5, %v936_v44  ;;  %v1939_v27 = vsub.f32 %v15414_v7, %v16879_v56 }
 0x1e1   : > { %v865_v33 = vpop.xlane.xlu0 %864  ;;  %v1774_v30 = vand.u32 4294901760, %v883_v48  ;;  %v1102_v61 = vand.u32 4294901760, %v1101_v57 }
 0x1e2   : > { %14148 = vmatprep.subr.bf16.mxu0 %v15369_v24  ;;  %v945_v20 = vand.u32 4294901760, %v865_v33  ;;  %v16875_v5 = vand.u32 4294901760, %v15379_v32  ;;  %v16881_v57 = vand.u32 4294901760, %v15429_v13 }
 0x1e3   : > { %14150 = vmatpush3.bf16.msra.mxu0 %v15369_v24  ;;  %v15458_v59 = vsub.f32 %v883_v48, %v1774_v30  ;;  %v14071_v17 = vpack.c.bf16 %v1102_v61, %v1095_v38 }
 0x1e4   : > { %14152 = vmatprep.subr.bf16.mxu0 %v15384_v39  ;;  %v887_v10 = vpop.xlane.xlu1 %886  ;;  %v1925_v49 = vsub.f32 %v15379_v32, %v16875_v5  ;;  %v15444_v51 = vpack.c.bf16 %v945_v20, %v942_v14  ;;  %v1918_v5 = vsub.f32 %v15395_v40, %v16877_v1  ;;  %v1108_v56 = vsub.f32 %v15429_v13, %v16881_v57 }
 0x1e5   : > { %v861_v18 = vpop.xlane.xlu0 %860  ;;  %v16837_v1 = vand.u32 4294901760, %v15458_v59 }
 0x1e6   : > { %v939_v22 = vand.u32 4294901760, %v861_v18  ;;  %16876 = vst [vmem:[#allocation23_spill] sm:$0xff] %v15444_v51  ;;  %v1926_v19 = vand.u32 4294901760, %v1925_v49  ;;  %v1919_v49 = vand.u32 4294901760, %v1918_v5  ;;  %v1940_v5 = vand.u32 4294901760, %v1939_v27 }
 0x1e7   : > { %14154 = vmatpush3.bf16.msra.mxu0 %v15384_v39 }
 0x1e8   : > { %v15432_v6 = vpack.c.bf16 %v939_v22, %v936_v44  ;;  %v15434_v8 = vsub.f32 %v861_v18, %v939_v22  ;;  %v15446_v44 = vsub.f32 %v865_v33, %v945_v20  ;;  %v15451_v18 = vsub.f32 %v15320_v50, %v942_v14 }
 0x1e9   : > { %v885_v4 = vpop.xlane.xlu0 %884  ;;  %v1780_v33 = vand.u32 4294901760, %v887_v10  ;;  %v14067_v14 = vpack.c.bf16 %v1088_v58, %v1081_v55  ;;  %v16882_v58 = vand.u32 4294901760, %v15393_v31 }
 0x1ea   : > { %v1777_v0 = vand.u32 4294901760, %v885_v4  ;;  %14060 = vmatprep.subr.bf16.mxu1 %v15432_v6 }
 0x1eb   : > { %14062 = vmatpush3.bf16.msra.mxu1 %v15432_v6  ;;  %v1932_v55 = vsub.f32 %v15393_v31, %v16882_v58  ;;  %v15484_v52 = vsub.f32 %v887_v10, %v1780_v33  ;;  %v16884_v10 = vand.u32 4294901760, %v15446_v44 }
 0x1ec   : > { %v15460_v20 = vpack.c.bf16 %v1777_v0, %v1774_v30  ;;  %v15462_v22 = vsub.f32 %v885_v4, %v1777_v0  ;;  %14064 = vmatprep.subr.bf16.mxu1 %v15444_v51  ;;  %v16880_v4 = vand.u32 4294901760, %v15434_v8 }
 0x1ed   : > { %v889_v50 = vpop.xlane.xlu0 %888  ;;  %v1933_v38 = vand.u32 4294901760, %v1932_v55 }
 0x1ee   : > { %16878 = vst [vmem:[#allocation24_spill] sm:$0xff] %v15460_v20  ;;  %v1783_v48 = vand.u32 4294901760, %v889_v50  ;;  %14156 = vmatprep.subr.bf16.mxu0 %v15460_v20  ;;  %v1115_v30 = vsub.f32 %v15434_v8, %v16880_v4 }
 0x1ef   : > { %14066 = vmatpush3.bf16.msra.mxu1 %v15444_v51  ;;  %14158 = vmatpush3.bf16.msra.mxu0 %v15460_v20  ;;  %v14163_v20 = vpack.c.bf16 %v1926_v19, %v1919_v49  ;;  %v15491_v51 = vand.u32 4294901760, %v15411_v42  ;;  %v16886_v19 = vsub.f32 %v15343_v62, %v15366_v21  ;;  %v16887_v49 = vand.u32 4294901760, %v15451_v18 }
 0x1f0   : > { %v15486_v4 = vpack.c.bf16 %v1783_v48, %v1780_v33  ;;  %v15488_v0 = vsub.f32 %v889_v50, %v1783_v48  ;;  %14068 = vmatprep.subr.bf16.mxu1 %v14067_v14  ;;  %v1116_v58 = vand.u32 4294901760, %v1115_v30  ;;  %v1129_v33 = vsub.f32 %v15446_v44, %v16884_v10 }
 0x1f1   : > { %16883 = vst [vmem:[#allocation25_spill] sm:$0xff] %v15491_v51  ;;  %v16885_v50 = vand.u32 4294901760, %v15462_v22  ;;  %v1040_v27 = vand.u32 4294901760, %v16886_v19  ;;  %v1109_v30 = vand.u32 4294901760, %v1108_v56  ;;  %v1122_v10 = vsub.f32 %v15451_v18, %v16887_v49 }
 0x1f2   : > { %v16844_v57 = vand.u32 4294901760, %v15488_v0  ;;  %12898 = vmatmul.mubr.f32.vlgmr.msra.gmra.mrb[0].mxu1 %v15381_v35  ;;  %14160 = vmatprep.subr.bf16.mxu0 %v15486_v4  ;;  %v14167_v55 = vpack.c.bf16 %v1940_v5, %v1933_v38  ;;  %v1059_v48 = vsub.f32 %v15390_v43, %v15424_v11  ;;  %v1069_v56 = vsub.f32 %v15411_v42, %v15491_v51 }
 0x1f3   : > { %v1953_v61 = vsub.f32 %v15462_v22, %v16885_v50  ;;  %14070 = vmatpush3.bf16.msra.mxu1 %v14067_v14  ;;  %14162 = vmatpush3.bf16.msra.mxu0 %v15486_v4  ;;  %v1946_v14 = vsub.f32 %v15458_v59, %v16837_v1  ;;  %v16888_v50 = vsub.f32 %v15350_v2, %v15372_v23  ;;  %v1130_v5 = vand.u32 4294901760, %v1129_v33 }
 0x1f4   : > { %14072 = vmatprep.subr.bf16.mxu1 %v14071_v17  ;;  %14164 = vmatprep.subr.bf16.mxu0 %v14163_v20  ;;  %v1967_v49 = vsub.f32 %v15488_v0, %v16844_v57  ;;  %v14075_v1 = vpack.c.bf16 %v1116_v58, %v1109_v30  ;;  %v16889_v23 = vand.u32 4294901760, %v15484_v52  ;;  %v1060_v57 = vand.u32 4294901760, %v1059_v48  ;;  %v16894_v30 = vld [vmem:[#allocation17_spill] sm:$0xff] }
 0x1f5   : > { %12900 = vmatprep.mubr.f32.mxu1 %v15387_v41  ;;  %v1050_v19 = vand.u32 4294901760, %v16888_v50  ;;  %v1954_v38 = vand.u32 4294901760, %v1953_v61  ;;  %v1123_v50 = vand.u32 4294901760, %v1122_v10  ;;  %v1947_v11 = vand.u32 4294901760, %v1946_v14 }
 0x1f6   : > { %12901 = vmatmul.mubr.f32.gmra.mrb[2].mxu1 %v15398_v60  ;;  %13066 = vmatmul.mubr.f32.vlgmr.msra.gmra.mrb[8].mxu0 %v15381_v35  ;;  %v1960_v51 = vsub.f32 %v15484_v52, %v16889_v23  ;;  %v1070_v33 = vand.u32 4294901760, %v1069_v56  ;;  %v14083_v23 = vpack.c.bf16 %v15352_v3, %v15359_v12  ;;  %v14187_v61 = vpack.c.bf16 %v15462_v22, %v15458_v59 }
 0x1f7   : > { %14074 = vmatpush3.bf16.msra.mxu1 %v14071_v17  ;;  %14166 = vmatpush3.bf16.msra.mxu0 %v14163_v20  ;;  %v14079_v35 = vpack.c.bf16 %v1130_v5, %v1123_v50  ;;  %v14171_v58 = vpack.c.bf16 %v1954_v38, %v1947_v11  ;;  %v1968_v17 = vand.u32 4294901760, %v1967_v49  ;;  %v14091_v11 = vpack.c.bf16 %v15434_v8, %v15429_v13  ;;  %v16906_v49 = vld [vmem:[#allocation21_spill] sm:$0xff]  ;;  %v16911_v50 = vld [vmem:[#allocation22_spill] sm:$0xff] }
 0x1f8   : > { %14076 = vmatprep.subr.bf16.mxu1 %v14075_v1  ;;  %14168 = vmatprep.subr.bf16.mxu0 %v14167_v55  ;;  %v1961_v20 = vand.u32 4294901760, %v1960_v51  ;;  %v14087_v51 = vpack.c.bf16 %v15376_v26, %v15345_v63  ;;  %v16898_v10 = vand.u32 4294901760, %v15395_v40  ;;  %v16899_v14 = vand.u32 4294901760, %v15379_v32 }
 0x1f9   : > { %12903 = vmatprep.mubr.f32.mxu1 %v1040_v27  ;;  %13068 = vmatprep.mubr.f32.mxu0 %v15387_v41  ;;  %v16910_v5 = vand.u32 4294901760, %v15462_v22 }
 0x1fa   : > { %12904 = vmatmul.mubr.f32.gmra.mrb[4].mxu1 %v1050_v19  ;;  %13069 = vmatmul.mubr.f32.gmra.mrb[10].mxu0 %v15398_v60  ;;  %v14175_v41 = vpack.c.bf16 %v1968_v17, %v1961_v20  ;;  %v14179_v60 = vpack.c.bf16 %v15379_v32, %v15395_v40  ;;  %v16904_v32 = vand.u32 4294901760, %v15393_v31 }
 0x1fb   : > { %14078 = vmatpush3.bf16.msra.mxu1 %v14075_v1  ;;  %14170 = vmatpush3.bf16.msra.mxu0 %v14167_v55  ;;  %v14183_v1 = vpack.c.bf16 %v15414_v7, %v15393_v31  ;;  %v14211_v55 = vpack.c.bf16 %v16899_v14, %v16898_v10 }
 0x1fc   : > { %14080 = vmatprep.subr.bf16.mxu1 %v14079_v35  ;;  %14172 = vmatprep.subr.bf16.mxu0 %v14171_v58 }
 0x1fd   : > { %12906 = vmatprep.mubr.f32.mxu1 %v1060_v57  ;;  %13071 = vmatprep.mubr.f32.mxu0 %v1040_v27  ;;  %v14191_v27 = vpack.c.bf16 %v15488_v0, %v15484_v52 }
 0x1fe   : > { %12907 = vmatmul.mubr.f32.gmra.mrb[6].mxu1 %v1070_v33  ;;  %13072 = vmatmul.mubr.f32.gmra.mrb[12].mxu0 %v1050_v19  ;;  %v16905_v19 = vand.u32 4294901760, %v15414_v7  ;;  %v16909_v7 = vand.u32 4294901760, %v15458_v59 }
 0x1ff   : > { %14082 = vmatpush3.bf16.msra.mxu1 %v14079_v35  ;;  %14174 = vmatpush3.bf16.msra.mxu0 %v14171_v58  ;;  %v16912_v35 = vld [vmem:[#allocation25_spill] sm:$0xff] }
 0x200   : > { %14084 = vmatprep.subr.bf16.mxu1 %v14083_v23  ;;  %14176 = vmatprep.subr.bf16.mxu0 %v14175_v41  ;;  %v14215_v56 = vpack.c.bf16 %v16905_v19, %v16904_v32  ;;  %v14219_v38 = vpack.c.bf16 %v16910_v5, %v16909_v7 }
 0x201   : > { %12925 = vmatprep.mubr.f32.mxu1 %v15266_v15  ;;  %13074 = vmatprep.mubr.f32.mxu0 %v1060_v57  ;;  %v14095_v57 = vpack.c.bf16 %v15446_v44, %v15451_v18 }
 0x202   : > { %12926 = vmatmul.mubr.f32.vlgmr.msra.gmra.mrb[0].mxu1 %v15289_v28  ;;  %13075 = vmatmul.mubr.f32.gmra.mrb[14].mxu0 %v1070_v33 }
 0x203   : > { %14086 = vmatpush3.bf16.msra.mxu1 %v14083_v23  ;;  %14178 = vmatpush3.bf16.msra.mxu0 %v14175_v41 }
 0x204   : > { %14088 = vmatprep.subr.bf16.mxu1 %v14087_v51  ;;  %14180 = vmatprep.subr.bf16.mxu0 %v14179_v60 }
 0x205   : > { %12928 = vmatprep.mubr.f32.mxu1 %v15291_v29  ;;  %13093 = vmatprep.mubr.f32.mxu0 %v15266_v15 }
 0x206   : > { %12929 = vmatmul.mubr.f32.gmra.mrb[2].mxu1 %v15300_v34  ;;  %13094 = vmatmul.mubr.f32.vlgmr.msra.gmra.mrb[8].mxu0 %v15289_v28 }
 0x207   : > { %14090 = vmatpush3.bf16.msra.mxu1 %v14087_v51  ;;  %14182 = vmatpush3.bf16.msra.mxu0 %v14179_v60 }
 0x208   : > { %14092 = vmatprep.subr.bf16.mxu1 %v14091_v11  ;;  %14184 = vmatprep.subr.bf16.mxu0 %v14183_v1 }
 0x209   : > { %12931 = vmatprep.mubr.f32.mxu1 %v15315_v47  ;;  %13096 = vmatprep.mubr.f32.mxu0 %v15291_v29 }
 0x20a   : > { %12932 = vmatmul.mubr.f32.gmra.mrb[4].mxu1 %v15325_v53  ;;  %13097 = vmatmul.mubr.f32.gmra.mrb[10].mxu0 %v15300_v34 }
 0x20b   : > { %14094 = vmatpush3.bf16.msra.mxu1 %v14091_v11  ;;  %14186 = vmatpush3.bf16.msra.mxu0 %v14183_v1 }
 0x20c   : > { %14096 = vmatprep.subr.bf16.mxu1 %v14095_v57  ;;  %14188 = vmatprep.subr.bf16.mxu0 %v14187_v61 }
 0x20d   : > { %12934 = vmatprep.mubr.f32.mxu1 %v15356_v9  ;;  %13099 = vmatprep.mubr.f32.mxu0 %v15315_v47 }
 0x20e   : > { %12935 = vmatmul.mubr.f32.gmra.mrb[6].mxu1 %v15374_v25  ;;  %13100 = vmatmul.mubr.f32.gmra.mrb[12].mxu0 %v15325_v53 }
 0x20f   : > { %14098 = vmatpush3.bf16.msra.mxu1 %v14095_v57  ;;  %14190 = vmatpush3.bf16.msra.mxu0 %v14187_v61 }
 0x210   : > { %14100 = vmatprep.subr.bf16.mxu1 %v15310_v45  ;;  %14192 = vmatprep.subr.bf16.mxu0 %v14191_v27 }
 0x211   : > { %12953 = vmatprep.mubr.f32.mxu1 %v15269_v16  ;;  %13102 = vmatprep.mubr.f32.mxu0 %v15356_v9 }
 0x212   : > { %12954 = vmatmul.mubr.f32.vlgmr.msra.gmra.mrb[0].mxu1 %v15303_v36  ;;  %13103 = vmatmul.mubr.f32.gmra.mrb[14].mxu0 %v15374_v25 }
 0x213   : > { %14102 = vmatpush3.bf16.msra.mxu1 %v15310_v45  ;;  %14194 = vmatpush3.bf16.msra.mxu0 %v14191_v27 }
 0x214   : > { %14104 = vmatprep.subr.bf16.mxu1 %v15327_v54  ;;  %14196 = vmatprep.subr.bf16.mxu0 %v15369_v24 }
 0x215   : > { %12956 = vmatprep.mubr.f32.mxu1 %v15306_v37  ;;  %13121 = vmatprep.mubr.f32.mxu0 %v15269_v16  ;;  %v16890_v16 = vld [vmem:[#allocation23_spill] sm:$0xff] }
 0x216   : > { %12957 = vmatmul.mubr.f32.gmra.mrb[2].mxu1 %v15313_v46  ;;  %13122 = vmatmul.mubr.f32.vlgmr.msra.gmra.mrb[8].mxu0 %v15303_v36  ;;  %v16891_v36 = vld [vmem:[#allocation24_spill] sm:$0xff] }
 0x217   : > { %14106 = vmatpush3.bf16.msra.mxu1 %v15327_v54  ;;  %14198 = vmatpush3.bf16.msra.mxu0 %v15369_v24 }
 0x218   : > { %14108 = vmatprep.subr.bf16.mxu1 %v15432_v6  ;;  %14200 = vmatprep.subr.bf16.mxu0 %v15384_v39 }
 0x219   : > { %12959 = vmatprep.mubr.f32.mxu1 %v15343_v62  ;;  %13124 = vmatprep.mubr.f32.mxu0 %v15306_v37  ;;  %v16892_v37 = vand.u32 4294901760, %v15359_v12 }
 0x21a   : > { %12960 = vmatmul.mubr.f32.gmra.mrb[4].mxu1 %v15350_v2  ;;  %13125 = vmatmul.mubr.f32.gmra.mrb[10].mxu0 %v15313_v46  ;;  %v16893_v46 = vand.u32 4294901760, %v15352_v3  ;;  %v16897_v3 = vand.u32 4294901760, %v15376_v26  ;;  %v16903_v26 = vand.u32 4294901760, %v15434_v8  ;;  %v16907_v8 = vand.u32 4294901760, %v15451_v18 }
 0x21b   : > { %14110 = vmatpush3.bf16.msra.mxu1 %v15432_v6  ;;  %14202 = vmatpush3.bf16.msra.mxu0 %v15384_v39  ;;  %v16914_v18 = vand.u32 4294901760, %v15488_v0 }
 0x21c   : > { %14112 = vmatprep.subr.bf16.mxu1 %v16890_v16  ;;  %14204 = vmatprep.subr.bf16.mxu0 %v16891_v36  ;;  %v14115_v48 = vpack.c.bf16 %v16893_v46, %v16892_v37 }
 0x21d   : > { %12962 = vmatprep.mubr.f32.mxu1 %v15390_v43  ;;  %13127 = vmatprep.mubr.f32.mxu0 %v15343_v62  ;;  %v16895_v62 = vld [vmem:[#allocation18_spill] sm:$0xff] }
 0x21e   : > { %12963 = vmatmul.mubr.f32.gmra.mrb[6].mxu1 %v15411_v42  ;;  %13128 = vmatmul.mubr.f32.gmra.mrb[12].mxu0 %v15350_v2  ;;  %v16896_v2 = vand.u32 4294901760, %v15345_v63  ;;  %v16902_v63 = vand.u32 4294901760, %v15429_v13  ;;  %v16908_v13 = vand.u32 4294901760, %v15446_v44  ;;  %v16913_v44 = vand.u32 4294901760, %v15484_v52 }
 0x21f   : > { %14114 = vmatpush3.bf16.msra.mxu1 %v16890_v16  ;;  %14206 = vmatpush3.bf16.msra.mxu0 %v16891_v36 }
 0x220   : > { %14116 = vmatprep.subr.bf16.mxu1 %v14115_v48  ;;  %14208 = vmatprep.subr.bf16.mxu0 %v15486_v4  ;;  %v14119_v12 = vpack.c.bf16 %v16897_v3, %v16896_v2  ;;  %v14123_v40 = vpack.c.bf16 %v16903_v26, %v16902_v63  ;;  %v14127_v31 = vpack.c.bf16 %v16908_v13, %v16907_v8 }
 0x221   : > { %12981 = vmatprep.mubr.f32.mxu1 %v16894_v30  ;;  %13130 = vmatprep.mubr.f32.mxu0 %v15390_v43  ;;  %v16900_v43 = vld [vmem:[#allocation19_spill] sm:$0xff]  ;;  %v14223_v59 = vpack.c.bf16 %v16914_v18, %v16913_v44  ;;  %v2657_v44 = vld [vmem:[%s16915_s3 + $0x8] sm:$0xff] }
 0x222   : > { %12982 = vmatmul.mubr.f32.vlgmr.msra.gmra.mrb[0].mxu1 %v16895_v62  ;;  %13131 = vmatmul.mubr.f32.gmra.mrb[14].mxu0 %v15411_v42  ;;  %v16901_v42 = vld [vmem:[#allocation20_spill] sm:$0xff] }
 0x223   : > { %14118 = vmatpush3.bf16.msra.mxu1 %v14115_v48  ;;  %14210 = vmatpush3.bf16.msra.mxu0 %v15486_v4 }
 0x224   : > { %14120 = vmatprep.subr.bf16.mxu1 %v14119_v12  ;;  %14212 = vmatprep.subr.bf16.mxu0 %v14211_v55 }
 0x225   : > { %12984 = vmatprep.mubr.f32.mxu1 %v16900_v43  ;;  %13149 = vmatprep.mubr.f32.mxu0 %v16894_v30 }
 0x226   : > { %12985 = vmatmul.mubr.f32.gmra.mrb[2].mxu1 %v16901_v42  ;;  %13150 = vmatmul.mubr.f32.vlgmr.msra.gmra.mrb[8].mxu0 %v16895_v62 }
 0x227   : > { %14122 = vmatpush3.bf16.msra.mxu1 %v14119_v12  ;;  %14214 = vmatpush3.bf16.msra.mxu0 %v14211_v55 }
 0x228   : > { %14124 = vmatprep.subr.bf16.mxu1 %v14123_v40  ;;  %14216 = vmatprep.subr.bf16.mxu0 %v14215_v56 }
 0x229   : > { %12987 = vmatprep.mubr.f32.mxu1 %v15366_v21  ;;  %13152 = vmatprep.mubr.f32.mxu0 %v16900_v43 }
 0x22a   : > { %12988 = vmatmul.mubr.f32.gmra.mrb[4].mxu1 %v16906_v49  ;;  %13153 = vmatmul.mubr.f32.gmra.mrb[10].mxu0 %v16901_v42 }
 0x22b   : > { %14126 = vmatpush3.bf16.msra.mxu1 %v14123_v40  ;;  %14218 = vmatpush3.bf16.msra.mxu0 %v14215_v56 }
 0x22c   : > { %14128 = vmatprep.subr.bf16.mxu1 %v14127_v31  ;;  %14220 = vmatprep.subr.bf16.mxu0 %v14219_v38 }
 0x22d   : > { %12990 = vmatprep.mubr.f32.mxu1 %v16911_v50  ;;  %13155 = vmatprep.mubr.f32.mxu0 %v15366_v21 }
 0x22e   : > { %12991 = vmatmul.mubr.f32.gmra.mrb[6].mxu1 %v16912_v35  ;;  %13156 = vmatmul.mubr.f32.gmra.mrb[12].mxu0 %v16906_v49 }
 0x22f   : > { %14130 = vmatpush3.bf16.msra.mxu1 %v14127_v31  ;;  %14222 = vmatpush3.bf16.msra.mxu0 %v14219_v38 }
 0x230   : > { %14132 = vmatprep.subr.bf16.mxu1 %v15310_v45  ;;  %14224 = vmatprep.subr.bf16.mxu0 %v14223_v59 }
 0x231   : > { %13009 = vmatprep.mubr.f32.mxu1 %v15266_v15  ;;  %13158 = vmatprep.mubr.f32.mxu0 %v16911_v50 }
 0x232   : > { %13010 = vmatmul.mubr.f32.vlgmr.msra.gmra.mrb[0].mxu1 %v15289_v28  ;;  %13159 = vmatmul.mubr.f32.gmra.mrb[14].mxu0 %v16912_v35 }
 0x233   : > { %14134 = vmatpush3.bf16.msra.mxu1 %v15310_v45  ;;  %14226 = vmatpush3.bf16.msra.mxu0 %v14223_v59  ;;  %v2656_v59 = vld [vmem:[%s16915_s3] sm:$0xff] }
 0x234   : > { %14136 = vmatprep.subr.bf16.mxu1 %v15327_v54  ;;  %14228 = vmatprep.subr.bf16.mxu0 %v15369_v24 }
 0x235   : > { %13012 = vmatprep.mubr.f32.mxu1 %v15291_v29  ;;  %13177 = vmatprep.mubr.f32.mxu0 %v15266_v15 }
 0x236   : > { %13013 = vmatmul.mubr.f32.gmra.mrb[2].mxu1 %v15300_v34  ;;  %13178 = vmatmul.mubr.f32.vlgmr.msra.gmra.mrb[8].mxu0 %v15289_v28 }
 0x237   : > { %14138 = vmatpush3.bf16.msra.mxu1 %v15327_v54  ;;  %14230 = vmatpush3.bf16.msra.mxu0 %v15369_v24 }
 0x238   : > { %14140 = vmatprep.subr.bf16.mxu1 %v15432_v6  ;;  %14232 = vmatprep.subr.bf16.mxu0 %v15384_v39 }
 0x239   : > { %13015 = vmatprep.mubr.f32.mxu1 %v15315_v47  ;;  %13180 = vmatprep.mubr.f32.mxu0 %v15291_v29 }
 0x23a   : > { %13016 = vmatmul.mubr.f32.gmra.mrb[4].mxu1 %v15325_v53  ;;  %13181 = vmatmul.mubr.f32.gmra.mrb[10].mxu0 %v15300_v34 }
 0x23b   : > { %14142 = vmatpush3.bf16.msra.mxu1 %v15432_v6  ;;  %14234 = vmatpush3.bf16.msra.mxu0 %v15384_v39 }
 0x23c   : > { %14144 = vmatprep.subr.bf16.mxu1 %v16890_v16  ;;  %14236 = vmatprep.subr.bf16.mxu0 %v16891_v36 }
 0x23d   : > { %13018 = vmatprep.mubr.f32.mxu1 %v15356_v9  ;;  %13183 = vmatprep.mubr.f32.mxu0 %v15315_v47 }
 0x23e   : > { %13019 = vmatmul.mubr.f32.gmra.mrb[6].mxu1 %v15374_v25  ;;  %13184 = vmatmul.mubr.f32.gmra.mrb[12].mxu0 %v15325_v53 }
 0x23f   : > { %14146 = vmatpush3.bf16.msra.mxu1 %v16890_v16  ;;  %14238 = vmatpush3.bf16.msra.mxu0 %v16891_v36 }
 0x240   : > { %14240 = vmatprep.subr.bf16.mxu0 %v15486_v4  ;;  %13037 = vmatprep.mubr.f32.mxu1 %v15266_v15 }
 0x241   : > { %13186 = vmatprep.mubr.f32.mxu0 %v15356_v9 }
 0x242   : > { %13038 = vmatmul.mubr.f32.vlgmr.msra.gmra.mrb[0].mxu1 %v15289_v28  ;;  %13187 = vmatmul.mubr.f32.gmra.mrb[14].mxu0 %v15374_v25 }
 0x243   : > { %14242 = vmatpush3.bf16.msra.mxu0 %v15486_v4  ;;  %13040 = vmatprep.mubr.f32.mxu1 %v15291_v29 }
 0x244   : > { %13205 = vmatprep.mubr.f32.mxu0 %v15266_v15 }
 0x246   : > { %13041 = vmatmul.mubr.f32.gmra.mrb[2].mxu1 %v15300_v34  ;;  %13206 = vmatmul.mubr.f32.vlgmr.msra.gmra.mrb[8].mxu0 %v15289_v28 }
 0x247   : > { %13043 = vmatprep.mubr.f32.mxu1 %v15315_v47  ;;  %13208 = vmatprep.mubr.f32.mxu0 %v15291_v29 }
 0x24a   : > { %13044 = vmatmul.mubr.f32.gmra.mrb[4].mxu1 %v15325_v53  ;;  %13209 = vmatmul.mubr.f32.gmra.mrb[10].mxu0 %v15300_v34 }
 0x24b   : > { %13046 = vmatprep.mubr.f32.mxu1 %v15356_v9  ;;  %13211 = vmatprep.mubr.f32.mxu0 %v15315_v47 }
 0x24e   : > { %13047 = vmatmul.mubr.f32.gmra.mrb[6].mxu1 %v15374_v25  ;;  %13212 = vmatmul.mubr.f32.gmra.mrb[12].mxu0 %v15325_v53 }
 0x24f   : > { %13214 = vmatprep.mubr.f32.mxu0 %v15356_v9 }
 0x252   : > { %13215 = vmatmul.mubr.f32.gmra.mrb[14].mxu0 %v15374_v25 }
 0x315   : > { %v13039_v15 = vpop.f32.mrb[0].mxu1 }
 0x316   : > { %v15691_v28 = vmul.f32 0.0009765625, %v13039_v15  ;;  %v1715_v29 = vpop.f32.mrb[1].mxu1 }
 0x317   : > { %v15693_v45 = vmul.f32 0.0009765625, %v1715_v29 }
 0x318   : > { %v2617_v54 = vmul.f32 %v15691_v28, %v15691_v28 }
 0x319   : > { %v13042_v52 = vpop.f32.mrb[2].mxu1  ;;  %v13207_v34 = vpop.f32.mrb[8].mxu0  ;;  %v2616_v9 = vmul.f32 %v15693_v45, %v15693_v45 }
 0x31a   : > { %v15697_v47 = vmul.f32 0.0009765625, %v13042_v52  ;;  %v2609_v21 = vmul.f32 0.0009765625, %v13207_v34  ;;  %v1727_v24 = vpop.f32.mrb[3].mxu1  ;;  %v2553_v53 = vpop.f32.mrb[9].mxu0 }
 0x31b   : > { %v15701_v25 = vmul.f32 0.0009765625, %v1727_v24  ;;  %v2608_v39 = vmul.f32 0.0009765625, %v2553_v53  ;;  %v2673_v24 = vld [vmem:[%s16915_s3 + $0x48] sm:$0xff]  ;;  %v2659_v53 = vld [vmem:[%s16915_s3 + $0x18] sm:$0xff] }
 0x31c   : > { %v2625_v6 = vsub.f32 %v2609_v21, %v2617_v54  ;;  %v2619_v58 = vmul.f32 %v15697_v47, %v15697_v47 }
 0x31d   : > { %v2624_v22 = vsub.f32 %v2608_v39, %v2616_v9  ;;  %v13045_v0 = vpop.f32.mrb[4].mxu1  ;;  %v13210_v4 = vpop.f32.mrb[10].mxu0  ;;  %v2618_v51 = vmul.f32 %v15701_v25, %v15701_v25  ;;  %v2658_v39 = vld [vmem:[%s16915_s3 + $0x10] sm:$0xff] }
 0x31e   : > { %v2633_v33 = vmax.f32 %v2625_v6, 0.0  ;;  %v15705_v17 = vmul.f32 0.0009765625, %v13045_v0  ;;  %v2611_v20 = vmul.f32 0.0009765625, %v13210_v4  ;;  %v1739_v23 = vpop.f32.mrb[5].mxu1  ;;  %v2565_v41 = vpop.f32.mrb[11].mxu0 }
 0x31f   : > { %v2632_v60 = vmax.f32 %v2624_v22, 0.0  ;;  %v15709_v11 = vmul.f32 0.0009765625, %v1739_v23  ;;  %v2610_v1 = vmul.f32 0.0009765625, %v2565_v41  ;;  %v2660_v23 = vld [vmem:[%s16915_s3 + $0x20] sm:$0xff] }
 0x320   : > { %v2641_v57 = vadd.f32 1e-05, %v2633_v33  ;;  %v2627_v61 = vsub.f32 %v2611_v20, %v2619_v58  ;;  %v2621_v16 = vmul.f32 %v15705_v17, %v15705_v17  ;;  %v2661_v20 = vld [vmem:[%s16915_s3 + $0x28] sm:$0xff] }
 0x321   : > { %v2640_v27 = vadd.f32 1e-05, %v2632_v60  ;;  %v2620_v36 = vmul.f32 %v15709_v11, %v15709_v11  ;;  %v2626_v37 = vsub.f32 %v2610_v1, %v2618_v51  ;;  %v13048_v46 = vpop.f32.mrb[6].mxu1  ;;  %v13213_v48 = vpop.f32.mrb[12].mxu0 }
 0x322   : > { %14895 = vrsqrt.f32 %v2641_v57  ;;  %v2635_v30 = vmax.f32 %v2627_v61, 0.0  ;;  %v15715_v62 = vmul.f32 0.0009765625, %v13048_v46  ;;  %v2613_v2 = vmul.f32 0.0009765625, %v13213_v48  ;;  %v1751_v3 = vpop.f32.mrb[7].mxu1  ;;  %v2577_v12 = vpop.f32.mrb[13].mxu0 }
 0x323   : > { %14897 = vrsqrt.f32 %v2640_v27  ;;  %v2634_v10 = vmax.f32 %v2626_v37, 0.0  ;;  %v15717_v14 = vmul.f32 0.0009765625, %v1751_v3  ;;  %v2612_v55 = vmul.f32 0.0009765625, %v2577_v12  ;;  %v2663_v27 = vld [vmem:[%s16915_s3 + $0x38] sm:$0xff]  ;;  %v2676_v12 = vld [vmem:[%s16915_s3 + $0x60] sm:$0xff] }
 0x324   : > { %v2643_v43 = vadd.f32 1e-05, %v2635_v30  ;;  %v2629_v42 = vsub.f32 %v2613_v2, %v2621_v16  ;;  %v2623_v32 = vmul.f32 %v15715_v62, %v15715_v62  ;;  %v2672_v16 = vld [vmem:[%s16915_s3 + $0x40] sm:$0xff]  ;;  %v2675_v3 = vld [vmem:[%s16915_s3 + $0x58] sm:$0xff] }
 0x325   : > { %v2642_v63 = vadd.f32 1e-05, %v2634_v10  ;;  %v2628_v26 = vsub.f32 %v2612_v55, %v2620_v36  ;;  %v13216_v40 = vpop.f32.mrb[14].mxu0  ;;  %v2622_v8 = vmul.f32 %v15717_v14, %v15717_v14 }
 0x326   : > { %14899 = vrsqrt.f32 %v2643_v43  ;;  %v2637_v19 = vmax.f32 %v2629_v42, 0.0  ;;  %v2615_v56 = vmul.f32 0.0009765625, %v13216_v40  ;;  %v2589_v49 = vpop.f32.mrb[15].mxu0  ;;  %v2677_v43 = vld [vmem:[%s16915_s3 + $0x68] sm:$0xff]  ;;  %v2678_v42 = vld [vmem:[%s16915_s3 + $0x70] sm:$0xff] }
 0x327   : > { %14901 = vrsqrt.f32 %v2642_v63  ;;  %v2636_v13 = vmax.f32 %v2628_v26, 0.0  ;;  %v2614_v31 = vmul.f32 0.0009765625, %v2589_v49  ;;  %v2679_v26 = vld [vmem:[%s16915_s3 + $0x78] sm:$0xff]  ;;  %v2810_v40 = vld [vmem:[%s16915_s3 + $0x90] sm:$0xff]  ;;  %v14886_v49 = vld [vmem:[%s16787_s8] sm:$0xff]  }
 0x328   : > { %v2645_v7 = vadd.f32 1e-05, %v2637_v19  ;;  %v2631_v5 = vsub.f32 %v2615_v56, %v2623_v32  ;;  %v2809_v19 = vld [vmem:[%s16915_s3 + $0x88] sm:$0xff]  ;;  %v2811_v56 = vld [vmem:[%s16915_s3 + $0x98] sm:$0xff]  ;;  %13225 = vmatprep.mubr.msk.bf16.mxu1 %vm898_vm1, %v14886_v49 }
 0x329   : > { %v2644_v38 = vadd.f32 1e-05, %v2636_v13  ;;  %v2630_v50 = vsub.f32 %v2614_v31, %v2622_v8 }
 0x32a   : > { %14903 = vrsqrt.f32 %v2645_v7  ;;  %v2639_v35 = vmax.f32 %v2631_v5, 0.0 }
 0x32b   : > { %14905 = vrsqrt.f32 %v2644_v38  ;;  %v2638_v18 = vmax.f32 %v2630_v50, 0.0  ;;  %v16916_v50 = vld [vmem:[#allocation12_spill] sm:$0xff] }
 0x32c   : > { %v14896_v15 = vpop.eup %14895  ;;  %v2647_v29 = vadd.f32 1e-05, %v2639_v35 }
 0x32d   : > { %v14898_v52 = vpop.eup %14897  ;;  %v2646_v34 = vadd.f32 1e-05, %v2638_v18  ;;  %v2665_v54 = vmul.f32 %v14896_v15, %v2657_v44  ;;  %v16917_v44 = vld [vmem:[#allocation10_spill] sm:$0xff] }
 0x32e   : > { %14907 = vrsqrt.f32 %v2647_v29  ;;  %v2664_v21 = vmul.f32 %v14898_v52, %v2656_v59  ;;  %v16918_v52 = vld [vmem:[#allocation9_spill] sm:$0xff] }
 0x32f   : > { %14909 = vrsqrt.f32 %v2646_v34  ;;  %2703 = vperm.xlu0 %14880, %v2665_v54   ;;  %v2681_v9 = vmul.f32 %v2665_v54, %v15691_v28  ;;  %v2674_v28 = vld [vmem:[%s16915_s3 + $0x50] sm:$0xff] }
 0x330   : > { %v14900_v6 = vpop.eup %14899  ;;  %2698 = vperm.xlu1 %14881, %v2664_v21   ;;  %v2680_v22 = vmul.f32 %v2664_v21, %v15693_v45 }
 0x331   : > { %v14902_v0 = vpop.eup %14901  ;;  %v2689_v4 = vsub.f32 %v2673_v24, %v2681_v9  ;;  %v2667_v58 = vmul.f32 %v14900_v6, %v2659_v53  ;;  %v16919_v24 = vld [vmem:[#allocation11_spill] sm:$0xff] }
 0x332   : > { %v2666_v33 = vmul.f32 %v14902_v0, %v2658_v39  ;;  %v2688_v30 = vsub.f32 %v2672_v16, %v2680_v22 }
 0x333   : > { %v2683_v41 = vmul.f32 %v2667_v58, %v15697_v47  ;;  %v2662_v47 = vld [vmem:[%s16915_s3 + $0x30] sm:$0xff] }
 0x334   : > { %v14904_v51 = vpop.eup %14903  ;;  %2751 = vperm.xlu1 %14881, %v2689_v4   ;;  %2708 = vperm.xlu0 %14880, %v2666_v33   ;;  %v2682_v45 = vmul.f32 %v2666_v33, %v15701_v25 }
 0x335   : > { %v14906_v60 = vpop.eup %14905  ;;  %v2669_v1 = vmul.f32 %v14904_v51, %v2661_v20  ;;  %v2691_v55 = vsub.f32 %v2675_v3, %v2683_v41 }
 0x336   : > { %v2690_v57 = vsub.f32 %v2674_v28, %v2682_v45  ;;  %v2668_v61 = vmul.f32 %v14906_v60, %v2660_v23  ;;  %v16920_v28 = vld [vmem:[#allocation14_spill] sm:$0xff]  ;;  %v16921_v60 = vld [vmem:[#allocation16_spill] sm:$0xff] }
 0x337   : > { %v2685_v36 = vmul.f32 %v2669_v1, %v15705_v17 }
 0x338   : > { %v14908_v37 = vpop.eup %14907  ;;  %2713 = vperm.xlu1 %14881, %v2667_v58   ;;  %2756 = vperm.xlu0 %14880, %v2690_v57   ;;  %v2684_v25 = vmul.f32 %v2668_v61, %v15709_v11 }
 0x339   : > { %v14910_v46 = vpop.eup %14909  ;;  %v2671_v48 = vmul.f32 %v14908_v37, %v2663_v27  ;;  %v2693_v63 = vsub.f32 %v2677_v43, %v2685_v36  ;;  %v16922_v37 = vld [vmem:[#allocation13_spill] sm:$0xff] }
 0x33a   : > { %v2670_v2 = vmul.f32 %v14910_v46, %v2662_v47  ;;  %v2692_v11 = vsub.f32 %v2676_v12, %v2684_v25 }
 0x33b   : > { %v2687_v10 = vmul.f32 %v2671_v48, %v15715_v62 }
 0x33c   : > { %2746 = vperm.xlu1 %14881, %v2688_v30   ;;  %2718 = vperm.xlu0 %14880, %v2668_v61   ;;  %v2686_v17 = vmul.f32 %v2670_v2, %v15717_v14  ;;  %v2808_v14 = vld [vmem:[%s16915_s3 + $0x80] sm:$0xff]  ;;  %v16923_v30 = vld [vmem:[#allocation15_spill] sm:$0xff] }
 0x33d   : > { %v2695_v32 = vsub.f32 %v2679_v26, %v2687_v10 }
 0x33e   : > { %v2694_v62 = vsub.f32 %v2678_v42, %v2686_v17 }
 0x340   : > { %2761 = vperm.xlu1 %14881, %v2691_v55   ;;  %2766 = vperm.xlu0 %14880, %v2692_v11   ;;  %v14887_v11 = vld [vmem:[%s16787_s8 + $0x8] sm:$0xff]  }
 0x344   : > { %2723 = vperm.xlu1 %14881, %v2669_v1   ;;  %2728 = vperm.xlu0 %14880, %v2670_v2  }
 0x348   : > { %2771 = vperm.xlu1 %14881, %v2693_v63   ;;  %2776 = vperm.xlu0 %14880, %v2694_v62  }
 0x34c   : > { %2733 = vperm.xlu1 %14881, %v2671_v48   ;;  %2814 = vperm.xlu0 %14880, %v2808_v14  }
 0x350   : > { %2781 = vperm.xlu1 %14881, %v2695_v32   ;;  %2824 = vperm.xlu0 %14880, %v2810_v40  }
 0x354   : > { %2819 = vperm.xlu1 %14881, %v2809_v19  }
 0x358   : > { %2829 = vperm.xlu1 %14881, %v2811_v56  }
 0x3ae   : > { %v2704_v8 = vpop.permute.xlu0 %2703 }
 0x3af   : > { %v2699_v13 = vpop.permute.xlu1 %2698  ;;  %v2737_v35 = vmul.f32 %v2704_v8, %v16916_v50 }
 0x3b0   : > { %v2736_v18 = vmul.f32 %v2699_v13, %v16917_v44 }
 0x3b3   : > { %v2752_v31 = vpop.permute.xlu1 %2751  ;;  %v2709_v7 = vpop.permute.xlu0 %2708 }
 0x3b4   : > { %v2785_v59 = vadd.f32 %v2752_v31, %v2737_v35  ;;  %v2738_v34 = vmul.f32 %v2709_v7, %v16918_v52 }
 0x3b6   : > { %v2793_v21 = vmax.f32 %v2785_v59, 0.0 }
 0x3b7   : > { %v2714_v5 = vpop.permute.xlu1 %2713  ;;  %v2757_v38 = vpop.permute.xlu0 %2756 }
 0x3b8   : > { %v2739_v53 = vmul.f32 %v2714_v5, %v16919_v24  ;;  %v2786_v9 = vadd.f32 %v2757_v38, %v2738_v34  ;;  %v2917_v38 = vld [vmem:[%s16924_s5] sm:$0xff] }
 0x3b9   : > { %v2923_v35 = vsel %vm2921_vm2, %v2917_v38, 0 }
 0x3ba   : > { %v2794_v58 = vmax.f32 %v2786_v9, 0.0  ;;  %v2920_v9 = vld [vmem:[%s16924_s5 + $0x18] sm:$0xff] }
 0x3bb   : > { %v2747_v15 = vpop.permute.xlu1 %2746  ;;  %v2719_v29 = vpop.permute.xlu0 %2718 }
 0x3bc   : > { %v2784_v54 = vadd.f32 %v2747_v15, %v2736_v18  ;;  %v2740_v23 = vmul.f32 %v2719_v29, %v16920_v28  ;;  %v15831_v18 = vand.u32 4294901760, %v2923_v35 }
 0x3be   : > { %v2792_v39 = vmax.f32 %v2784_v54, 0.0  ;;  %v15834_v59 = vsub.f32 %v2923_v35, %v15831_v18  ;;  %v2918_v54 = vld [vmem:[%s16924_s5 + $0x8] sm:$0xff] }
 0x3bf   : > { %v2762_v6 = vpop.permute.xlu1 %2761  ;;  %v2767_v22 = vpop.permute.xlu0 %2766 }
 0x3c0   : > { %v2800_v0 = vpack.c.bf16 %v2793_v21, %v2792_v39  ;;  %v2787_v4 = vadd.f32 %v2762_v6, %v2739_v53  ;;  %v2788_v45 = vadd.f32 %v2767_v22, %v2740_v23  ;;  %v15837_v15 = vand.u32 4294901760, %v15834_v59  ;;  %v2919_v21 = vld [vmem:[%s16924_s5 + $0x10] sm:$0xff]  ;;  %s14947_s5 = sshll.u32 %s15010_s27, 4  ;;  %s14948_s5 = int_to_ptr.vmem [resolvable:$false] %s14947_s5 }
 0x3c1   : > { %v2926_v53 = vsel %vm2921_vm2, %v2918_v54, 0  ;;  %v2929_v39 = vsel %vm2921_vm2, %v2919_v21, 0  ;;  %v2932_v22 = vsel %vm2921_vm2, %v2920_v9, 0  ;;  %s14949_s28 = scalar_lea.vmem %s14948_s5, 32  ;;  %p14950_p0 = scmp.lt.s32.totalorder %s16739_s23, %s14948_s5 }
 0x3c2   : > { %v2795_v33 = vmax.f32 %v2787_v4, 0.0  ;;  %13217 = vmatprep.subr.bf16.mxu1 %v2800_v0  ;;  %v2796_v27 = vmax.f32 %v2788_v45, 0.0  ;;  %v3006_v29 = vsub.f32 %v15834_v59, %v15837_v15  ;;  %v15855_v6 = vand.u32 4294901760, %v2926_v53  ;;  %p14951_p1 = scmp.lt.s32.totalorder %s14949_s28, %s14943_s26 }
 0x3c3   : > { %13218 = vmatpush3.bf16.msra.mxu1 %v2800_v0  ;;  %v2724_v20 = vpop.permute.xlu1 %2723  ;;  %v2729_v51 = vpop.permute.xlu0 %2728  ;;  %v15858_v0 = vand.u32 4294901760, %v2929_v39 }
 0x3c4   : > { %v2801_v41 = vpack.c.bf16 %v2795_v33, %v2794_v58  ;;  %v2741_v1 = vmul.f32 %v2724_v20, %v16921_v60  ;;  %v2742_v25 = vmul.f32 %v2729_v51, %v16922_v37  ;;  %v15841_v34 = vand.u32 4294901760, %v3006_v29  ;;  %p14952_p2 = por %p14951_p1, %p14950_p0 }
 0x3c5   : > { %v15861_v58 = vsub.f32 %v2926_v53, %v15855_v6  ;;  %v15863_v33 = vand.u32 4294901760, %v2932_v22 }
 0x3c6   : > { %13219 = vmatprep.subr.bf16.mxu1 %v2801_v41  ;;  %p14953_p3 = pnand %p14952_p2, %p14946_p13 }
 0x3c7   : > { %13220 = vmatpush3.bf16.msra.mxu1 %v2801_v41  ;;  %v2772_v57 = vpop.permute.xlu1 %2771  ;;  %v2777_v47 = vpop.permute.xlu0 %2776  ;;  %v15866_v41 = vsub.f32 %v2929_v39, %v15858_v0 }
 0x3c8   : > { %v2789_v61 = vadd.f32 %v2772_v57, %v2741_v1  ;;  %v2790_v48 = vadd.f32 %v2777_v47, %v2742_v25  ;;  %v15871_v57 = vand.u32 4294901760, %v15861_v58 }
 0x3c9   : > { %v15880_v25 = vand.u32 4294901760, %v15866_v41 }
 0x3ca   : > { %v2797_v16 = vmax.f32 %v2789_v61, 0.0  ;;  %v2798_v10 = vmax.f32 %v2790_v48, 0.0  ;;  %v15874_v61 = vsub.f32 %v2932_v22, %v15863_v33 }
 0x3cb   : > { %v2734_v36 = vpop.permute.xlu1 %2733  ;;  %v2815_v43 = vpop.permute.xlu0 %2814 }
 0x3cc   : > { %v2802_v46 = vpack.c.bf16 %v2797_v16, %v2796_v27  ;;  %v2743_v2 = vmul.f32 %v2734_v36, %v16923_v30 }
 0x3ce   : > { %13221 = vmatprep.subr.bf16.mxu1 %v2802_v46 }
 0x3cf   : > { %13222 = vmatpush3.bf16.msra.mxu1 %v2802_v46  ;;  %v2782_v3 = vpop.permute.xlu1 %2781  ;;  %v2825_v19 = vpop.permute.xlu0 %2824 }
 0x3d0   : > { %v2791_v12 = vadd.f32 %v2782_v3, %v2743_v2 }
 0x3d2   : > { %v2799_v17 = vmax.f32 %v2791_v12, 0.0  ;;  %v3016_v12 = vsub.f32 %v15861_v58, %v15871_v57 }
 0x3d3   : > { %v2820_v26 = vpop.permute.xlu1 %2819 }
 0x3d4   : > { %v2803_v55 = vpack.c.bf16 %v2799_v17, %v2798_v10 }
 0x3d6   : > { %13223 = vmatprep.subr.bf16.mxu1 %v2803_v55 }
 0x3d7   : > { %13224 = vmatpush3.bf16.msra.mxu1 %v2803_v55  ;;  %v2830_v8 = vpop.permute.xlu1 %2829 }
 0x3da   : > { %13226 = vmatmul.mubr.msk.bf16.vlgmr.msra.gmra.mrb[8].mxu1 %vm898_vm1, %v14887_v11  ;;  %v15888_v11 = vand.u32 4294901760, %v15874_v61 }
 0x3db   : > { %13237 = vmatprep.mubr.f32.mxu1 %v15841_v34 }
 0x4ad   : > { %v13227_v42 = vpop.f32.mrb[8].mxu1 }
 0x4ae   : > { %v2882_v63 = vpop.f32.mrb[9].mxu1  ;;  %v15812_v56 = vadd.f32 %v13227_v42, %v2825_v19 }
 0x4af   : > { %v15807_v62 = vadd.f32 %v2882_v63, %v2815_v43  ;;  %v13228_v14 = vpop.f32.mrb[10].mxu1  ;;  %v3026_v43 = vsub.f32 %v15866_v41, %v15880_v25 }
 0x4b0   : > { %v2885_v40 = vpop.f32.mrb[11].mxu1  ;;  %v15818_v13 = vadd.f32 %v13228_v14, %v2830_v8  ;;  %v2907_v31 = vmul.f32 %v15812_v56, %v15812_v56  ;;  %v3036_v8 = vsub.f32 %v15874_v61, %v15888_v11 }
 0x4b1   : > { %v15809_v32 = vadd.f32 %v2885_v40, %v2820_v26  ;;  %2897 = vadd.xlane.f32.xlu0 %v15807_v62  ;;  %v2905_v49 = vmul.f32 %v15807_v62, %v15807_v62 }
 0x4b2   : > { %v2908_v5 = vmul.f32 %v15818_v13, %v15818_v13  ;;  %v15903_v38 = vand.u32 4294901760, %v3036_v8 }
 0x4b3   : > { %2899 = vadd.xlane.f32.xlu1 %v15809_v32  ;;  %v2906_v7 = vmul.f32 %v15809_v32, %v15809_v32 }
 0x4b5   : > { %2901 = vadd.xlane.f32.xlu0 %v15812_v56 }
 0x4b7   : > { %2909 = vadd.xlane.f32.xlu1 %v2905_v49  ;;  %v15895_v49 = vand.u32 4294901760, %v3016_v12 }
 0x4b9   : > { %2903 = vadd.xlane.f32.xlu0 %v15818_v13 }
 0x4bb   : > { %2913 = vadd.xlane.f32.xlu1 %v2907_v31 }
 0x4bd   : > { %2911 = vadd.xlane.f32.xlu0 %v2906_v7  ;;  %v15900_v7 = vand.u32 4294901760, %v3026_v43 }
 0x4c1   : > { %2915 = vadd.xlane.f32.xlu0 %v2908_v5 }
 0x53e   : > { %v2898_v4 = vpop.xlane.xlu0 %2897 }
 0x53f   : > { %v2935_v20 = vand.u32 4294901760, %v2898_v4 }
 0x540   : > { %v2900_v23 = vpop.xlane.xlu1 %2899 }
 0x541   : > { %v15868_v51 = vsub.f32 %v2898_v4, %v2935_v20  ;;  %v2938_v45 = vand.u32 4294901760, %v2900_v23 }
 0x542   : > { %v2902_v1 = vpop.xlane.xlu0 %2901 }
 0x543   : > { %v3046_v27 = vand.u32 4294901760, %v15868_v51  ;;  %v15877_v16 = vpack.c.bf16 %v2938_v45, %v2935_v20  ;;  %v3052_v47 = vsub.f32 %v2900_v23, %v2938_v45  ;;  %v2941_v36 = vand.u32 4294901760, %v2902_v1 }
 0x544   : > { %v2910_v22 = vpop.xlane.xlu1 %2909 }
 0x545   : > { %v3053_v46 = vand.u32 4294901760, %v3052_v47  ;;  %v3059_v48 = vsub.f32 %v2902_v1, %v2941_v36  ;;  %14244 = vmatprep.subr.bf16.mxu1 %v15877_v16  ;;  %v3047_v2 = vsub.f32 %v15868_v51, %v3046_v27  ;;  %v14259_v21 = vpack.c.bf16 %v3052_v47, %v15868_v51 }
 0x546   : > { %14246 = vmatpush3.bf16.msra.mxu1 %v15877_v16  ;;  %v2904_v3 = vpop.xlane.xlu0 %2903  ;;  %v3549_v51 = vand.u32 4294901760, %v2910_v22 }
 0x547   : > { %v3054_v10 = vsub.f32 %v3052_v47, %v3053_v46  ;;  %v3060_v17 = vand.u32 4294901760, %v3059_v48  ;;  %v2944_v55 = vand.u32 4294901760, %v2904_v3  ;;  %v3048_v14 = vand.u32 4294901760, %v3047_v2 }
 0x548   : > { %v14275_v39 = vpack.c.bf16 %v3053_v46, %v3046_v27  ;;  %v2914_v45 = vpop.xlane.xlu1 %2913  ;;  %v3659_v47 = vsub.f32 %v2910_v22, %v3549_v51 }
 0x549   : > { %v15892_v42 = vpack.c.bf16 %v2944_v55, %v2941_v36  ;;  %v3066_v63 = vsub.f32 %v2904_v3, %v2944_v55  ;;  %v3055_v26 = vand.u32 4294901760, %v3054_v10  ;;  %v3061_v40 = vsub.f32 %v3059_v48, %v3060_v17 }
 0x54a   : > { %v2912_v9 = vpop.xlane.xlu0 %2911  ;;  %v3555_v36 = vand.u32 4294901760, %v2914_v45  ;;  %v3660_v2 = vand.u32 4294901760, %v3659_v47 }
 0x54b   : > { %v3067_v19 = vand.u32 4294901760, %v3066_v63  ;;  %14248 = vmatprep.subr.bf16.mxu1 %v15892_v42  ;;  %v14251_v31 = vpack.c.bf16 %v3055_v26, %v3048_v14  ;;  %v3062_v35 = vand.u32 4294901760, %v3061_v40  ;;  %v14263_v53 = vpack.c.bf16 %v3066_v63, %v3059_v48 }
 0x54c   : > { %14250 = vmatpush3.bf16.msra.mxu1 %v15892_v42  ;;  %v3552_v4 = vand.u32 4294901760, %v2912_v9  ;;  %v3673_v3 = vsub.f32 %v2914_v45, %v3555_v36  ;;  %v3661_v55 = vsub.f32 %v3659_v47, %v3660_v2 }
 0x54d   : > { %v3068_v5 = vsub.f32 %v3066_v63, %v3067_v19  ;;  %14252 = vmatprep.subr.bf16.mxu1 %v14251_v31  ;;  %v14279_v20 = vpack.c.bf16 %v3067_v19, %v3060_v17 }
 0x54e   : > { %v2916_v23 = vpop.xlane.xlu0 %2915  ;;  %v15923_v1 = vsub.f32 %v2912_v9, %v3552_v4  ;;  %v14291_v12 = vpack.c.bf16 %v3552_v4, %v3549_v51  ;;  %v3674_v43 = vand.u32 4294901760, %v3673_v3  ;;  %v3662_v40 = vand.u32 4294901760, %v3661_v55 }
 0x54f   : > { %13238 = vmatmul.mubr.f32.vlgmr.msra.gmra.mrb[12].mxu1 %v15895_v49  ;;  %v3069_v29 = vand.u32 4294901760, %v3068_v5  ;;  %v3558_v27 = vand.u32 4294901760, %v2916_v23 }
 0x550   : > { %14254 = vmatpush3.bf16.msra.mxu1 %v14251_v31  ;;  %13240 = vmatprep.mubr.f32.mxu1 %v15900_v7  ;;  %v3667_v46 = vand.u32 4294901760, %v15923_v1  ;;  %v3675_v26 = vsub.f32 %v3673_v3, %v3674_v43  ;;  %v14307_v5 = vpack.c.bf16 %v15923_v1, %v3659_v47 }
 0x551   : > { %v14255_v54 = vpack.c.bf16 %v3069_v29, %v3062_v35  ;;  %v3680_v48 = vsub.f32 %v2916_v23, %v3558_v27 }
 0x552   : > { %v3668_v10 = vsub.f32 %v15923_v1, %v3667_v46  ;;  %v3676_v8 = vand.u32 4294901760, %v3675_v26  ;;  %v14323_v29 = vpack.c.bf16 %v3667_v46, %v3660_v2 }
 0x553   : > { %13241 = vmatmul.mubr.f32.gmra.mrb[14].mxu1 %v15903_v38  ;;  %14256 = vmatprep.subr.bf16.mxu1 %v14255_v54  ;;  %v3681_v17 = vand.u32 4294901760, %v3680_v48  ;;  %v14311_v35 = vpack.c.bf16 %v3680_v48, %v3673_v3 }
 0x554   : > { %14258 = vmatpush3.bf16.msra.mxu1 %v14255_v54  ;;  %13251 = vmatprep.mubr.f32.mxu1 %v15831_v18  ;;  %v3669_v14 = vand.u32 4294901760, %v3668_v10 }
 0x555   : > { %14260 = vmatprep.subr.bf16.mxu1 %v14259_v21  ;;  %v3682_v63 = vsub.f32 %v3680_v48, %v3681_v17  ;;  %v14327_v54 = vpack.c.bf16 %v3681_v17, %v3674_v43 }
 0x556   : > { %v14299_v19 = vpack.c.bf16 %v3669_v14, %v3662_v40 }
 0x557   : > { %13252 = vmatmul.mubr.f32.vlgmr.msra.gmra.mrb[12].mxu1 %v15855_v6 }
 0x558   : > { %14262 = vmatpush3.bf16.msra.mxu1 %v14259_v21  ;;  %13254 = vmatprep.mubr.f32.mxu1 %v15858_v0 }
 0x559   : > { %14264 = vmatprep.subr.bf16.mxu1 %v14263_v53 }
 0x55b   : > { %13255 = vmatmul.mubr.f32.gmra.mrb[14].mxu1 %v15863_v33 }
 0x55c   : > { %14266 = vmatpush3.bf16.msra.mxu1 %v14263_v53  ;;  %13265 = vmatprep.mubr.f32.mxu1 %v15834_v59 }
 0x55d   : > { %14268 = vmatprep.subr.bf16.mxu1 %v15877_v16 }
 0x55f   : > { %13266 = vmatmul.mubr.f32.vlgmr.msra.gmra.mrb[12].mxu1 %v15861_v58 }
 0x560   : > { %14270 = vmatpush3.bf16.msra.mxu1 %v15877_v16  ;;  %13268 = vmatprep.mubr.f32.mxu1 %v15866_v41 }
 0x561   : > { %14272 = vmatprep.subr.bf16.mxu1 %v15892_v42 }
 0x563   : > { %13269 = vmatmul.mubr.f32.gmra.mrb[14].mxu1 %v15874_v61 }
 0x564   : > { %14274 = vmatpush3.bf16.msra.mxu1 %v15892_v42  ;;  %13279 = vmatprep.mubr.f32.mxu1 %v15837_v15 }
 0x565   : > { %14276 = vmatprep.subr.bf16.mxu1 %v14275_v39 }
 0x567   : > { %13280 = vmatmul.mubr.f32.vlgmr.msra.gmra.mrb[12].mxu1 %v15871_v57 }
 0x568   : > { %14278 = vmatpush3.bf16.msra.mxu1 %v14275_v39  ;;  %13282 = vmatprep.mubr.f32.mxu1 %v15880_v25 }
 0x569   : > { %14280 = vmatprep.subr.bf16.mxu1 %v14279_v20 }
 0x56b   : > { %13283 = vmatmul.mubr.f32.gmra.mrb[14].mxu1 %v15888_v11 }
 0x56c   : > { %14282 = vmatpush3.bf16.msra.mxu1 %v14279_v20  ;;  %13293 = vmatprep.mubr.f32.mxu1 %v15831_v18 }
 0x56d   : > { %14284 = vmatprep.subr.bf16.mxu1 %v15877_v16 }
 0x56f   : > { %13294 = vmatmul.mubr.f32.vlgmr.msra.gmra.mrb[12].mxu1 %v15855_v6 }
 0x570   : > { %14286 = vmatpush3.bf16.msra.mxu1 %v15877_v16  ;;  %13296 = vmatprep.mubr.f32.mxu1 %v15858_v0  ;;  %v14295_v16 = vpack.c.bf16 %v3558_v27, %v3555_v36 }
 0x571   : > { %14288 = vmatprep.subr.bf16.mxu1 %v15892_v42 }
 0x573   : > { %13297 = vmatmul.mubr.f32.gmra.mrb[14].mxu1 %v15863_v33 }
 0x574   : > { %14290 = vmatpush3.bf16.msra.mxu1 %v15892_v42  ;;  %13307 = vmatprep.mubr.f32.mxu1 %v15831_v18  ;;  %v3683_v42 = vand.u32 4294901760, %v3682_v63 }
 0x575   : > { %14292 = vmatprep.subr.bf16.mxu1 %v14291_v12 }
 0x576   : > { %v14303_v31 = vpack.c.bf16 %v3683_v42, %v3676_v8 }
 0x577   : > { %13308 = vmatmul.mubr.f32.vlgmr.msra.gmra.mrb[12].mxu1 %v15855_v6 }
 0x578   : > { %14294 = vmatpush3.bf16.msra.mxu1 %v14291_v12  ;;  %13310 = vmatprep.mubr.f32.mxu1 %v15858_v0 }
 0x579   : > { %14296 = vmatprep.subr.bf16.mxu1 %v14295_v16 }
 0x57b   : > { %13311 = vmatmul.mubr.f32.gmra.mrb[14].mxu1 %v15863_v33 }
 0x57c   : > { %14298 = vmatpush3.bf16.msra.mxu1 %v14295_v16  ;;  %13321 = vmatprep.mubr.f32.mxu1 %v15841_v34 }
 0x57d   : > { %14300 = vmatprep.subr.bf16.mxu1 %v14299_v19 }
 0x57f   : > { %13322 = vmatmul.mubr.f32.vlgmr.msra.gmra.mrb[16].mxu1 %v15895_v49 }
 0x580   : > { %14302 = vmatpush3.bf16.msra.mxu1 %v14299_v19  ;;  %13324 = vmatprep.mubr.f32.mxu1 %v15900_v7 }
 0x581   : > { %14304 = vmatprep.subr.bf16.mxu1 %v14303_v31 }
 0x583   : > { %13325 = vmatmul.mubr.f32.gmra.mrb[18].mxu1 %v15903_v38 }
 0x584   : > { %14306 = vmatpush3.bf16.msra.mxu1 %v14303_v31  ;;  %13335 = vmatprep.mubr.f32.mxu1 %v15831_v18 }
 0x585   : > { %14308 = vmatprep.subr.bf16.mxu1 %v14307_v5 }
 0x587   : > { %13336 = vmatmul.mubr.f32.vlgmr.msra.gmra.mrb[16].mxu1 %v15855_v6 }
 0x588   : > { %14310 = vmatpush3.bf16.msra.mxu1 %v14307_v5  ;;  %13338 = vmatprep.mubr.f32.mxu1 %v15858_v0  ;;  %v4192_v5 = vld [vmem:[%s16915_s3 + $0xa8] sm:$0xff] }
 0x589   : > { %14312 = vmatprep.subr.bf16.mxu1 %v14311_v35 }
 0x58b   : > { %13339 = vmatmul.mubr.f32.gmra.mrb[18].mxu1 %v15863_v33 }
 0x58c   : > { %14314 = vmatpush3.bf16.msra.mxu1 %v14311_v35  ;;  %13349 = vmatprep.mubr.f32.mxu1 %v15834_v59  ;;  %v4191_v35 = vld [vmem:[%s16915_s3 + $0xa0] sm:$0xff] }
 0x58d   : > { %14316 = vmatprep.subr.bf16.mxu1 %v14291_v12 }
 0x58f   : > { %13350 = vmatmul.mubr.f32.vlgmr.msra.gmra.mrb[16].mxu1 %v15861_v58 }
 0x590   : > { %14318 = vmatpush3.bf16.msra.mxu1 %v14291_v12  ;;  %13352 = vmatprep.mubr.f32.mxu1 %v15866_v41 }
 0x591   : > { %14320 = vmatprep.subr.bf16.mxu1 %v14295_v16 }
 0x593   : > { %13353 = vmatmul.mubr.f32.gmra.mrb[18].mxu1 %v15874_v61 }
 0x594   : > { %14322 = vmatpush3.bf16.msra.mxu1 %v14295_v16  ;;  %13363 = vmatprep.mubr.f32.mxu1 %v15837_v15 }
 0x595   : > { %14324 = vmatprep.subr.bf16.mxu1 %v14323_v29 }
 0x597   : > { %13364 = vmatmul.mubr.f32.vlgmr.msra.gmra.mrb[16].mxu1 %v15871_v57 }
 0x598   : > { %14326 = vmatpush3.bf16.msra.mxu1 %v14323_v29  ;;  %13366 = vmatprep.mubr.f32.mxu1 %v15880_v25 }
 0x599   : > { %14328 = vmatprep.subr.bf16.mxu1 %v14327_v54 }
 0x59b   : > { %13367 = vmatmul.mubr.f32.gmra.mrb[18].mxu1 %v15888_v11 }
 0x59c   : > { %14330 = vmatpush3.bf16.msra.mxu1 %v14327_v54  ;;  %13377 = vmatprep.mubr.f32.mxu1 %v15831_v18 }
 0x59d   : > { %14332 = vmatprep.subr.bf16.mxu1 %v14291_v12 }
 0x59f   : > { %13378 = vmatmul.mubr.f32.vlgmr.msra.gmra.mrb[16].mxu1 %v15855_v6 }
 0x5a0   : > { %14334 = vmatpush3.bf16.msra.mxu1 %v14291_v12  ;;  %13380 = vmatprep.mubr.f32.mxu1 %v15858_v0 }
 0x5a1   : > { %14336 = vmatprep.subr.bf16.mxu1 %v14295_v16 }
 0x5a3   : > { %13381 = vmatmul.mubr.f32.gmra.mrb[18].mxu1 %v15863_v33 }
 0x5a4   : > { %14338 = vmatpush3.bf16.msra.mxu1 %v14295_v16  ;;  %13391 = vmatprep.mubr.f32.mxu1 %v15831_v18 }
 0x5a7   : > { %13392 = vmatmul.mubr.f32.vlgmr.msra.gmra.mrb[16].mxu1 %v15855_v6 }
 0x5a8   : > { %13394 = vmatprep.mubr.f32.mxu1 %v15858_v0 }
 0x5ab   : > { %13395 = vmatmul.mubr.f32.gmra.mrb[18].mxu1 %v15863_v33 }
 0x5ac   : > { %13509 = vmatprep.mubr.f32.mxu1 %v15841_v34 }
 0x64a   : > { %v13309_v21 = vpop.f32.mrb[12].mxu1 }
 0x64b   : > { %v3526_v53 = vpop.f32.mrb[13].mxu1  ;;  %v4164_v22 = vmul.f32 0.001953125, %v13309_v21 }
 0x64c   : > { %v4163_v4 = vmul.f32 0.001953125, %v3526_v53 }
 0x64d   : > { %v4172_v23 = vmul.f32 %v4164_v22, %v4164_v22 }
 0x64e   : > { %v13312_v9 = vpop.f32.mrb[14].mxu1  ;;  %v4171_v27 = vmul.f32 %v4163_v4, %v4163_v4 }
 0x64f   : > { %v3538_v39 = vpop.f32.mrb[15].mxu1  ;;  %v4166_v51 = vmul.f32 0.001953125, %v13312_v9  ;;  %v4200_v9 = vld [vmem:[%s16915_s3 + $0xc8] sm:$0xff] }
 0x650   : > { %v4165_v47 = vmul.f32 0.001953125, %v3538_v39  ;;  %v4194_v39 = vld [vmem:[%s16915_s3 + $0xb8] sm:$0xff] }
 0x651   : > { %v4174_v3 = vmul.f32 %v4166_v51, %v4166_v51 }
 0x652   : > { %v4173_v55 = vmul.f32 %v4165_v47, %v4165_v47 }
 0x67a   : > { %v13393_v20 = vpop.f32.mrb[16].mxu1 }
 0x67b   : > { %v4168_v45 = vmul.f32 0.001953125, %v13393_v20  ;;  %v4140_v1 = vpop.f32.mrb[17].mxu1 }
 0x67c   : > { %v4167_v36 = vmul.f32 0.001953125, %v4140_v1 }
 0x67d   : > { %v4176_v46 = vsub.f32 %v4168_v45, %v4172_v23  ;;  %v4193_v23 = vld [vmem:[%s16915_s3 + $0xb0] sm:$0xff] }
 0x67e   : > { %v4175_v48 = vsub.f32 %v4167_v36, %v4171_v27  ;;  %v13396_v2 = vpop.f32.mrb[18].mxu1 }
 0x67f   : > { %v4180_v12 = vmax.f32 %v4176_v46, 0.0  ;;  %v4170_v10 = vmul.f32 0.001953125, %v13396_v2  ;;  %v4152_v17 = vpop.f32.mrb[19].mxu1  ;;  %v4201_v2 = vld [vmem:[%s16915_s3 + $0xd0] sm:$0xff] }
 0x680   : > { %v4179_v43 = vmax.f32 %v4175_v48, 0.0  ;;  %v4169_v16 = vmul.f32 0.001953125, %v4152_v17 }
 0x681   : > { %v4184_v63 = vadd.f32 1e-05, %v4180_v12  ;;  %v4178_v14 = vsub.f32 %v4170_v10, %v4174_v3  ;;  %v4199_v10 = vld [vmem:[%s16915_s3 + $0xc0] sm:$0xff] }
 0x682   : > { %v4183_v26 = vadd.f32 1e-05, %v4179_v43  ;;  %v4177_v40 = vsub.f32 %v4169_v16, %v4173_v55  ;;  %v4202_v55 = vld [vmem:[%s16915_s3 + $0xd8] sm:$0xff]  ;;  %v4270_v43 = vld [vmem:[%s16915_s3 + $0xe8] sm:$0xff] }
 0x683   : > { %14911 = vrsqrt.f32 %v4184_v63  ;;  %v4182_v19 = vmax.f32 %v4178_v14, 0.0  ;;  %v4272_v16 = vld [vmem:[%s16915_s3 + $0xf8] sm:$0xff]  ;;  %v14888_v63 = vld [vmem:[%s16788_s9] sm:$0xff]  }
 0x684   : > { %14913 = vrsqrt.f32 %v4183_v26  ;;  %v4181_v42 = vmax.f32 %v4177_v40, 0.0  ;;  %13401 = vmatprep.mubr.msk.bf16.mxu0 %vm2921_vm2, %v14888_v63 }
 0x685   : > { %v4186_v8 = vadd.f32 1e-05, %v4182_v19 }
 0x686   : > { %v4185_v31 = vadd.f32 1e-05, %v4181_v42 }
 0x687   : > { %14915 = vrsqrt.f32 %v4186_v8 }
 0x688   : > { %14917 = vrsqrt.f32 %v4185_v31 }
 0x68d   : > { %v14912_v29 = vpop.eup %14911 }
 0x68e   : > { %v14914_v54 = vpop.eup %14913  ;;  %v4196_v21 = vmul.f32 %v14912_v29, %v4192_v5 }
 0x68f   : > { %v4195_v53 = vmul.f32 %v14914_v54, %v4191_v35 }
 0x690   : > { %4218 = vperm.xlu0 %14880, %v4196_v21   ;;  %v4204_v20 = vmul.f32 %v4196_v21, %v4164_v22 }
 0x691   : > { %v14916_v45 = vpop.eup %14915  ;;  %4213 = vperm.xlu1 %14881, %v4195_v53   ;;  %v4203_v1 = vmul.f32 %v4195_v53, %v4163_v4  ;;  %v4269_v4 = vld [vmem:[%s16915_s3 + $0xe0] sm:$0xff] }
 0x692   : > { %v14918_v27 = vpop.eup %14917  ;;  %v4208_v36 = vsub.f32 %v4200_v9, %v4204_v20  ;;  %v4198_v46 = vmul.f32 %v14916_v45, %v4194_v39 }
 0x693   : > { %v4197_v48 = vmul.f32 %v14918_v27, %v4193_v23  ;;  %v4207_v17 = vsub.f32 %v4199_v10, %v4203_v1 }
 0x694   : > { %v4206_v3 = vmul.f32 %v4198_v46, %v4166_v51  ;;  %v4271_v51 = vld [vmem:[%s16915_s3 + $0xf0] sm:$0xff] }
 0x695   : > { %4242 = vperm.xlu1 %14881, %v4208_v36   ;;  %4223 = vperm.xlu0 %14880, %v4197_v48   ;;  %v4205_v12 = vmul.f32 %v4197_v48, %v4165_v47  ;;  %v14891_v48 = vld [vmem:[%s16789_s10 + $0x8] sm:$0xff]  }
 0x696   : > { %v4210_v47 = vsub.f32 %v4202_v55, %v4206_v3 }
 0x697   : > { %v4209_v22 = vsub.f32 %v4201_v2, %v4205_v12 }
 0x699   : > { %4228 = vperm.xlu1 %14881, %v4198_v46   ;;  %4247 = vperm.xlu0 %14880, %v4209_v22   ;;  %v4359_v46 = vpack.c.bf16 %v16919_v24, %v16918_v52 }
 0x69d   : > { %4237 = vperm.xlu1 %14881, %v4207_v17   ;;  %4275 = vperm.xlu0 %14880, %v4269_v4  }
 0x6a1   : > { %4252 = vperm.xlu1 %14881, %v4210_v47   ;;  %4285 = vperm.xlu0 %14880, %v4271_v51  }
 0x6a5   : > { %4280 = vperm.xlu1 %14881, %v4270_v43  }
 0x6a9   : > { %4290 = vperm.xlu1 %14881, %v4272_v16  }
 0x70f   : > { %v4219_v14 = vpop.permute.xlu0 %4218 }
 0x710   : > { %v4214_v26 = vpop.permute.xlu1 %4213  ;;  %v4232_v8 = vmul.f32 %v4219_v14, %v15809_v32 }
 0x711   : > { %v4231_v31 = vmul.f32 %v4214_v26, %v15807_v62  ;;  %v4358_v62 = vpack.c.bf16 %v16916_v50, %v16917_v44  ;;  %v4360_v50 = vpack.c.bf16 %v16921_v60, %v16920_v28  ;;  %v4361_v44 = vpack.c.bf16 %v16923_v30, %v16922_v37 }
 0x714   : > { %v4243_v40 = vpop.permute.xlu1 %4242  ;;  %v4224_v19 = vpop.permute.xlu0 %4223 }
 0x715   : > { %v4256_v5 = vadd.f32 %v4243_v40, %v4232_v8  ;;  %v4233_v54 = vmul.f32 %v4224_v19, %v15812_v56  ;;  %v14889_v56 = vld [vmem:[%s16788_s9 + $0x8] sm:$0xff]  }
 0x717   : > { %v4260_v53 = vmax.f32 %v4256_v5, 0.0 }
 0x718   : > { %v4229_v42 = vpop.permute.xlu1 %4228  ;;  %v4248_v35 = vpop.permute.xlu0 %4247 }
 0x719   : > { %v4234_v9 = vmul.f32 %v4229_v42, %v15818_v13  ;;  %v4257_v39 = vadd.f32 %v4248_v35, %v4233_v54  ;;  %v14890_v13 = vld [vmem:[%s16789_s10] sm:$0xff]  }
 0x71b   : > { %v4261_v27 = vmax.f32 %v4257_v39, 0.0 }
 0x71c   : > { %v4238_v29 = vpop.permute.xlu1 %4237  ;;  %v4276_v2 = vpop.permute.xlu0 %4275 }
 0x71d   : > { %v4255_v21 = vadd.f32 %v4238_v29, %v4231_v31 }
 0x71f   : > { %v4259_v20 = vmax.f32 %v4255_v21, 0.0 }
 0x720   : > { %v4253_v23 = vpop.permute.xlu1 %4252  ;;  %v4286_v10 = vpop.permute.xlu0 %4285 }
 0x721   : > { %v4263_v45 = vpack.c.bf16 %v4260_v53, %v4259_v20  ;;  %v4258_v1 = vadd.f32 %v4253_v23, %v4234_v9 }
 0x723   : > { %v4262_v36 = vmax.f32 %v4258_v1, 0.0  ;;  %13397 = vmatprep.subr.bf16.mxu0 %v4263_v45 }
 0x724   : > { %13398 = vmatpush3.bf16.msra.mxu0 %v4263_v45  ;;  %v4281_v52 = vpop.permute.xlu1 %4280 }
 0x725   : > { %v4264_v32 = vpack.c.bf16 %v4262_v36, %v4261_v27 }
 0x727   : > { %13399 = vmatprep.subr.bf16.mxu0 %v4264_v32 }
 0x728   : > { %13400 = vmatpush3.bf16.msra.mxu0 %v4264_v32  ;;  %v4291_v30 = vpop.permute.xlu1 %4290 }
 0x729   : > { %13405 = vmatprep.subr.bf16.mxu0 %v4358_v62 }
 0x72b   : > { %13402 = vmatmul.mubr.msk.bf16.vlgmr.msra.gmra.mrb[16].mxu0 %vm2921_vm2, %v14889_v56 }
 0x72c   : > { %13406 = vmatpush3.bf16.msra.mxu0 %v4358_v62  ;;  %13413 = vmatprep.mubr.msk.bf16.mxu0 %vm898_vm1, %v14890_v13 }
 0x72d   : > { %13407 = vmatprep.subr.bf16.mxu0 %v4359_v46 }
 0x730   : > { %13408 = vmatpush3.bf16.msra.mxu0 %v4359_v46 }
 0x731   : > { %13409 = vmatprep.subr.bf16.mxu0 %v4360_v50 }
 0x734   : > { %13410 = vmatpush3.bf16.msra.mxu0 %v4360_v50 }
 0x735   : > { %13411 = vmatprep.subr.bf16.mxu0 %v4361_v44 }
 0x738   : > { %13412 = vmatpush3.bf16.msra.mxu0 %v4361_v44 }
 0x73b   : > { %13414 = vmatmul.mubr.msk.bf16.vlgmr.msra.gmra.mrb[16].mxu0 %vm898_vm1, %v14891_v48 }
 0x73c   : > { %13425 = vmatprep.mubr.f32.mxu0 %v15841_v34 }
 0x80e   : > { %v13415_v24 = vpop.f32.mrb[16].mxu0 }
 0x80f   : > { %v4416_v28 = vpop.f32.mrb[17].mxu0  ;;  %v16039_v4 = vadd.f32 %v13415_v24, %v4286_v10 }
 0x810   : > { %v16031_v60 = vadd.f32 %v4416_v28, %v4276_v2  ;;  %v13416_v3 = vpop.f32.mrb[18].mxu0 }
 0x811   : > { %v4419_v12 = vpop.f32.mrb[19].mxu0  ;;  %v16036_v22 = vadd.f32 %v13416_v3, %v4291_v30  ;;  %v4441_v17 = vmul.f32 %v16039_v4, %v16039_v4 }
 0x812   : > { %v16033_v37 = vadd.f32 %v4419_v12, %v4281_v52  ;;  %4431 = vadd.xlane.f32.xlu0 %v16031_v60  ;;  %v4439_v34 = vmul.f32 %v16031_v60, %v16031_v60 }
 0x813   : > { %v4442_v51 = vmul.f32 %v16036_v22, %v16036_v22 }
 0x814   : > { %4433 = vadd.xlane.f32.xlu1 %v16033_v37  ;;  %v4440_v55 = vmul.f32 %v16033_v37, %v16033_v37 }
 0x816   : > { %4437 = vadd.xlane.f32.xlu0 %v16036_v22 }
 0x818   : > { %4435 = vadd.xlane.f32.xlu1 %v16039_v4 }
 0x81a   : > { %4443 = vadd.xlane.f32.xlu0 %v4439_v34 }
 0x81c   : > { %4447 = vadd.xlane.f32.xlu1 %v4441_v17 }
 0x81e   : > { %4445 = vadd.xlane.f32.xlu0 %v4440_v55 }
 0x822   : > { %4449 = vadd.xlane.f32.xlu0 %v4442_v51 }
 0x89f   : > { %v4432_v47 = vpop.xlane.xlu0 %4431 }
 0x8a0   : > { %v4452_v43 = vand.u32 4294901760, %v4432_v47 }
 0x8a1   : > { %v4434_v16 = vpop.xlane.xlu1 %4433 }
 0x8a2   : > { %v16051_v63 = vsub.f32 %v4432_v47, %v4452_v43  ;;  %v4455_v14 = vand.u32 4294901760, %v4434_v16 }
 0x8a3   : > { %v4438_v26 = vpop.xlane.xlu0 %4437 }
 0x8a4   : > { %v4563_v40 = vand.u32 4294901760, %v16051_v63  ;;  %v16054_v19 = vpack.c.bf16 %v4455_v14, %v4452_v43  ;;  %v16056_v42 = vsub.f32 %v4434_v16, %v4455_v14  ;;  %v4461_v8 = vand.u32 4294901760, %v4438_v26 }
 0x8a5   : > { %v4436_v31 = vpop.xlane.xlu1 %4435 }
 0x8a6   : > { %v4564_v5 = vsub.f32 %v16051_v63, %v4563_v40  ;;  %v4570_v35 = vand.u32 4294901760, %v16056_v42  ;;  %v16062_v29 = vsub.f32 %v4438_v26, %v4461_v8  ;;  %v4458_v54 = vand.u32 4294901760, %v4436_v31  ;;  %14340 = vmatprep.subr.bf16.mxu0 %v16054_v19 }
 0x8a7   : > { %14342 = vmatpush3.bf16.msra.mxu0 %v16054_v19  ;;  %v4444_v21 = vpop.xlane.xlu0 %4443  ;;  %v14355_v51 = vpack.c.bf16 %v16056_v42, %v16051_v63 }
 0x8a8   : > { %v4571_v53 = vsub.f32 %v16056_v42, %v4570_v35  ;;  %v4584_v9 = vand.u32 4294901760, %v16062_v29  ;;  %v16070_v39 = vpack.c.bf16 %v4461_v8, %v4458_v54  ;;  %v16072_v20 = vsub.f32 %v4436_v31, %v4458_v54 }
 0x8a9   : > { %v5066_v23 = vand.u32 4294901760, %v4444_v21  ;;  %v4448_v45 = vpop.xlane.xlu1 %4447  ;;  %v4565_v1 = vand.u32 4294901760, %v4564_v5 }
 0x8aa   : > { %v4585_v27 = vsub.f32 %v16062_v29, %v4584_v9  ;;  %v4577_v36 = vand.u32 4294901760, %v16072_v20  ;;  %v5072_v32 = vand.u32 4294901760, %v4448_v45  ;;  %14344 = vmatprep.subr.bf16.mxu0 %v16070_v39  ;;  %v4572_v62 = vand.u32 4294901760, %v4571_v53 }
 0x8ab   : > { %v16079_v56 = vsub.f32 %v4444_v21, %v5066_v23  ;;  %14346 = vmatpush3.bf16.msra.mxu0 %v16070_v39  ;;  %v4446_v13 = vpop.xlane.xlu0 %4445  ;;  %v14359_v54 = vpack.c.bf16 %v16062_v29, %v16072_v20 }
 0x8ac   : > { %v4578_v46 = vsub.f32 %v16072_v20, %v4577_v36  ;;  %v16085_v50 = vsub.f32 %v4448_v45, %v5072_v32  ;;  %v5069_v44 = vand.u32 4294901760, %v4446_v13  ;;  %v14347_v48 = vpack.c.bf16 %v4572_v62, %v4565_v1 }
 0x8ad   : > { %v5177_v52 = vand.u32 4294901760, %v16079_v56  ;;  %v4586_v3 = vand.u32 4294901760, %v4585_v27  ;;  %v14375_v63 = vpack.c.bf16 %v4584_v9, %v4577_v36 }
 0x8ae   : > { %v16088_v24 = vpack.c.bf16 %v5069_v44, %v5066_v23  ;;  %v16090_v2 = vsub.f32 %v4446_v13, %v5069_v44  ;;  %13426 = vmatmul.mubr.f32.vlgmr.msra.gmra.mrb[20].mxu0 %v15895_v49  ;;  %14348 = vmatprep.subr.bf16.mxu0 %v14347_v48  ;;  %v4579_v28 = vand.u32 4294901760, %v4578_v46  ;;  %v5191_v12 = vand.u32 4294901760, %v16085_v50 }
 0x8af   : > { %14350 = vmatpush3.bf16.msra.mxu0 %v14347_v48  ;;  %v4450_v30 = vpop.xlane.xlu0 %4449  ;;  %13428 = vmatprep.mubr.f32.mxu0 %v15900_v7  ;;  %v5178_v10 = vsub.f32 %v16079_v56, %v5177_v52 }
 0x8b0   : > { %v5184_v34 = vand.u32 4294901760, %v16090_v2  ;;  %v5075_v17 = vand.u32 4294901760, %v4450_v30  ;;  %14388 = vmatprep.subr.bf16.mxu1 %v16088_v24  ;;  %v14351_v55 = vpack.c.bf16 %v4586_v3, %v4579_v28  ;;  %v5192_v14 = vsub.f32 %v16085_v50, %v5191_v12  ;;  %v5708_v28 = vld [vmem:[%s16915_s3 + $0x108] sm:$0xff]  ;;  %v5707_v3 = vld [vmem:[%s16915_s3 + $0x100] sm:$0xff] }
 0x8b1   : > { %14390 = vmatpush3.bf16.msra.mxu1 %v16088_v24  ;;  %v5179_v8 = vand.u32 4294901760, %v5178_v10 }
 0x8b2   : > { %v5185_v47 = vsub.f32 %v16090_v2, %v5184_v34  ;;  %v16106_v43 = vpack.c.bf16 %v5075_v17, %v5072_v32  ;;  %v16108_v16 = vsub.f32 %v4450_v30, %v5075_v17  ;;  %13429 = vmatmul.mubr.f32.gmra.mrb[22].mxu0 %v15903_v38  ;;  %14352 = vmatprep.subr.bf16.mxu0 %v14351_v55  ;;  %v5193_v53 = vand.u32 4294901760, %v5192_v14  ;;  %v5716_v17 = vld [vmem:[%s16915_s3 + $0x128] sm:$0xff] }
 0x8b3   : > { %14354 = vmatpush3.bf16.msra.mxu0 %v14351_v55  ;;  %13439 = vmatprep.mubr.f32.mxu0 %v15831_v18  ;;  %v5710_v55 = vld [vmem:[%s16915_s3 + $0x118] sm:$0xff] }
 0x8b4   : > { %v5198_v26 = vand.u32 4294901760, %v16108_v16  ;;  %14356 = vmatprep.subr.bf16.mxu0 %v14355_v51  ;;  %14392 = vmatprep.subr.bf16.mxu1 %v16106_v43  ;;  %v5186_v31 = vand.u32 4294901760, %v5185_v47  ;;  %v5709_v47 = vld [vmem:[%s16915_s3 + $0x110] sm:$0xff] }
 0x8b5   : > { %14394 = vmatpush3.bf16.msra.mxu1 %v16106_v43 }
 0x8b6   : > { %v5199_v5 = vsub.f32 %v16108_v16, %v5198_v26  ;;  %13440 = vmatmul.mubr.f32.vlgmr.msra.gmra.mrb[20].mxu0 %v15855_v6  ;;  %v14395_v21 = vpack.c.bf16 %v5186_v31, %v5179_v8 }
 0x8b7   : > { %14358 = vmatpush3.bf16.msra.mxu0 %v14355_v51  ;;  %13442 = vmatprep.mubr.f32.mxu0 %v15858_v0 }
 0x8b8   : > { %14360 = vmatprep.subr.bf16.mxu0 %v14359_v54  ;;  %13510 = vmatmul.mubr.f32.vlgmr.msra.gmra.mrb[20].mxu1 %v15895_v49  ;;  %v5200_v23 = vand.u32 4294901760, %v5199_v5  ;;  %v14403_v49 = vpack.c.bf16 %v16090_v2, %v16079_v56  ;;  %v5717_v5 = vld [vmem:[%s16915_s3 + $0x130] sm:$0xff] }
 0x8b9   : > { %14396 = vmatprep.subr.bf16.mxu1 %v14395_v21  ;;  %13512 = vmatprep.mubr.f32.mxu1 %v15900_v7  ;;  %v14407_v7 = vpack.c.bf16 %v16108_v16, %v16085_v50 }
 0x8ba   : > { %14398 = vmatpush3.bf16.msra.mxu1 %v14395_v21  ;;  %13443 = vmatmul.mubr.f32.gmra.mrb[22].mxu0 %v15863_v33  ;;  %v14399_v45 = vpack.c.bf16 %v5200_v23, %v5193_v53  ;;  %v5715_v23 = vld [vmem:[%s16915_s3 + $0x120] sm:$0xff] }
 0x8bb   : > { %14362 = vmatpush3.bf16.msra.mxu0 %v14359_v54  ;;  %13453 = vmatprep.mubr.f32.mxu0 %v15834_v59 }
 0x8bc   : > { %14364 = vmatprep.subr.bf16.mxu0 %v16054_v19  ;;  %13513 = vmatmul.mubr.f32.gmra.mrb[22].mxu1 %v15903_v38  ;;  %v14371_v38 = vpack.c.bf16 %v4570_v35, %v4563_v40 }
 0x8bd   : > { %14400 = vmatprep.subr.bf16.mxu1 %v14399_v45  ;;  %13523 = vmatprep.mubr.f32.mxu1 %v15831_v18 }
 0x8be   : > { %14402 = vmatpush3.bf16.msra.mxu1 %v14399_v45  ;;  %13454 = vmatmul.mubr.f32.vlgmr.msra.gmra.mrb[20].mxu0 %v15861_v58  ;;  %v5783_v45 = vld [vmem:[%s16915_s3 + $0x140] sm:$0xff] }
 0x8bf   : > { %14404 = vmatprep.subr.bf16.mxu1 %v14403_v49  ;;  %14366 = vmatpush3.bf16.msra.mxu0 %v16054_v19 }
 0x8c0   : > { %14368 = vmatprep.subr.bf16.mxu0 %v16070_v39  ;;  %13456 = vmatprep.mubr.f32.mxu0 %v15866_v41 }
 0x8c1   : > { %13524 = vmatmul.mubr.f32.vlgmr.msra.gmra.mrb[20].mxu1 %v15855_v6 }
 0x8c2   : > { %14406 = vmatpush3.bf16.msra.mxu1 %v14403_v49  ;;  %13457 = vmatmul.mubr.f32.gmra.mrb[22].mxu0 %v15874_v61 }
 0x8c3   : > { %14408 = vmatprep.subr.bf16.mxu1 %v14407_v7  ;;  %14370 = vmatpush3.bf16.msra.mxu0 %v16070_v39 }
 0x8c4   : > { %13526 = vmatprep.mubr.f32.mxu1 %v15858_v0  ;;  %14372 = vmatprep.subr.bf16.mxu0 %v14371_v38 }
 0x8c5   : > { %13527 = vmatmul.mubr.f32.gmra.mrb[22].mxu1 %v15863_v33  ;;  %13467 = vmatprep.mubr.f32.mxu0 %v15837_v15 }
 0x8c6   : > { %14410 = vmatpush3.bf16.msra.mxu1 %v14407_v7  ;;  %13468 = vmatmul.mubr.f32.vlgmr.msra.gmra.mrb[20].mxu0 %v15871_v57  ;;  %v5718_v7 = vld [vmem:[%s16915_s3 + $0x138] sm:$0xff] }
 0x8c7   : > { %14412 = vmatprep.subr.bf16.mxu1 %v16088_v24  ;;  %14374 = vmatpush3.bf16.msra.mxu0 %v14371_v38 }
 0x8c8   : > { %13537 = vmatprep.mubr.f32.mxu1 %v15834_v59  ;;  %14376 = vmatprep.subr.bf16.mxu0 %v14375_v63  ;;  %v14419_v59 = vpack.c.bf16 %v5184_v34, %v5177_v52 }
 0x8c9   : > { %13538 = vmatmul.mubr.f32.vlgmr.msra.gmra.mrb[20].mxu1 %v15861_v58  ;;  %13470 = vmatprep.mubr.f32.mxu0 %v15880_v25  ;;  %v14423_v58 = vpack.c.bf16 %v5198_v26, %v5191_v12 }
 0x8ca   : > { %14414 = vmatpush3.bf16.msra.mxu1 %v16088_v24  ;;  %13471 = vmatmul.mubr.f32.gmra.mrb[22].mxu0 %v15888_v11 }
 0x8cb   : > { %14416 = vmatprep.subr.bf16.mxu1 %v16106_v43  ;;  %14378 = vmatpush3.bf16.msra.mxu0 %v14375_v63  ;;  %v5784_v63 = vld [vmem:[%s16915_s3 + $0x148] sm:$0xff] }
 0x8cc   : > { %13540 = vmatprep.mubr.f32.mxu1 %v15866_v41  ;;  %14380 = vmatprep.subr.bf16.mxu0 %v16054_v19 }
 0x8cd   : > { %13541 = vmatmul.mubr.f32.gmra.mrb[22].mxu1 %v15874_v61  ;;  %13481 = vmatprep.mubr.f32.mxu0 %v15831_v18 }
 0x8ce   : > { %14418 = vmatpush3.bf16.msra.mxu1 %v16106_v43  ;;  %13482 = vmatmul.mubr.f32.vlgmr.msra.gmra.mrb[20].mxu0 %v15855_v6 }
 0x8cf   : > { %14420 = vmatprep.subr.bf16.mxu1 %v14419_v59  ;;  %14382 = vmatpush3.bf16.msra.mxu0 %v16054_v19 }
 0x8d0   : > { %13551 = vmatprep.mubr.f32.mxu1 %v15837_v15  ;;  %14384 = vmatprep.subr.bf16.mxu0 %v16070_v39 }
 0x8d1   : > { %13552 = vmatmul.mubr.f32.vlgmr.msra.gmra.mrb[20].mxu1 %v15871_v57  ;;  %13484 = vmatprep.mubr.f32.mxu0 %v15858_v0 }
 0x8d2   : > { %14422 = vmatpush3.bf16.msra.mxu1 %v14419_v59  ;;  %13485 = vmatmul.mubr.f32.gmra.mrb[22].mxu0 %v15863_v33  ;;  %v15008_v59 = vmov 0.0  }
 0x8d3   : > { %14424 = vmatprep.subr.bf16.mxu1 %v14423_v58  ;;  %14386 = vmatpush3.bf16.msra.mxu0 %v16070_v39 }
 0x8d4   : > { %13554 = vmatprep.mubr.f32.mxu1 %v15880_v25  ;;  %13495 = vmatprep.mubr.f32.mxu0 %v15831_v18 }
 0x8d5   : > { %13555 = vmatmul.mubr.f32.gmra.mrb[22].mxu1 %v15888_v11  ;;  %13585 = vmatprep.subr.bf16.mxu0 %v15008_v59 }
 0x8d6   : > { %14426 = vmatpush3.bf16.msra.mxu1 %v14423_v58  ;;  %13496 = vmatmul.mubr.f32.vlgmr.msra.gmra.mrb[20].mxu0 %v15855_v6 }
 0x8d7   : > { %14428 = vmatprep.subr.bf16.mxu1 %v16088_v24  ;;  %13565 = vmatprep.mubr.f32.mxu1 %v15831_v18 }
 0x8d8   : > { %13498 = vmatprep.mubr.f32.mxu0 %v15858_v0 }
 0x8d9   : > { %13566 = vmatmul.mubr.f32.vlgmr.msra.gmra.mrb[20].mxu1 %v15855_v6 }
 0x8da   : > { %14430 = vmatpush3.bf16.msra.mxu1 %v16088_v24  ;;  %13499 = vmatmul.mubr.f32.gmra.mrb[22].mxu0 %v15863_v33 }
 0x8db   : > { %14432 = vmatprep.subr.bf16.mxu1 %v16106_v43  ;;  %13568 = vmatprep.mubr.f32.mxu1 %v15858_v0 }
 0x8dc   : > { %13589 = vmatprep.mubr.msk.bf16.mxu0 %vm15009_vm3, %v15008_v59 }
 0x8dd   : > { %13569 = vmatmul.mubr.f32.gmra.mrb[22].mxu1 %v15863_v33 }
 0x8de   : > { %14434 = vmatpush3.bf16.msra.mxu1 %v16106_v43  ;;  %13579 = vmatprep.mubr.f32.mxu1 %v15831_v18 }
 0x8e1   : > { %13580 = vmatmul.mubr.f32.vlgmr.msra.gmra.mrb[20].mxu1 %v15855_v6 }
 0x8e2   : > { %13582 = vmatprep.mubr.f32.mxu1 %v15858_v0 }
 0x8e5   : > { %13583 = vmatmul.mubr.f32.gmra.mrb[22].mxu1 %v15863_v33 }
 0x9a9   : > { %v13497_v15 = vpop.f32.mrb[20].mxu0 }
 0x9aa   : > { %v5043_v41 = vpop.f32.mrb[21].mxu0  ;;  %v5680_v25 = vmul.f32 0.001953125, %v13497_v15 }
 0x9ab   : > { %v5679_v11 = vmul.f32 0.001953125, %v5043_v41 }
 0x9ac   : > { %v5688_v19 = vmul.f32 %v5680_v25, %v5680_v25 }
 0x9ad   : > { %v13500_v57 = vpop.f32.mrb[22].mxu0  ;;  %v5687_v9 = vmul.f32 %v5679_v11, %v5679_v11 }
 0x9ae   : > { %v5055_v61 = vpop.f32.mrb[23].mxu0  ;;  %v5682_v42 = vmul.f32 0.001953125, %v13500_v57 }
 0x9af   : > { %v5681_v39 = vmul.f32 0.001953125, %v5055_v61 }
 0x9b0   : > { %v5690_v0 = vmul.f32 %v5682_v42, %v5682_v42 }
 0x9b1   : > { %v5689_v32 = vmul.f32 %v5681_v39, %v5681_v39 }
 0x9b4   : > { %v13581_v40 = vpop.f32.mrb[20].mxu1 }
 0x9b5   : > { %v5684_v35 = vmul.f32 0.001953125, %v13581_v40  ;;  %v5657_v29 = vpop.f32.mrb[21].mxu1 }
 0x9b6   : > { %v5683_v18 = vmul.f32 0.001953125, %v5657_v29 }
 0x9b7   : > { %v5692_v20 = vsub.f32 %v5684_v35, %v5688_v19 }
 0x9b8   : > { %v5691_v6 = vsub.f32 %v5683_v18, %v5687_v9  ;;  %v13584_v1 = vpop.f32.mrb[22].mxu1 }
 0x9b9   : > { %v5696_v27 = vmax.f32 %v5692_v20, 0.0  ;;  %v5686_v33 = vmul.f32 0.001953125, %v13584_v1  ;;  %v5669_v36 = vpop.f32.mrb[23].mxu1 }
 0x9ba   : > { %v5695_v62 = vmax.f32 %v5691_v6, 0.0  ;;  %v5685_v56 = vmul.f32 0.001953125, %v5669_v36 }
 0x9bb   : > { %v5700_v13 = vadd.f32 1e-05, %v5696_v27  ;;  %v5694_v46 = vsub.f32 %v5686_v33, %v5690_v0 }
 0x9bc   : > { %v5699_v50 = vadd.f32 1e-05, %v5695_v62  ;;  %v5693_v44 = vsub.f32 %v5685_v56, %v5689_v32  ;;  %v14892_v32 = vld [vmem:[%s16790_s11] sm:$0xff]  }
 0x9bd   : > { %14919 = vrsqrt.f32 %v5700_v13  ;;  %v5698_v48 = vmax.f32 %v5694_v46, 0.0 }
 0x9be   : > { %14921 = vrsqrt.f32 %v5699_v50  ;;  %v5697_v52 = vmax.f32 %v5693_v44, 0.0 }
 0x9bf   : > { %v5702_v24 = vadd.f32 1e-05, %v5698_v48 }
 0x9c0   : > { %v5701_v2 = vadd.f32 1e-05, %v5697_v52 }
 0x9c1   : > { %14923 = vrsqrt.f32 %v5702_v24 }
 0x9c2   : > { %14925 = vrsqrt.f32 %v5701_v2 }
 0x9c7   : > { %v14920_v12 = vpop.eup %14919 }
 0x9c8   : > { %v14922_v30 = vpop.eup %14921  ;;  %v5712_v10 = vmul.f32 %v14920_v12, %v5708_v28  ;;  %v5854_v28 = vld [vmem:[%s16925_s29] sm:$0xff] }
 0x9c9   : > { %v5711_v34 = vmul.f32 %v14922_v30, %v5707_v3  ;;  %v5858_v3 = vsel %vm5856_vm4, %v5854_v28, 0 }
 0x9ca   : > { %5734 = vperm.xlu0 %14880, %v5712_v10   ;;  %v5720_v51 = vmul.f32 %v5712_v10, %v5680_v25  ;;  %v16257_v12 = vand.u32 4294901760, %v5858_v3 }
 0x9cb   : > { %v14924_v43 = vpop.eup %14923  ;;  %5729 = vperm.xlu1 %14881, %v5711_v34   ;;  %v5719_v16 = vmul.f32 %v5711_v34, %v5679_v11 }
 0x9cc   : > { %v14926_v14 = vpop.eup %14925  ;;  %v5724_v26 = vsub.f32 %v5716_v17, %v5720_v51  ;;  %v5714_v8 = vmul.f32 %v14924_v43, %v5710_v55  ;;  %v16260_v30 = vsub.f32 %v5858_v3, %v16257_v12  ;;  %v5855_v55 = vld [vmem:[%s16925_s29 + $0x8] sm:$0xff] }
 0x9cd   : > { %v5713_v31 = vmul.f32 %v14926_v14, %v5709_v47  ;;  %v5723_v49 = vsub.f32 %v5715_v23, %v5719_v16  ;;  %v5861_v51 = vsel %vm5856_vm4, %v5855_v55, 0 }
 0x9ce   : > { %v5722_v54 = vmul.f32 %v5714_v8, %v5682_v42  ;;  %v16264_v10 = vand.u32 4294901760, %v16260_v30  ;;  %v16275_v47 = vand.u32 4294901760, %v5861_v51 }
 0x9cf   : > { %5758 = vperm.xlu1 %14881, %v5724_v26   ;;  %5739 = vperm.xlu0 %14880, %v5713_v31   ;;  %v5721_v21 = vmul.f32 %v5713_v31, %v5681_v39 }
 0x9d0   : > { %v5726_v38 = vsub.f32 %v5718_v7, %v5722_v54  ;;  %v5933_v34 = vsub.f32 %v16260_v30, %v16264_v10  ;;  %v16278_v43 = vsub.f32 %v5861_v51, %v16275_v47 }
 0x9d1   : > { %v5725_v53 = vsub.f32 %v5717_v5, %v5721_v21 }
 0x9d2   : > { %v16268_v17 = vand.u32 4294901760, %v5933_v34  ;;  %v16281_v16 = vand.u32 4294901760, %v16278_v43 }
 0x9d3   : > { %5744 = vperm.xlu1 %14881, %v5714_v8   ;;  %5763 = vperm.xlu0 %14880, %v5725_v53  }
 0x9d4   : > { %13597 = vmatprep.mubr.f32.mxu1 %v16268_v17  ;;  %v5943_v54 = vsub.f32 %v16278_v43, %v16281_v16 }
 0x9d7   : > { %5753 = vperm.xlu1 %14881, %v5723_v49   ;;  %5787 = vperm.xlu0 %14880, %v5783_v45  }
 0x9db   : > { %5768 = vperm.xlu1 %14881, %v5726_v38  }
 0x9df   : > { %5792 = vperm.xlu1 %14881, %v5784_v63  }
 0xa49   : > { %v5735_v58 = vpop.permute.xlu0 %5734 }
 0xa4a   : > { %v5730_v15 = vpop.permute.xlu1 %5729  ;;  %v5748_v25 = vmul.f32 %v16033_v37, %v5735_v58  ;;  %v16288_v58 = vand.u32 4294901760, %v5943_v54  ;;  %v6882_v54 = vld [vmem:[%s16915_s3 + $0x150] sm:$0xff] }
 0xa4b   : > { %v5747_v11 = vmul.f32 %v16031_v60, %v5730_v15 }
 0xa4e   : > { %v5759_v41 = vpop.permute.xlu1 %5758  ;;  %v5740_v57 = vpop.permute.xlu0 %5739 }
 0xa4f   : > { %v5772_v40 = vadd.f32 %v5759_v41, %v5748_v25  ;;  %v5749_v35 = vmul.f32 %v16039_v4, %v5740_v57 }
 0xa51   : > { %v5776_v9 = vmax.f32 %v5772_v40, 0.0 }
 0xa52   : > { %v5745_v61 = vpop.permute.xlu1 %5744  ;;  %v5764_v19 = vpop.permute.xlu0 %5763 }
 0xa53   : > { %v5750_v39 = vmul.f32 %v16036_v22, %v5745_v61  ;;  %v5773_v18 = vadd.f32 %v5764_v19, %v5749_v35 }
 0xa55   : > { %v5777_v27 = vmax.f32 %v5773_v18, 0.0 }
 0xa56   : > { %v5754_v42 = vpop.permute.xlu1 %5753  ;;  %v5788_v62 = vpop.permute.xlu0 %5787 }
 0xa57   : > { %v5771_v29 = vadd.f32 %v5754_v42, %v5747_v11 }
 0xa59   : > { %v5775_v20 = vmax.f32 %v5771_v29, 0.0 }
 0xa5a   : > { %v5769_v6 = vpop.permute.xlu1 %5768 }
 0xa5b   : > { %v5779_v1 = vpack.c.bf16 %v5776_v9, %v5775_v20  ;;  %v5774_v0 = vadd.f32 %v5769_v6, %v5750_v39 }
 0xa5d   : > { %v5778_v33 = vmax.f32 %v5774_v0, 0.0  ;;  %13586 = vmatpush3.bf16.msra.mxu0 %v5779_v1 }
 0xa5e   : > { %13587 = vmatprep.subr.bf16.mxu0 %v15008_v59  ;;  %v5793_v50 = vpop.permute.xlu1 %5792 }
 0xa5f   : > { %v5780_v36 = vpack.c.bf16 %v5778_v33, %v5777_v27 }
 0xa61   : > { %13588 = vmatpush3.bf16.msra.mxu0 %v5780_v36 }
 0xa64   : > { %13590 = vmatmul.mubr.msk.bf16.vlgmr.msra.gmra.mrb[24].mxu0 %vm2921_vm2, %v14892_v32 }
 0xa65   : > { %13604 = vmatprep.mubr.f32.mxu0 %v16257_v12 }
 0xb37   : > { %v5837_v56 = vpop.f32.mrb[24].mxu0 }
 0xb38   : > { %v16243_v13 = vadd.f32 %v5837_v56, %v5788_v62  ;;  %v13591_v46 = vpop.f32.mrb[25].mxu0 }
 0xb39   : > { %v5840_v44 = vpop.f32.mrb[26].mxu0 }
 0xb3a   : > { %v16245_v48 = vadd.f32 %v5840_v44, %v5793_v50  ;;  %v13592_v52 = vpop.f32.mrb[27].mxu0  ;;  %5844 = vadd.xlane.f32.xlu0 %v16243_v13  ;;  %v5848_v24 = vmul.f32 %v16243_v13, %v16243_v13 }
 0xb3c   : > { %5846 = vadd.xlane.f32.xlu1 %v16245_v48  ;;  %v5849_v2 = vmul.f32 %v16245_v48, %v16245_v48 }
 0xb3e   : > { %5850 = vadd.xlane.f32.xlu0 %v5848_v24 }
 0xb42   : > { %5852 = vadd.xlane.f32.xlu0 %v5849_v2 }
 0xbc7   : > { %v5845_v14 = vpop.xlane.xlu0 %5844 }
 0xbc8   : > { %v5864_v26 = vand.u32 4294901760, %v5845_v14 }
 0xbc9   : > { %v5847_v8 = vpop.xlane.xlu1 %5846 }
 0xbca   : > { %v5952_v31 = vsub.f32 %v5845_v14, %v5864_v26  ;;  %v5867_v5 = vand.u32 4294901760, %v5847_v8 }
 0xbcb   : > { %v5851_v21 = vpop.xlane.xlu0 %5850 }
 0xbcc   : > { %v5953_v53 = vand.u32 4294901760, %v5952_v31  ;;  %v16285_v23 = vpack.c.bf16 %v5867_v5, %v5864_v26  ;;  %v5959_v45 = vsub.f32 %v5847_v8, %v5867_v5  ;;  %v6366_v49 = vand.u32 4294901760, %v5851_v21  ;;  %v6883_v5 = vld [vmem:[%s16915_s3 + $0x158] sm:$0xff] }
 0xbce   : > { %v5954_v7 = vsub.f32 %v5952_v31, %v5953_v53  ;;  %v5960_v38 = vand.u32 4294901760, %v5959_v45  ;;  %v6454_v63 = vsub.f32 %v5851_v21, %v6366_v49  ;;  %14436 = vmatprep.subr.bf16.mxu1 %v16285_v23  ;;  %v14443_v39 = vpack.c.bf16 %v5959_v45, %v5952_v31 }
 0xbcf   : > { %14438 = vmatpush3.bf16.msra.mxu1 %v16285_v23  ;;  %v5853_v15 = vpop.xlane.xlu0 %5852 }
 0xbd0   : > { %v5961_v41 = vsub.f32 %v5959_v45, %v5960_v38  ;;  %v6455_v57 = vand.u32 4294901760, %v6454_v63  ;;  %v6369_v61 = vand.u32 4294901760, %v5853_v15  ;;  %v5955_v40 = vand.u32 4294901760, %v5954_v7 }
 0xbd1   : > { %v14451_v0 = vpack.c.bf16 %v5960_v38, %v5953_v53  ;;  %v6921_v38 = vld [vmem:[%s16915_s3 + $0x170] sm:$0xff] }
 0xbd2   : > { %v14459_v25 = vpack.c.bf16 %v6369_v61, %v6366_v49  ;;  %v6461_v11 = vsub.f32 %v5853_v15, %v6369_v61  ;;  %13598 = vmatmul.mubr.f32.vlgmr.msra.gmra.mrb[24].mxu1 %v16288_v58  ;;  %v5962_v19 = vand.u32 4294901760, %v5961_v41  ;;  %v6456_v42 = vsub.f32 %v6454_v63, %v6455_v57  ;;  %v6886_v49 = vld [vmem:[%s16915_s3 + $0x160] sm:$0xff]  ;;  %v6887_v41 = vld [vmem:[%s16915_s3 + $0x168] sm:$0xff]  ;;  %v6922_v61 = vld [vmem:[%s16915_s3 + $0x178] sm:$0xff] }
 0xbd3   : > { %13639 = vmatprep.mubr.f32.mxu1 %v16268_v17 }
 0xbd4   : > { %v6462_v35 = vand.u32 4294901760, %v6461_v11  ;;  %14460 = vmatprep.subr.bf16.mxu1 %v14459_v25  ;;  %v14439_v29 = vpack.c.bf16 %v5962_v19, %v5955_v40  ;;  %v6457_v18 = vand.u32 4294901760, %v6456_v42  ;;  %v14467_v1 = vpack.c.bf16 %v6461_v11, %v6454_v63 }
 0xbd5   : > { %14462 = vmatpush3.bf16.msra.mxu1 %v14459_v25 }
 0xbd6   : > { %v6463_v9 = vsub.f32 %v6461_v11, %v6462_v35  ;;  %14440 = vmatprep.subr.bf16.mxu0 %v14439_v29  ;;  %v14475_v27 = vpack.c.bf16 %v6462_v35, %v6455_v57 }
 0xbd7   : > { %14442 = vmatpush3.bf16.msra.mxu0 %v14439_v29 }
 0xbd8   : > { %14444 = vmatprep.subr.bf16.mxu0 %v14443_v39  ;;  %13640 = vmatmul.mubr.f32.vlgmr.msra.gmra.mrb[26].mxu1 %v16288_v58  ;;  %v6464_v20 = vand.u32 4294901760, %v6463_v9 }
 0xbd9   : > { %13646 = vmatprep.mubr.f32.mxu1 %v16257_v12 }
 0xbda   : > { %13605 = vmatmul.mubr.f32.vlgmr.msra.gmra.mrb[28].mxu0 %v16275_v47  ;;  %v14463_v6 = vpack.c.bf16 %v6464_v20, %v6457_v18 }
 0xbdb   : > { %14446 = vmatpush3.bf16.msra.mxu0 %v14443_v39  ;;  %13611 = vmatprep.mubr.f32.mxu0 %v16260_v30 }
 0xbdc   : > { %14448 = vmatprep.subr.bf16.mxu0 %v16285_v23  ;;  %14464 = vmatprep.subr.bf16.mxu1 %v14463_v6 }
 0xbdd   : > { %14466 = vmatpush3.bf16.msra.mxu1 %v14463_v6  ;;  %v14893_v6 = vld [vmem:[%s16791_s12] sm:$0xff]  }
 0xbde   : > { %14468 = vmatprep.subr.bf16.mxu1 %v14467_v1 }
 0xbe0   : > { %13647 = vmatmul.mubr.f32.vlgmr.msra.gmra.mrb[26].mxu1 %v16275_v47 }
 0xbe1   : > { %14470 = vmatpush3.bf16.msra.mxu1 %v14467_v1  ;;  %13653 = vmatprep.mubr.f32.mxu1 %v16260_v30  ;;  %v6982_v1 = vpack.c.bf16 %v16033_v37, %v16031_v60 }
 0xbe2   : > { %13612 = vmatmul.mubr.f32.vlgmr.msra.gmra.mrb[28].mxu0 %v16278_v43  ;;  %14472 = vmatprep.subr.bf16.mxu1 %v14459_v25 }
 0xbe3   : > { %14450 = vmatpush3.bf16.msra.mxu0 %v16285_v23  ;;  %13618 = vmatprep.mubr.f32.mxu0 %v16264_v10 }
 0xbe4   : > { %14452 = vmatprep.subr.bf16.mxu0 %v14451_v0 }
 0xbe8   : > { %13654 = vmatmul.mubr.f32.vlgmr.msra.gmra.mrb[26].mxu1 %v16278_v43 }
 0xbe9   : > { %14474 = vmatpush3.bf16.msra.mxu1 %v14459_v25  ;;  %13660 = vmatprep.mubr.f32.mxu1 %v16264_v10 }
 0xbea   : > { %14476 = vmatprep.subr.bf16.mxu1 %v14475_v27  ;;  %13619 = vmatmul.mubr.f32.vlgmr.msra.gmra.mrb[28].mxu0 %v16281_v16 }
 0xbeb   : > { %14454 = vmatpush3.bf16.msra.mxu0 %v14451_v0  ;;  %13625 = vmatprep.mubr.f32.mxu0 %v16257_v12 }
 0xbec   : > { %14456 = vmatprep.subr.bf16.mxu0 %v16285_v23 }
 0xbf0   : > { %13661 = vmatmul.mubr.f32.vlgmr.msra.gmra.mrb[26].mxu1 %v16281_v16 }
 0xbf1   : > { %14478 = vmatpush3.bf16.msra.mxu1 %v14475_v27  ;;  %13667 = vmatprep.mubr.f32.mxu1 %v16257_v12 }
 0xbf2   : > { %14480 = vmatprep.subr.bf16.mxu1 %v14459_v25  ;;  %13626 = vmatmul.mubr.f32.vlgmr.msra.gmra.mrb[28].mxu0 %v16275_v47 }
 0xbf3   : > { %14458 = vmatpush3.bf16.msra.mxu0 %v16285_v23  ;;  %13632 = vmatprep.mubr.f32.mxu0 %v16257_v12 }
 0xbf4   : > { %13677 = vmatprep.subr.bf16.mxu0 %v15008_v59 }
 0xbf8   : > { %13668 = vmatmul.mubr.f32.vlgmr.msra.gmra.mrb[26].mxu1 %v16275_v47 }
 0xbf9   : > { %14482 = vmatpush3.bf16.msra.mxu1 %v14459_v25  ;;  %13674 = vmatprep.mubr.f32.mxu1 %v16257_v12 }
 0xbfa   : > { %13633 = vmatmul.mubr.f32.vlgmr.msra.gmra.mrb[28].mxu0 %v16275_v47 }
 0xbfb   : > { %13679 = vmatprep.mubr.msk.bf16.mxu0 %vm15009_vm3, %v15008_v59 }
 0xc00   : > { %13675 = vmatmul.mubr.f32.vlgmr.msra.gmra.mrb[26].mxu1 %v16275_v47 }
 0xc01   : > { %13695 = vmatprep.mubr.f32.mxu1 %v16268_v17 }
 0xca5   : > { %v13599_v33 = vpop.f32.mrb[24].mxu1 }
 0xca6   : > { %v5936_v36 = vpop.f32.mrb[25].mxu1 }
 0xccd   : > { %v13634_v32 = vpop.f32.mrb[28].mxu0 }
 0xcce   : > { %v14535_v62 = vadd.f32 %v13634_v32, %v13599_v33  ;;  %v6355_v56 = vpop.f32.mrb[29].mxu0 }
 0xccf   : > { %v14536_v46 = vadd.f32 %v6355_v56, %v5936_v36 }
 0xcd0   : > { %v6869_v50 = vmul.f32 0.00390625, %v14535_v62 }
 0xcd1   : > { %v6868_v44 = vmul.f32 0.00390625, %v14536_v46 }
 0xcd2   : > { %v6873_v24 = vmul.f32 %v6869_v50, %v6869_v50 }
 0xcd3   : > { %v13676_v52 = vpop.f32.mrb[26].mxu1  ;;  %v6872_v3 = vmul.f32 %v6868_v44, %v6868_v44 }
 0xcd4   : > { %v6871_v2 = vmul.f32 0.00390625, %v13676_v52  ;;  %v6857_v28 = vpop.f32.mrb[27].mxu1 }
 0xcd5   : > { %v6870_v34 = vmul.f32 0.00390625, %v6857_v28 }
 0xcd6   : > { %v6875_v55 = vsub.f32 %v6871_v2, %v6873_v24 }
 0xcd7   : > { %v6874_v51 = vsub.f32 %v6870_v34, %v6872_v3 }
 0xcd8   : > { %v6877_v14 = vmax.f32 %v6875_v55, 0.0 }
 0xcd9   : > { %v6876_v26 = vmax.f32 %v6874_v51, 0.0 }
 0xcda   : > { %v6879_v8 = vadd.f32 1e-05, %v6877_v14 }
 0xcdb   : > { %v6878_v31 = vadd.f32 1e-05, %v6876_v26 }
 0xcdc   : > { %14927 = vrsqrt.f32 %v6879_v8 }
 0xcdd   : > { %14929 = vrsqrt.f32 %v6878_v31 }
 0xce6   : > { %v14928_v21 = vpop.eup %14927 }
 0xce7   : > { %v14930_v53 = vpop.eup %14929  ;;  %v6885_v23 = vmul.f32 %v14928_v21, %v6883_v5 }
 0xce8   : > { %v6884_v45 = vmul.f32 %v14930_v53, %v6882_v54 }
 0xce9   : > { %6899 = vperm.xlu0 %14880, %v6885_v23   ;;  %v6889_v7 = vmul.f32 %v6885_v23, %v6869_v50 }
 0xcea   : > { %6894 = vperm.xlu1 %14881, %v6884_v45   ;;  %v6888_v63 = vmul.f32 %v6884_v45, %v6868_v44 }
 0xceb   : > { %v6891_v57 = vsub.f32 %v6887_v41, %v6889_v7 }
 0xcec   : > { %v6890_v15 = vsub.f32 %v6886_v49, %v6888_v63 }
 0xced   : > { %6925 = vperm.xlu0 %14880, %v6921_v38  }
 0xcee   : > { %6906 = vperm.xlu1 %14881, %v6890_v15  }
 0xcf2   : > { %6911 = vperm.xlu1 %14881, %v6891_v57  }
 0xcf6   : > { %6930 = vperm.xlu1 %14881, %v6922_v61  }
 0xd68   : > { %v6900_v11 = vpop.permute.xlu0 %6899 }
 0xd69   : > { %v6895_v25 = vpop.permute.xlu1 %6894  ;;  %v6903_v42 = vmul.f32 %v6900_v11, %v16245_v48  ;;  %v14894_v48 = vld [vmem:[%s16792_s13] sm:$0xff]  }
 0xd6a   : > { %v6902_v19 = vmul.f32 %v6895_v25, %v16243_v13  ;;  %v6983_v13 = vpack.c.bf16 %v16036_v22, %v16039_v4 }
 0xd6c   : > { %v6926_v60 = vpop.permute.xlu0 %6925 }
 0xd6d   : > { %v6907_v40 = vpop.permute.xlu1 %6906 }
 0xd6e   : > { %v6914_v35 = vadd.f32 %v6907_v40, %v6902_v19 }
 0xd70   : > { %v6916_v39 = vmax.f32 %v6914_v35, 0.0 }
 0xd71   : > { %v6912_v29 = vpop.permute.xlu1 %6911 }
 0xd72   : > { %v6915_v9 = vadd.f32 %v6912_v29, %v6903_v42 }
 0xd74   : > { %v6917_v18 = vmax.f32 %v6915_v9, 0.0 }
 0xd75   : > { %v6931_v33 = vpop.permute.xlu1 %6930 }
 0xd76   : > { %v6918_v20 = vpack.c.bf16 %v6917_v18, %v6916_v39 }
 0xd78   : > { %13678 = vmatpush3.bf16.msra.mxu0 %v6918_v20 }
 0xd79   : > { %13683 = vmatprep.subr.bf16.mxu0 %v15008_v59 }
 0xd7b   : > { %13680 = vmatmul.mubr.msk.bf16.vlgmr.msra.gmra.mrb[32].mxu0 %vm5856_vm4, %v14893_v6  ;;  %v8063_v6 = vld [vmem:[%s16915_s3 + $0x180] sm:$0xff] }
 0xd7c   : > { %13684 = vmatpush3.bf16.msra.mxu0 %v6982_v1  ;;  %13687 = vmatprep.mubr.msk.bf16.mxu0 %vm15009_vm3, %v15008_v59 }
 0xd7d   : > { %13685 = vmatprep.subr.bf16.mxu0 %v15008_v59 }
 0xd80   : > { %13686 = vmatpush3.bf16.msra.mxu0 %v6983_v13 }
 0xd87   : > { %13688 = vmatmul.mubr.msk.bf16.vlgmr.msra.gmra.mrb[32].mxu0 %vm2921_vm2, %v14894_v48 }
 0xd88   : > { %13737 = vmatprep.mubr.f32.mxu0 %v16268_v17 }
 0xe5a   : > { %v7028_v37 = vpop.f32.mrb[32].mxu0 }
 0xe5b   : > { %v16358_v0 = vadd.f32 %v7028_v37, %v6926_v60  ;;  %v13689_v27 = vpop.f32.mrb[33].mxu0  ;;  %v8067_v37 = vld [vmem:[%s16915_s3 + $0x190] sm:$0xff] }
 0xe5c   : > { %v7031_v36 = vpop.f32.mrb[34].mxu0 }
 0xe5d   : > { %v16360_v32 = vadd.f32 %v7031_v36, %v6931_v33  ;;  %7035 = vadd.xlane.f32.xlu0 %v16358_v0  ;;  %v13690_v22 = vpop.f32.mrb[35].mxu0  ;;  %v7039_v4 = vmul.f32 %v16358_v0, %v16358_v0  ;;  %v8101_v33 = vld [vmem:[%s16915_s3 + $0x1a0] sm:$0xff] }
 0xe5f   : > { %7037 = vadd.xlane.f32.xlu1 %v16360_v32  ;;  %v7040_v17 = vmul.f32 %v16360_v32, %v16360_v32 }
 0xe61   : > { %7041 = vadd.xlane.f32.xlu0 %v7039_v4  ;;  %v8068_v4 = vld [vmem:[%s16915_s3 + $0x198] sm:$0xff] }
 0xe65   : > { %7043 = vadd.xlane.f32.xlu0 %v7040_v17 }
 0xeea   : > { %v7036_v62 = vpop.xlane.xlu0 %7035 }
 0xeeb   : > { %v7046_v56 = vand.u32 4294901760, %v7036_v62 }
 0xeec   : > { %v7038_v46 = vpop.xlane.xlu1 %7037 }
 0xeed   : > { %v7134_v50 = vsub.f32 %v7036_v62, %v7046_v56  ;;  %v7049_v44 = vand.u32 4294901760, %v7038_v46 }
 0xeee   : > { %v7042_v52 = vpop.xlane.xlu0 %7041 }
 0xeef   : > { %v7135_v24 = vand.u32 4294901760, %v7134_v50  ;;  %v16368_v2 = vpack.c.bf16 %v7049_v44, %v7046_v56  ;;  %v7141_v28 = vsub.f32 %v7038_v46, %v7049_v44  ;;  %v7548_v3 = vand.u32 4294901760, %v7042_v52 }
 0xef1   : > { %v7136_v34 = vsub.f32 %v7134_v50, %v7135_v24  ;;  %v7142_v55 = vand.u32 4294901760, %v7141_v28  ;;  %v7636_v51 = vsub.f32 %v7042_v52, %v7548_v3  ;;  %14484 = vmatprep.subr.bf16.mxu1 %v16368_v2  ;;  %v14491_v38 = vpack.c.bf16 %v7141_v28, %v7134_v50 }
 0xef2   : > { %14486 = vmatpush3.bf16.msra.mxu1 %v16368_v2  ;;  %v7044_v14 = vpop.xlane.xlu0 %7043 }
 0xef3   : > { %v7143_v26 = vsub.f32 %v7141_v28, %v7142_v55  ;;  %v7637_v8 = vand.u32 4294901760, %v7636_v51  ;;  %v7551_v31 = vand.u32 4294901760, %v7044_v14  ;;  %v7137_v21 = vand.u32 4294901760, %v7136_v34 }
 0xef5   : > { %v14507_v5 = vpack.c.bf16 %v7551_v31, %v7548_v3  ;;  %v7643_v54 = vsub.f32 %v7044_v14, %v7551_v31  ;;  %13696 = vmatmul.mubr.f32.vlgmr.msra.gmra.mrb[28].mxu1 %v16288_v58  ;;  %v7144_v53 = vand.u32 4294901760, %v7143_v26  ;;  %v7638_v23 = vsub.f32 %v7636_v51, %v7637_v8 }
 0xef6   : > { %13702 = vmatprep.mubr.f32.mxu1 %v16257_v12 }
 0xef7   : > { %v7644_v45 = vand.u32 4294901760, %v7643_v54  ;;  %14508 = vmatprep.subr.bf16.mxu0 %v14507_v5  ;;  %v14487_v49 = vpack.c.bf16 %v7144_v53, %v7137_v21  ;;  %v7639_v63 = vand.u32 4294901760, %v7638_v23  ;;  %v14515_v57 = vpack.c.bf16 %v7643_v54, %v7636_v51  ;;  %v8155_v21 = vld [vmem:[%s16926_s25] sm:$0xff] }
 0xef8   : > { %14510 = vmatpush3.bf16.msra.mxu0 %v14507_v5  ;;  %v8158_v53 = vsel %vm8156_vm5, %v8155_v21, 0 }
 0xef9   : > { %v7645_v7 = vsub.f32 %v7643_v54, %v7644_v45  ;;  %14488 = vmatprep.subr.bf16.mxu1 %v14487_v49  ;;  %v14523_v61 = vpack.c.bf16 %v7644_v45, %v7637_v8  ;;  %v16437_v23 = vand.u32 4294901760, %v8158_v53 }
 0xefa   : > { %14490 = vmatpush3.bf16.msra.mxu1 %v14487_v49 }
 0xefb   : > { %14492 = vmatprep.subr.bf16.mxu1 %v14491_v38  ;;  %13738 = vmatmul.mubr.f32.vlgmr.msra.gmra.mrb[30].mxu0 %v16288_v58  ;;  %v7646_v15 = vand.u32 4294901760, %v7645_v7  ;;  %v14499_v58 = vpack.c.bf16 %v7142_v55, %v7135_v24  ;;  %v8100_v55 = vld [vmem:[%s16793_s14] sm:$0xf]  ;;  %v16440_v45 = vsub.f32 %v8158_v53, %v16437_v23 }
 0xefc   : > { %13744 = vmatprep.mubr.f32.mxu0 %v16257_v12 }
 0xefd   : > { %13703 = vmatmul.mubr.f32.vlgmr.msra.gmra.mrb[28].mxu1 %v16275_v47  ;;  %v14511_v41 = vpack.c.bf16 %v7646_v15, %v7639_v63  ;;  %v16443_v49 = vand.u32 4294901760, %v16440_v45 }
 0xefe   : > { %14494 = vmatpush3.bf16.msra.mxu1 %v14491_v38  ;;  %13709 = vmatprep.mubr.f32.mxu1 %v16260_v30 }
 0xeff   : > { %14496 = vmatprep.subr.bf16.mxu1 %v16368_v2  ;;  %14512 = vmatprep.subr.bf16.mxu0 %v14511_v41  ;;  %v8229_v7 = vsub.f32 %v16440_v45, %v16443_v49 }
 0xf00   : > { %14514 = vmatpush3.bf16.msra.mxu0 %v14511_v41 }
 0xf01   : > { %14516 = vmatprep.subr.bf16.mxu0 %v14515_v57  ;;  %v16447_v63 = vand.u32 4294901760, %v8229_v7 }
 0xf03   : > { %13745 = vmatmul.mubr.f32.vlgmr.msra.gmra.mrb[30].mxu0 %v16275_v47 }
 0xf04   : > { %14518 = vmatpush3.bf16.msra.mxu0 %v14515_v57  ;;  %13751 = vmatprep.mubr.f32.mxu0 %v16260_v30 }
 0xf05   : > { %13710 = vmatmul.mubr.f32.vlgmr.msra.gmra.mrb[28].mxu1 %v16278_v43  ;;  %14520 = vmatprep.subr.bf16.mxu0 %v14507_v5 }
 0xf06   : > { %14498 = vmatpush3.bf16.msra.mxu1 %v16368_v2  ;;  %13716 = vmatprep.mubr.f32.mxu1 %v16264_v10 }
 0xf07   : > { %14500 = vmatprep.subr.bf16.mxu1 %v14499_v58 }
 0xf0b   : > { %13752 = vmatmul.mubr.f32.vlgmr.msra.gmra.mrb[30].mxu0 %v16278_v43 }
 0xf0c   : > { %14522 = vmatpush3.bf16.msra.mxu0 %v14507_v5  ;;  %13758 = vmatprep.mubr.f32.mxu0 %v16264_v10 }
 0xf0d   : > { %14524 = vmatprep.subr.bf16.mxu0 %v14523_v61  ;;  %13717 = vmatmul.mubr.f32.vlgmr.msra.gmra.mrb[28].mxu1 %v16281_v16 }
 0xf0e   : > { %14502 = vmatpush3.bf16.msra.mxu1 %v14499_v58  ;;  %13723 = vmatprep.mubr.f32.mxu1 %v16257_v12 }
 0xf0f   : > { %14504 = vmatprep.subr.bf16.mxu1 %v16368_v2 }
 0xf13   : > { %13759 = vmatmul.mubr.f32.vlgmr.msra.gmra.mrb[30].mxu0 %v16281_v16 }
 0xf14   : > { %14526 = vmatpush3.bf16.msra.mxu0 %v14523_v61  ;;  %13765 = vmatprep.mubr.f32.mxu0 %v16257_v12 }
 0xf15   : > { %14528 = vmatprep.subr.bf16.mxu0 %v14507_v5  ;;  %13724 = vmatmul.mubr.f32.vlgmr.msra.gmra.mrb[28].mxu1 %v16275_v47 }
 0xf16   : > { %14506 = vmatpush3.bf16.msra.mxu1 %v16368_v2  ;;  %13730 = vmatprep.mubr.f32.mxu1 %v16257_v12 }
 0xf17   : > { %13775 = vmatprep.subr.bf16.mxu1 %v15008_v59 }
 0xf1b   : > { %13766 = vmatmul.mubr.f32.vlgmr.msra.gmra.mrb[30].mxu0 %v16275_v47 }
 0xf1c   : > { %14530 = vmatpush3.bf16.msra.mxu0 %v14507_v5  ;;  %13772 = vmatprep.mubr.f32.mxu0 %v16257_v12 }
 0xf1d   : > { %13731 = vmatmul.mubr.f32.vlgmr.msra.gmra.mrb[28].mxu1 %v16275_v47  ;;  %13781 = vmatprep.subr.mxu0 %v15008_v59 }
 0xf1e   : > { %13777 = vmatprep.mubr.msk.bf16.mxu1 %vm15009_vm3, %v15008_v59 }
 0xf23   : > { %13773 = vmatmul.mubr.f32.vlgmr.msra.gmra.mrb[30].mxu0 %v16275_v47  ;;  %v8064_v47 = vld [vmem:[%s16915_s3 + $0x188] sm:$0xff] }
 0xf24   : > { %13783 = vmatprep.mubr.msk.f32.mxu0 %vm15009_vm3, %v15008_v59 }
 0xff0   : > { %v13732_v30 = vpop.f32.mrb[28].mxu1 }
 0xff1   : > { %v7537_v10 = vpop.f32.mrb[29].mxu1  ;;  %v8050_v43 = vmul.f32 0.00390625, %v13732_v30 }
 0xff2   : > { %v8049_v16 = vmul.f32 0.00390625, %v7537_v10 }
 0xff3   : > { %v8054_v11 = vmul.f32 %v8050_v43, %v8050_v43 }
 0xff4   : > { %v8053_v19 = vmul.f32 %v8049_v16, %v8049_v16 }
 0xff6   : > { %v13774_v25 = vpop.f32.mrb[30].mxu0 }
 0xff7   : > { %v8052_v40 = vmul.f32 0.00390625, %v13774_v25  ;;  %v8039_v12 = vpop.f32.mrb[31].mxu0 }
 0xff8   : > { %v8051_v42 = vmul.f32 0.00390625, %v8039_v12 }
 0xff9   : > { %v8056_v35 = vsub.f32 %v8052_v40, %v8054_v11 }
 0xffa   : > { %v8055_v29 = vsub.f32 %v8051_v42, %v8053_v19 }
 0xffb   : > { %v8058_v9 = vmax.f32 %v8056_v35, 0.0 }
 0xffc   : > { %v8057_v39 = vmax.f32 %v8055_v29, 0.0 }
 0xffd   : > { %v8060_v18 = vadd.f32 1e-05, %v8058_v9 }
 0xffe   : > { %v8059_v20 = vadd.f32 1e-05, %v8057_v39 }
 0xfff   : > { %14931 = vrsqrt.f32 %v8060_v18 }
0x1000   : > { %14933 = vrsqrt.f32 %v8059_v20 }
0x1009   : > { %v14932_v1 = vpop.eup %14931 }
0x100a   : > { %v14934_v13 = vpop.eup %14933  ;;  %v8066_v48 = vmul.f32 %v14932_v1, %v8064_v47  ;;  %v9060_v47 = vld [vmem:[%s16915_s3 + $0x1a8] sm:$0xff] }
0x100b   : > { %v8065_v60 = vmul.f32 %v14934_v13, %v8063_v6  ;;  %v9062_v13 = vld [vmem:[%s16915_s3 + $0x1b0] sm:$0xff] }
0x100c   : > { %8080 = vperm.xlu0 %14880, %v8066_v48   ;;  %v8070_v27 = vmul.f32 %v8066_v48, %v8050_v43 }
0x100d   : > { %8075 = vperm.xlu1 %14881, %v8065_v60   ;;  %v8069_v36 = vmul.f32 %v8065_v60, %v8049_v16 }
0x100e   : > { %v8072_v17 = vsub.f32 %v8068_v4, %v8070_v27 }
0x100f   : > { %v8071_v22 = vsub.f32 %v8067_v37, %v8069_v36  ;;  %v9080_v37 = vld [vmem:[%s16915_s3 + $0x1b8] sm:$0xff] }
0x1010   : > { %8104 = vperm.xlu0 %14880, %v8101_v33  }
0x1011   : > { %8087 = vperm.xlu1 %14881, %v8071_v22  }
0x1015   : > { %8092 = vperm.xlu1 %14881, %v8072_v17  }
0x108b   : > { %v8081_v56 = vpop.permute.xlu0 %8080 }
0x108c   : > { %v8076_v62 = vpop.permute.xlu1 %8075  ;;  %v8084_v44 = vmul.f32 %v16360_v32, %v8081_v56  ;;  %v9079_v56 = vld [vmem:[%s16794_s15] sm:$0xf] }
0x108d   : > { %v8083_v50 = vmul.f32 %v16358_v0, %v8076_v62 }
0x108f   : > { %v8105_v51 = vpop.permute.xlu0 %8104 }
0x1090   : > { %v8088_v46 = vpop.permute.xlu1 %8087 }
0x1091   : > { %v8095_v52 = vadd.f32 %v8088_v46, %v8083_v50  ;;  %v9133_v46 = vpack.c.bf16 %v16360_v32, %v16358_v0  ;;  %v9134_v50 = vld [vmem:[%s16795_s16] sm:$0xf] }
0x1093   : > { %v8097_v28 = vmax.f32 %v8095_v52, 0.0 }
0x1094   : > { %v8093_v24 = vpop.permute.xlu1 %8092 }
0x1095   : > { %v8096_v2 = vadd.f32 %v8093_v24, %v8084_v44 }
0x1097   : > { %v8098_v3 = vmax.f32 %v8096_v2, 0.0 }
0x1099   : > { %v8099_v34 = vpack.c.bf16 %v8098_v3, %v8097_v28 }
0x109b   : > { %13776 = vmatpush3.bf16.msra.mxu1 %v8099_v34 }
0x109c   : > { %13811 = vmatprep.subr.mxu1 %v15008_v59 }
0x109e   : > { %13778 = vmatmul.mubr.msk.bf16.vlgmr.msra.gmra.mrb[32].mxu1 %vm5856_vm4, %v8100_v55 }
0x109f   : > { %13813 = vmatprep.mubr.msk.f32.mxu1 %vm15009_vm3, %v15008_v59 }
0x1171   : > { %v8144_v14 = vpop.f32.mrb[32].mxu1 }
0x1172   : > { %v16428_v26 = vadd.f32 %v8144_v14, %v8105_v51  ;;  %v13779_v8 = vpop.f32.mrb[33].mxu1 }
0x1173   : > { %v8147_v31 = vpop.f32.mrb[34].mxu1 }
0x1174   : > { %8150 = vadd.xlane.f32.xlu1 %v16428_v26  ;;  %v13780_v5 = vpop.f32.mrb[35].mxu1  ;;  %v8152_v54 = vmul.f32 %v16428_v26, %v16428_v26 }
0x1176   : > { %8153 = vadd.xlane.f32.xlu0 %v8152_v54 }
0x1201   : > { %v8151_v38 = vpop.xlane.xlu1 %8150 }
0x1202   : > { %v8161_v15 = vand.u32 4294901760, %v8151_v38 }
0x1203   : > { %v8154_v41 = vpop.xlane.xlu0 %8153 }
0x1204   : > { %v8238_v57 = vsub.f32 %v8151_v38, %v8161_v15  ;;  %v8607_v58 = vand.u32 4294901760, %v8154_v41  ;;  %13782 = vmatpush3.msra.mxu0 %v8161_v15 }
0x1205   : > { %13784 = vmatmul.mubr.f32.vlgmr.msra.gmra.mrb[36].mxu0 %v16447_v63  ;;  %13786 = vmatprep.subr.mxu0 %v15008_v59 }
0x1206   : > { %v8239_v61 = vand.u32 4294901760, %v8238_v57  ;;  %v8684_v30 = vsub.f32 %v8154_v41, %v8607_v58  ;;  %13812 = vmatpush3.msra.mxu1 %v8607_v58  ;;  %13788 = vmatprep.mubr.msk.f32.mxu0 %vm15009_vm3, %v15008_v59 }
0x1207   : > { %13814 = vmatmul.mubr.f32.vlgmr.msra.gmra.mrb[30].mxu1 %v16447_v63  ;;  %13816 = vmatprep.subr.mxu1 %v15008_v59 }
0x1208   : > { %v8240_v10 = vsub.f32 %v8238_v57, %v8239_v61  ;;  %v8685_v43 = vand.u32 4294901760, %v8684_v30  ;;  %13818 = vmatprep.mubr.msk.f32.mxu1 %vm15009_vm3, %v15008_v59 }
0x120a   : > { %v8241_v16 = vand.u32 4294901760, %v8240_v10  ;;  %v8686_v25 = vsub.f32 %v8684_v30, %v8685_v43 }
0x120c   : > { %v8687_v11 = vand.u32 4294901760, %v8686_v25  ;;  %13787 = vmatpush3.msra.mxu0 %v8241_v16  ;;  %v10082_v16 = vld [vmem:[%s16915_s3 + $0x1c0] sm:$0xff] }
0x120d   : > { %13789 = vmatmul.mubr.f32.vlgmr.msra.gmra.mrb[36].mxu0 %v16437_v23  ;;  %13791 = vmatprep.subr.mxu0 %v15008_v59 }
0x120e   : > { %13792 = vmatpush3.msra.mxu0 %v8238_v57  ;;  %13817 = vmatpush3.msra.mxu1 %v8687_v11 }
0x120f   : > { %13819 = vmatmul.mubr.f32.vlgmr.msra.gmra.mrb[30].mxu1 %v16437_v23  ;;  %13821 = vmatprep.subr.mxu1 %v15008_v59 }
0x1210   : > { %13822 = vmatpush3.msra.mxu1 %v8684_v30  ;;  %13793 = vmatprep.mubr.msk.f32.mxu0 %vm15009_vm3, %v15008_v59 }
0x1211   : > { %13796 = vmatprep.subr.mxu0 %v15008_v59  ;;  %13823 = vmatprep.mubr.msk.f32.mxu1 %vm15009_vm3, %v15008_v59 }
0x1212   : > { %13826 = vmatprep.subr.mxu1 %v15008_v59 }
0x1215   : > { %13794 = vmatmul.mubr.f32.vlgmr.msra.gmra.mrb[36].mxu0 %v16440_v45 }
0x1216   : > { %13797 = vmatpush3.msra.mxu0 %v8161_v15  ;;  %13798 = vmatprep.mubr.msk.f32.mxu0 %vm15009_vm3, %v15008_v59 }
0x1217   : > { %13824 = vmatmul.mubr.f32.vlgmr.msra.gmra.mrb[30].mxu1 %v16440_v45  ;;  %13801 = vmatprep.subr.mxu0 %v15008_v59 }
0x1218   : > { %13827 = vmatpush3.msra.mxu1 %v8607_v58  ;;  %13828 = vmatprep.mubr.msk.f32.mxu1 %vm15009_vm3, %v15008_v59 }
0x1219   : > { %13831 = vmatprep.subr.mxu1 %v15008_v59 }
0x121d   : > { %13799 = vmatmul.mubr.f32.vlgmr.msra.gmra.mrb[36].mxu0 %v16443_v49 }
0x121e   : > { %13802 = vmatpush3.msra.mxu0 %v8239_v61  ;;  %13803 = vmatprep.mubr.msk.f32.mxu0 %vm15009_vm3, %v15008_v59 }
0x121f   : > { %13829 = vmatmul.mubr.f32.vlgmr.msra.gmra.mrb[30].mxu1 %v16443_v49  ;;  %13806 = vmatprep.subr.mxu0 %v15008_v59 }
0x1220   : > { %13832 = vmatpush3.msra.mxu1 %v8685_v43  ;;  %13833 = vmatprep.mubr.msk.f32.mxu1 %vm15009_vm3, %v15008_v59 }
0x1221   : > { %13836 = vmatprep.subr.mxu1 %v15008_v59 }
0x1225   : > { %13804 = vmatmul.mubr.f32.vlgmr.msra.gmra.mrb[36].mxu0 %v16437_v23 }
0x1226   : > { %13807 = vmatpush3.msra.mxu0 %v8161_v15  ;;  %13808 = vmatprep.mubr.msk.f32.mxu0 %vm15009_vm3, %v15008_v59 }
0x1227   : > { %13834 = vmatmul.mubr.f32.vlgmr.msra.gmra.mrb[30].mxu1 %v16437_v23  ;;  %13841 = vmatprep.subr.bf16.mxu0 %v15008_v59 }
0x1228   : > { %13837 = vmatpush3.msra.mxu1 %v8607_v58  ;;  %13838 = vmatprep.mubr.msk.f32.mxu1 %vm15009_vm3, %v15008_v59 }
0x1229   : > { %13853 = vmatprep.subr.mxu1 %v15008_v59 }
0x122d   : > { %13809 = vmatmul.mubr.f32.vlgmr.msra.gmra.mrb[36].mxu0 %v16437_v23 }
0x122e   : > { %13843 = vmatprep.mubr.msk.bf16.mxu0 %vm15009_vm3, %v15008_v59 }
0x122f   : > { %13839 = vmatmul.mubr.f32.vlgmr.msra.gmra.mrb[30].mxu1 %v16437_v23 }
0x1230   : > { %13855 = vmatprep.mubr.msk.f32.mxu1 %vm15009_vm3, %v15008_v59 }
0x1300   : > { %v8602_v40 = vpop.f32.mrb[36].mxu0 }
0x1301   : > { %v9053_v12 = vmul.f32 0.0078125, %v8602_v40  ;;  %v13810_v19 = vpop.f32.mrb[37].mxu0  ;;  %v10084_v40 = vld [vmem:[%s16915_s3 + $0x1c8] sm:$0xff] }
0x1302   : > { %v9048_v42 = vpop.f32.mrb[30].mxu1  ;;  %v10102_v19 = vld [vmem:[%s16915_s3 + $0x1d0] sm:$0xff] }
0x1303   : > { %v9055_v35 = vmul.f32 %v9053_v12, %v9053_v12  ;;  %v9054_v29 = vmul.f32 0.0078125, %v9048_v42  ;;  %v13840_v9 = vpop.f32.mrb[31].mxu1 }
0x1305   : > { %v9056_v39 = vsub.f32 %v9054_v29, %v9055_v35 }
0x1307   : > { %v9057_v18 = vmax.f32 %v9056_v39, 0.0 }
0x1309   : > { %v9058_v20 = vadd.f32 1e-05, %v9057_v18 }
0x130b   : > { %14935 = vrsqrt.f32 %v9058_v20 }
0x1315   : > { %v14936_v6 = vpop.eup %14935 }
0x1316   : > { %v9061_v1 = vmul.f32 %v14936_v6, %v9060_v47  ;;  %v10101_v6 = vld [vmem:[%s16796_s17] sm:$0xf] }
0x1318   : > { %9067 = vperm.xlu0 %14880, %v9061_v1   ;;  %v9063_v48 = vmul.f32 %v9061_v1, %v9053_v12 }
0x131a   : > { %v9064_v60 = vsub.f32 %v9062_v13, %v9063_v48 }
0x131c   : > { %9073 = vperm.xlu1 %14881, %v9064_v60  }
0x1320   : > { %9083 = vperm.xlu1 %14881, %v9080_v37  }
0x1397   : > { %v9068_v27 = vpop.permute.xlu0 %9067 }
0x1398   : > { %v9070_v33 = vmul.f32 %v9068_v27, %v16428_v26 }
0x139b   : > { %v9074_v36 = vpop.permute.xlu1 %9073 }
0x139c   : > { %v9076_v22 = vadd.f32 %v9074_v36, %v9070_v33 }
0x139e   : > { %v9077_v4 = vmax.f32 %v9076_v22, 0.0 }
0x139f   : > { %v9084_v44 = vpop.permute.xlu1 %9083 }
0x13a0   : > { %v9078_v17 = vpack.c.bf16 %v9077_v4, %v9077_v4 }
0x13a2   : > { %v9091_v62 = vsel %vm9089_vm6, %v9078_v17, 0 }
0x13a3   : > { %13842 = vmatpush3.bf16.msra.mxu0 %v9091_v62 }
0x13a4   : > { %13847 = vmatprep.subr.bf16.mxu0 %v15008_v59 }
0x13a6   : > { %13844 = vmatmul.mubr.msk.bf16.vlgmr.msra.gmra.mrb[40].mxu0 %vm8156_vm5, %v9079_v56 }
0x13a7   : > { %13848 = vmatpush3.bf16.msra.mxu0 %v9133_v46  ;;  %13849 = vmatprep.mubr.msk.bf16.mxu0 %vm15009_vm3, %v15008_v59 }
0x13a8   : > { %13883 = vmatprep.subr.mxu0 %v15008_v59 }
0x13b2   : > { %13850 = vmatmul.mubr.msk.bf16.vlgmr.msra.gmra.mrb[40].mxu0 %vm5856_vm4, %v9134_v50 }
0x13b3   : > { %13885 = vmatprep.mubr.msk.f32.mxu0 %vm15009_vm3, %v15008_v59 }
0x1485   : > { %v9172_v52 = vpop.f32.mrb[40].mxu0 }
0x1486   : > { %v16524_v0 = vadd.f32 %v9172_v52, %v9084_v44  ;;  %v13851_v32 = vpop.f32.mrb[41].mxu0 }
0x1487   : > { %v9175_v24 = vpop.f32.mrb[42].mxu0 }
0x1488   : > { %v13852_v2 = vpop.f32.mrb[43].mxu0  ;;  %9178 = vadd.xlane.f32.xlu0 %v16524_v0  ;;  %v9180_v28 = vmul.f32 %v16524_v0, %v16524_v0 }
0x148a   : > { %9181 = vadd.xlane.f32.xlu1 %v9180_v28 }
0x1515   : > { %v9179_v3 = vpop.xlane.xlu0 %9178 }
0x1516   : > { %v9184_v34 = vand.u32 4294901760, %v9179_v3 }
0x1517   : > { %v9182_v55 = vpop.xlane.xlu1 %9181 }
0x1518   : > { %v9261_v51 = vsub.f32 %v9179_v3, %v9184_v34  ;;  %v9630_v14 = vand.u32 4294901760, %v9182_v55  ;;  %13854 = vmatpush3.msra.mxu1 %v9184_v34 }
0x1519   : > { %13856 = vmatmul.mubr.f32.vlgmr.msra.gmra.mrb[36].mxu1 %v16447_v63  ;;  %13858 = vmatprep.subr.mxu1 %v15008_v59 }
0x151a   : > { %v9262_v26 = vand.u32 4294901760, %v9261_v51  ;;  %v9707_v8 = vsub.f32 %v9182_v55, %v9630_v14  ;;  %13884 = vmatpush3.msra.mxu0 %v9630_v14  ;;  %13860 = vmatprep.mubr.msk.f32.mxu1 %vm15009_vm3, %v15008_v59 }
0x151b   : > { %13886 = vmatmul.mubr.f32.vlgmr.msra.gmra.mrb[38].mxu0 %v16447_v63  ;;  %13888 = vmatprep.subr.mxu0 %v15008_v59 }
0x151c   : > { %v9263_v31 = vsub.f32 %v9261_v51, %v9262_v26  ;;  %v9708_v5 = vand.u32 4294901760, %v9707_v8  ;;  %13890 = vmatprep.mubr.msk.f32.mxu0 %vm15009_vm3, %v15008_v59 }
0x151e   : > { %v9264_v54 = vand.u32 4294901760, %v9263_v31  ;;  %v9709_v21 = vsub.f32 %v9707_v8, %v9708_v5 }
0x1520   : > { %v9710_v53 = vand.u32 4294901760, %v9709_v21  ;;  %13859 = vmatpush3.msra.mxu1 %v9264_v54 }
0x1521   : > { %13861 = vmatmul.mubr.f32.vlgmr.msra.gmra.mrb[36].mxu1 %v16437_v23  ;;  %13863 = vmatprep.subr.mxu1 %v15008_v59 }
0x1522   : > { %13864 = vmatpush3.msra.mxu1 %v9261_v51  ;;  %13889 = vmatpush3.msra.mxu0 %v9710_v53  ;;  %v11060_v53 = vld [vmem:[%s16915_s3 + $0x1e0] sm:$0xff] }
0x1523   : > { %13891 = vmatmul.mubr.f32.vlgmr.msra.gmra.mrb[38].mxu0 %v16437_v23  ;;  %13893 = vmatprep.subr.mxu0 %v15008_v59 }
0x1524   : > { %13894 = vmatpush3.msra.mxu0 %v9707_v8  ;;  %13865 = vmatprep.mubr.msk.f32.mxu1 %vm15009_vm3, %v15008_v59 }
0x1525   : > { %13868 = vmatprep.subr.mxu1 %v15008_v59  ;;  %13895 = vmatprep.mubr.msk.f32.mxu0 %vm15009_vm3, %v15008_v59 }
0x1526   : > { %13898 = vmatprep.subr.mxu0 %v15008_v59 }
0x1529   : > { %13866 = vmatmul.mubr.f32.vlgmr.msra.gmra.mrb[36].mxu1 %v16440_v45 }
0x152a   : > { %13869 = vmatpush3.msra.mxu1 %v9184_v34  ;;  %13870 = vmatprep.mubr.msk.f32.mxu1 %vm15009_vm3, %v15008_v59 }
0x152b   : > { %13896 = vmatmul.mubr.f32.vlgmr.msra.gmra.mrb[38].mxu0 %v16440_v45  ;;  %13873 = vmatprep.subr.mxu1 %v15008_v59 }
0x152c   : > { %13899 = vmatpush3.msra.mxu0 %v9630_v14  ;;  %13900 = vmatprep.mubr.msk.f32.mxu0 %vm15009_vm3, %v15008_v59 }
0x152d   : > { %13903 = vmatprep.subr.mxu0 %v15008_v59 }
0x1531   : > { %13871 = vmatmul.mubr.f32.vlgmr.msra.gmra.mrb[36].mxu1 %v16443_v49 }
0x1532   : > { %13874 = vmatpush3.msra.mxu1 %v9262_v26  ;;  %13875 = vmatprep.mubr.msk.f32.mxu1 %vm15009_vm3, %v15008_v59 }
0x1533   : > { %13901 = vmatmul.mubr.f32.vlgmr.msra.gmra.mrb[38].mxu0 %v16443_v49  ;;  %13878 = vmatprep.subr.mxu1 %v15008_v59 }
0x1534   : > { %13904 = vmatpush3.msra.mxu0 %v9708_v5  ;;  %13905 = vmatprep.mubr.msk.f32.mxu0 %vm15009_vm3, %v15008_v59  ;;  %v11058_v5 = vld [vmem:[%s16915_s3 + $0x1d8] sm:$0xff] }
0x1535   : > { %13908 = vmatprep.subr.mxu0 %v15008_v59 }
0x1539   : > { %13876 = vmatmul.mubr.f32.vlgmr.msra.gmra.mrb[36].mxu1 %v16437_v23 }
0x153a   : > { %13879 = vmatpush3.msra.mxu1 %v9184_v34  ;;  %13880 = vmatprep.mubr.msk.f32.mxu1 %vm15009_vm3, %v15008_v59 }
0x153b   : > { %13906 = vmatmul.mubr.f32.vlgmr.msra.gmra.mrb[38].mxu0 %v16437_v23  ;;  %13913 = vmatprep.subr.bf16.mxu1 %v15008_v59 }
0x153c   : > { %13909 = vmatpush3.msra.mxu0 %v9630_v14  ;;  %13910 = vmatprep.mubr.msk.f32.mxu0 %vm15009_vm3, %v15008_v59 }
0x153d   : > { %13949 = vmatprep.subr.mxu0 %v15008_v59 }
0x1541   : > { %13881 = vmatmul.mubr.f32.vlgmr.msra.gmra.mrb[36].mxu1 %v16437_v23 }
0x1542   : > { %13915 = vmatprep.mubr.msk.bf16.mxu1 %vm15009_vm3, %v15008_v59 }
0x1543   : > { %13911 = vmatmul.mubr.f32.vlgmr.msra.gmra.mrb[38].mxu0 %v16437_v23 }
0x1544   : > { %13951 = vmatprep.mubr.msk.f32.mxu0 %vm15009_vm3, %v15008_v59 }
0x1614   : > { %v9625_v7 = vpop.f32.mrb[36].mxu1 }
0x1615   : > { %v10075_v38 = vmul.f32 0.0078125, %v9625_v7  ;;  %v13882_v15 = vpop.f32.mrb[37].mxu1 }
0x1616   : > { %v10071_v41 = vpop.f32.mrb[38].mxu0  ;;  %v11078_v15 = vld [vmem:[%s16915_s3 + $0x1e8] sm:$0xff] }
0x1617   : > { %v10077_v57 = vmul.f32 %v10075_v38, %v10075_v38  ;;  %v10076_v58 = vmul.f32 0.0078125, %v10071_v41  ;;  %v13912_v61 = vpop.f32.mrb[39].mxu0 }
0x1619   : > { %v10078_v30 = vsub.f32 %v10076_v58, %v10077_v57 }
0x161b   : > { %v10079_v10 = vmax.f32 %v10078_v30, 0.0 }
0x161d   : > { %v10080_v43 = vadd.f32 1e-05, %v10079_v10 }
0x161f   : > { %14937 = vrsqrt.f32 %v10080_v43 }
0x1629   : > { %v14938_v25 = vpop.eup %14937 }
0x162a   : > { %v10083_v11 = vmul.f32 %v14938_v25, %v10082_v16  ;;  %v11077_v16 = vld [vmem:[%s16797_s18] sm:$0xf] }
0x162c   : > { %10089 = vperm.xlu0 %14880, %v10083_v11   ;;  %v10085_v12 = vmul.f32 %v10083_v11, %v10075_v38 }
0x162e   : > { %v10086_v42 = vsub.f32 %v10084_v40, %v10085_v12 }
0x1630   : > { %10105 = vperm.xlu0 %14880, %v10102_v19   ;;  %10095 = vperm.xlu1 %14881, %v10086_v42  }
0x16ab   : > { %v10090_v35 = vpop.permute.xlu0 %10089 }
0x16ac   : > { %v10092_v29 = vmul.f32 %v16524_v0, %v10090_v35 }
0x16af   : > { %v10096_v9 = vpop.permute.xlu1 %10095  ;;  %v10106_v1 = vpop.permute.xlu0 %10105 }
0x16b0   : > { %v10098_v39 = vadd.f32 %v10096_v9, %v10092_v29 }
0x16b2   : > { %v10099_v18 = vmax.f32 %v10098_v39, 0.0 }
0x16b4   : > { %v10100_v20 = vpack.c.bf16 %v10099_v18, %v10099_v18 }
0x16b6   : > { %v10112_v47 = vsel %vm9089_vm6, %v10100_v20, 0 }
0x16b7   : > { %13914 = vmatpush3.bf16.msra.mxu1 %v10112_v47 }
0x16b8   : > { %13919 = vmatprep.subr.mxu1 %v15008_v59 }
0x16ba   : > { %13916 = vmatmul.mubr.msk.bf16.vlgmr.msra.gmra.mrb[40].mxu1 %vm8156_vm5, %v10101_v6 }
0x16bb   : > { %13921 = vmatprep.mubr.msk.f32.mxu1 %vm15009_vm3, %v15008_v59 }
0x178d   : > { %v10148_v13 = vpop.f32.mrb[40].mxu1 }
0x178e   : > { %v16595_v48 = vadd.f32 %v10148_v13, %v10106_v1  ;;  %v13917_v60 = vpop.f32.mrb[41].mxu1 }
0x178f   : > { %v10151_v37 = vpop.f32.mrb[42].mxu1 }
0x1790   : > { %10154 = vadd.xlane.f32.xlu1 %v16595_v48  ;;  %v13918_v27 = vpop.f32.mrb[43].mxu1  ;;  %v10156_v33 = vmul.f32 %v16595_v48, %v16595_v48 }
0x1792   : > { %10157 = vadd.xlane.f32.xlu0 %v10156_v33 }
0x181d   : > { %v10155_v36 = vpop.xlane.xlu1 %10154 }
0x181e   : > { %v10160_v22 = vand.u32 4294901760, %v10155_v36 }
0x181f   : > { %v10158_v4 = vpop.xlane.xlu0 %10157 }
0x1820   : > { %v10237_v17 = vsub.f32 %v10155_v36, %v10160_v22  ;;  %v10606_v62 = vand.u32 4294901760, %v10158_v4  ;;  %13920 = vmatpush3.msra.mxu1 %v10160_v22 }
0x1821   : > { %13922 = vmatmul.mubr.f32.vlgmr.msra.gmra.mrb[38].mxu1 %v16447_v63  ;;  %13924 = vmatprep.subr.mxu1 %v15008_v59 }
0x1822   : > { %v10238_v56 = vand.u32 4294901760, %v10237_v17  ;;  %v10683_v46 = vsub.f32 %v10158_v4, %v10606_v62  ;;  %13950 = vmatpush3.msra.mxu0 %v10606_v62  ;;  %13926 = vmatprep.mubr.msk.f32.mxu1 %vm15009_vm3, %v15008_v59 }
0x1823   : > { %13952 = vmatmul.mubr.f32.vlgmr.msra.gmra.mrb[44].mxu0 %v16447_v63  ;;  %13954 = vmatprep.subr.mxu0 %v15008_v59 }
0x1824   : > { %v10239_v50 = vsub.f32 %v10237_v17, %v10238_v56  ;;  %v10684_v44 = vand.u32 4294901760, %v10683_v46  ;;  %13956 = vmatprep.mubr.msk.f32.mxu0 %vm15009_vm3, %v15008_v59 }
0x1826   : > { %v10240_v52 = vand.u32 4294901760, %v10239_v50  ;;  %v10685_v32 = vsub.f32 %v10683_v46, %v10684_v44 }
0x1828   : > { %v10686_v24 = vand.u32 4294901760, %v10685_v32  ;;  %13925 = vmatpush3.msra.mxu1 %v10240_v52 }
0x1829   : > { %13927 = vmatmul.mubr.f32.vlgmr.msra.gmra.mrb[38].mxu1 %v16437_v23  ;;  %13929 = vmatprep.subr.mxu1 %v15008_v59 }
0x182a   : > { %13930 = vmatpush3.msra.mxu1 %v10237_v17  ;;  %13955 = vmatpush3.msra.mxu0 %v10686_v24 }
0x182b   : > { %13957 = vmatmul.mubr.f32.vlgmr.msra.gmra.mrb[44].mxu0 %v16437_v23  ;;  %13959 = vmatprep.subr.mxu0 %v15008_v59 }
0x182c   : > { %13960 = vmatpush3.msra.mxu0 %v10683_v46  ;;  %13931 = vmatprep.mubr.msk.f32.mxu1 %vm15009_vm3, %v15008_v59 }
0x182d   : > { %13934 = vmatprep.subr.mxu1 %v15008_v59  ;;  %13961 = vmatprep.mubr.msk.f32.mxu0 %vm15009_vm3, %v15008_v59 }
0x182e   : > { %13964 = vmatprep.subr.mxu0 %v15008_v59 }
0x1831   : > { %13932 = vmatmul.mubr.f32.vlgmr.msra.gmra.mrb[38].mxu1 %v16440_v45 }
0x1832   : > { %13935 = vmatpush3.msra.mxu1 %v10160_v22  ;;  %13936 = vmatprep.mubr.msk.f32.mxu1 %vm15009_vm3, %v15008_v59 }
0x1833   : > { %13962 = vmatmul.mubr.f32.vlgmr.msra.gmra.mrb[44].mxu0 %v16440_v45  ;;  %13939 = vmatprep.subr.mxu1 %v15008_v59 }
0x1834   : > { %13965 = vmatpush3.msra.mxu0 %v10606_v62  ;;  %13966 = vmatprep.mubr.msk.f32.mxu0 %vm15009_vm3, %v15008_v59 }
0x1835   : > { %13969 = vmatprep.subr.mxu0 %v15008_v59 }
0x1839   : > { %13937 = vmatmul.mubr.f32.vlgmr.msra.gmra.mrb[38].mxu1 %v16443_v49 }
0x183a   : > { %13940 = vmatpush3.msra.mxu1 %v10238_v56  ;;  %13941 = vmatprep.mubr.msk.f32.mxu1 %vm15009_vm3, %v15008_v59  ;;  %v12035_v56 = vld [vmem:[%s16915_s3 + $0x1f0] sm:$0xff] }
0x183b   : > { %13967 = vmatmul.mubr.f32.vlgmr.msra.gmra.mrb[44].mxu0 %v16443_v49  ;;  %13944 = vmatprep.subr.mxu1 %v15008_v59 }
0x183c   : > { %13970 = vmatpush3.msra.mxu0 %v10684_v44  ;;  %13971 = vmatprep.mubr.msk.f32.mxu0 %vm15009_vm3, %v15008_v59  ;;  %v12055_v44 = vld [vmem:[%s16915_s3 + $0x200] sm:$0x1] }
0x183d   : > { %13974 = vmatprep.subr.mxu0 %v15008_v59 }
0x1841   : > { %13942 = vmatmul.mubr.f32.vlgmr.msra.gmra.mrb[38].mxu1 %v16437_v23 }
0x1842   : > { %13945 = vmatpush3.msra.mxu1 %v10160_v22  ;;  %13946 = vmatprep.mubr.msk.f32.mxu1 %vm15009_vm3, %v15008_v59 }
0x1843   : > { %13972 = vmatmul.mubr.f32.vlgmr.msra.gmra.mrb[44].mxu0 %v16437_v23  ;;  %13979 = vmatprep.subr.bf16.mxu1 %v15008_v59 }
0x1844   : > { %13975 = vmatpush3.msra.mxu0 %v10606_v62  ;;  %13976 = vmatprep.mubr.msk.f32.mxu0 %vm15009_vm3, %v15008_v59 }
0x1845   : > { %13985 = vmatprep.subr.mxu0 %v15008_v59 }
0x1849   : > { %13947 = vmatmul.mubr.f32.vlgmr.msra.gmra.mrb[38].mxu1 %v16437_v23 }
0x184a   : > { %13981 = vmatprep.mubr.msk.bf16.mxu1 %vm15009_vm3, %v15008_v59 }
0x184b   : > { %13977 = vmatmul.mubr.f32.vlgmr.msra.gmra.mrb[44].mxu0 %v16437_v23 }
0x184c   : > { %13987 = vmatprep.mubr.msk.f32.mxu0 %vm15009_vm3, %v15008_v59 }
0x191c   : > { %v10601_v2 = vpop.f32.mrb[38].mxu1 }
0x191d   : > { %v11051_v28 = vmul.f32 0.0078125, %v10601_v2  ;;  %v13948_v3 = vpop.f32.mrb[39].mxu1 }
0x191e   : > { %v11047_v34 = vpop.f32.mrb[44].mxu0 }
0x191f   : > { %v11053_v55 = vmul.f32 %v11051_v28, %v11051_v28  ;;  %v11052_v51 = vmul.f32 0.0078125, %v11047_v34  ;;  %v13978_v14 = vpop.f32.mrb[45].mxu0 }
0x1921   : > { %v11054_v26 = vsub.f32 %v11052_v51, %v11053_v55  ;;  %v12054_v51 = vld [vmem:[%s16798_s19] sm:$0x1] }
0x1923   : > { %v11055_v8 = vmax.f32 %v11054_v26, 0.0 }
0x1925   : > { %v11056_v31 = vadd.f32 1e-05, %v11055_v8 }
0x1927   : > { %14939 = vrsqrt.f32 %v11056_v31 }
0x1931   : > { %v14940_v54 = vpop.eup %14939 }
0x1932   : > { %v11059_v21 = vmul.f32 %v14940_v54, %v11058_v5 }
0x1934   : > { %11065 = vperm.xlu0 %14880, %v11059_v21   ;;  %v11061_v7 = vmul.f32 %v11059_v21, %v11051_v28 }
0x1936   : > { %v11062_v38 = vsub.f32 %v11060_v53, %v11061_v7 }
0x1938   : > { %11071 = vperm.xlu1 %14881, %v11062_v38  }
0x193c   : > { %11081 = vperm.xlu1 %14881, %v11078_v15  }
0x19b3   : > { %v11066_v41 = vpop.permute.xlu0 %11065 }
0x19b4   : > { %v11068_v57 = vmul.f32 %v11066_v41, %v16595_v48 }
0x19b7   : > { %v11072_v58 = vpop.permute.xlu1 %11071 }
0x19b8   : > { %v11074_v61 = vadd.f32 %v11072_v58, %v11068_v57 }
0x19ba   : > { %v11075_v30 = vmax.f32 %v11074_v61, 0.0 }
0x19bb   : > { %v11082_v25 = vpop.permute.xlu1 %11081 }
0x19bc   : > { %v11076_v10 = vpack.c.bf16 %v11075_v30, %v11075_v30 }
0x19be   : > { %v11088_v43 = vsel %vm9089_vm6, %v11076_v10, 0 }
0x19bf   : > { %13980 = vmatpush3.bf16.msra.mxu1 %v11088_v43 }
0x19c0   : > { %14015 = vmatprep.subr.mxu1 %v15008_v59 }
0x19c2   : > { %13982 = vmatmul.mubr.msk.bf16.vlgmr.msra.gmra.mrb[44].mxu1 %vm8156_vm5, %v11077_v16 }
0x19c3   : > { %14017 = vmatprep.mubr.msk.f32.mxu1 %vm15009_vm3, %v15008_v59 }
0x1a95   : > { %v11124_v11 = vpop.f32.mrb[44].mxu1 }
0x1a96   : > { %v11125_v40 = vadd.f32 %v11124_v11, %v11082_v25  ;;  %v13983_v12 = vpop.f32.mrb[45].mxu1 }
0x1a97   : > { %v11127_v19 = vpop.f32.mrb[46].mxu1 }
0x1a98   : > { %v16667_v42 = vadd.f32 %v16524_v0, %v11125_v40  ;;  %v13984_v35 = vpop.f32.mrb[47].mxu1 }
0x1a9a   : > { %11131 = vadd.xlane.f32.xlu0 %v16667_v42  ;;  %v11133_v29 = vmul.f32 %v16667_v42, %v16667_v42 }
0x1a9c   : > { %11134 = vadd.xlane.f32.xlu1 %v11133_v29 }
0x1b27   : > { %v11132_v9 = vpop.xlane.xlu0 %11131 }
0x1b28   : > { %v11137_v39 = vand.u32 4294901760, %v11132_v9 }
0x1b29   : > { %v11135_v18 = vpop.xlane.xlu1 %11134 }
0x1b2a   : > { %v11214_v20 = vsub.f32 %v11132_v9, %v11137_v39  ;;  %v11583_v47 = vand.u32 4294901760, %v11135_v18  ;;  %13986 = vmatpush3.msra.mxu0 %v11137_v39 }
0x1b2b   : > { %13988 = vmatmul.mubr.f32.vlgmr.msra.gmra.mrb[46].mxu0 %v16447_v63  ;;  %13990 = vmatprep.subr.mxu0 %v15008_v59 }
0x1b2c   : > { %v11215_v6 = vand.u32 4294901760, %v11214_v20  ;;  %v11660_v0 = vsub.f32 %v11135_v18, %v11583_v47  ;;  %14016 = vmatpush3.msra.mxu1 %v11583_v47  ;;  %13992 = vmatprep.mubr.msk.f32.mxu0 %vm15009_vm3, %v15008_v59 }
0x1b2d   : > { %14018 = vmatmul.mubr.f32.vlgmr.msra.gmra.mrb[48].mxu1 %v16447_v63  ;;  %14020 = vmatprep.subr.mxu1 %v15008_v59 }
0x1b2e   : > { %v11216_v1 = vsub.f32 %v11214_v20, %v11215_v6  ;;  %v11661_v13 = vand.u32 4294901760, %v11660_v0  ;;  %14022 = vmatprep.mubr.msk.f32.mxu1 %vm15009_vm3, %v15008_v59 }
0x1b30   : > { %v11217_v48 = vand.u32 4294901760, %v11216_v1  ;;  %v11662_v60 = vsub.f32 %v11660_v0, %v11661_v13 }
0x1b32   : > { %v11663_v37 = vand.u32 4294901760, %v11662_v60  ;;  %13991 = vmatpush3.msra.mxu0 %v11217_v48 }
0x1b33   : > { %13993 = vmatmul.mubr.f32.vlgmr.msra.gmra.mrb[46].mxu0 %v16437_v23  ;;  %13995 = vmatprep.subr.mxu0 %v15008_v59 }
0x1b34   : > { %13996 = vmatpush3.msra.mxu0 %v11214_v20  ;;  %14021 = vmatpush3.msra.mxu1 %v11663_v37 }
0x1b35   : > { %14023 = vmatmul.mubr.f32.vlgmr.msra.gmra.mrb[48].mxu1 %v16437_v23  ;;  %14025 = vmatprep.subr.mxu1 %v15008_v59 }
0x1b36   : > { %14026 = vmatpush3.msra.mxu1 %v11660_v0  ;;  %13997 = vmatprep.mubr.msk.f32.mxu0 %vm15009_vm3, %v15008_v59 }
0x1b37   : > { %14000 = vmatprep.subr.mxu0 %v15008_v59  ;;  %14027 = vmatprep.mubr.msk.f32.mxu1 %vm15009_vm3, %v15008_v59 }
0x1b38   : > { %14030 = vmatprep.subr.mxu1 %v15008_v59 }
0x1b3b   : > { %13998 = vmatmul.mubr.f32.vlgmr.msra.gmra.mrb[46].mxu0 %v16440_v45 }
0x1b3c   : > { %14001 = vmatpush3.msra.mxu0 %v11137_v39  ;;  %14002 = vmatprep.mubr.msk.f32.mxu0 %vm15009_vm3, %v15008_v59 }
0x1b3d   : > { %14028 = vmatmul.mubr.f32.vlgmr.msra.gmra.mrb[48].mxu1 %v16440_v45  ;;  %14005 = vmatprep.subr.mxu0 %v15008_v59 }
0x1b3e   : > { %14031 = vmatpush3.msra.mxu1 %v11583_v47  ;;  %14032 = vmatprep.mubr.msk.f32.mxu1 %vm15009_vm3, %v15008_v59 }
0x1b3f   : > { %14035 = vmatprep.subr.mxu1 %v15008_v59 }
0x1b43   : > { %14003 = vmatmul.mubr.f32.vlgmr.msra.gmra.mrb[46].mxu0 %v16443_v49 }
0x1b44   : > { %14006 = vmatpush3.msra.mxu0 %v11215_v6  ;;  %14007 = vmatprep.mubr.msk.f32.mxu0 %vm15009_vm3, %v15008_v59 }
0x1b45   : > { %14033 = vmatmul.mubr.f32.vlgmr.msra.gmra.mrb[48].mxu1 %v16443_v49  ;;  %14010 = vmatprep.subr.mxu0 %v15008_v59 }
0x1b46   : > { %14036 = vmatpush3.msra.mxu1 %v11661_v13  ;;  %14037 = vmatprep.mubr.msk.f32.mxu1 %vm15009_vm3, %v15008_v59 }
0x1b47   : > { %14040 = vmatprep.subr.mxu1 %v15008_v59 }
0x1b4b   : > { %14008 = vmatmul.mubr.f32.vlgmr.msra.gmra.mrb[46].mxu0 %v16437_v23 }
0x1b4c   : > { %14011 = vmatpush3.msra.mxu0 %v11137_v39  ;;  %14012 = vmatprep.mubr.msk.f32.mxu0 %vm15009_vm3, %v15008_v59 }
0x1b4d   : > { %14038 = vmatmul.mubr.f32.vlgmr.msra.gmra.mrb[48].mxu1 %v16437_v23  ;;  %14045 = vmatprep.subr.bf16.mxu0 %v15008_v59 }
0x1b4e   : > { %14041 = vmatpush3.msra.mxu1 %v11583_v47  ;;  %14042 = vmatprep.mubr.msk.f32.mxu1 %vm15009_vm3, %v15008_v59 }
0x1b53   : > { %14013 = vmatmul.mubr.f32.vlgmr.msra.gmra.mrb[46].mxu0 %v16437_v23 }
0x1b54   : > { %14047 = vmatprep.mubr.msk.bf16.mxu0 %vm15009_vm3, %v15008_v59  ;;  %v12037_v59 = vld [vmem:[%s16915_s3 + $0x1f8] sm:$0xff]  ;;  %s16737_s3 = scalar_lea.hbm %s16799_s20, %s12228_s0 }
0x1b55   : > { %14043 = vmatmul.mubr.f32.vlgmr.msra.gmra.mrb[48].mxu1 %v16437_v23 }
0x1c26   : > { %v11578_v45 = vpop.f32.mrb[46].mxu0 }
0x1c27   : > { %v12028_v49 = vmul.f32 0.0078125, %v11578_v45  ;;  %v14014_v63 = vpop.f32.mrb[47].mxu0 }
0x1c28   : > { %v12024_v27 = vpop.f32.mrb[48].mxu1 }
0x1c29   : > { %v12030_v33 = vmul.f32 %v12028_v49, %v12028_v49  ;;  %v12029_v36 = vmul.f32 0.0078125, %v12024_v27  ;;  %v14044_v22 = vpop.f32.mrb[49].mxu1 }
0x1c2b   : > { %v12031_v4 = vsub.f32 %v12029_v36, %v12030_v33 }
0x1c2d   : > { %v12032_v17 = vmax.f32 %v12031_v4, 0.0 }
0x1c2f   : > { %v12033_v62 = vadd.f32 1e-05, %v12032_v17 }
0x1c31   : > { %14941 = vrsqrt.f32 %v12033_v62 }
0x1c3b   : > { %v14942_v46 = vpop.eup %14941 }
0x1c3c   : > { %v12036_v50 = vmul.f32 %v14942_v46, %v12035_v56 }
0x1c3e   : > { %12042 = vperm.xlu0 %14880, %v12036_v50   ;;  %v12038_v23 = vmul.f32 %v12036_v50, %v12028_v49 }
0x1c40   : > { %v12039_v52 = vsub.f32 %v12037_v59, %v12038_v23 }
0x1c42   : > { %12058 = vperm.xlu0 %14880, %v12055_v44   ;;  %12048 = vperm.xlu1 %14881, %v12039_v52  }
0x1cbd   : > { %v12043_v32 = vpop.permute.xlu0 %12042 }
0x1cbe   : > { %v12045_v24 = vmul.f32 %v12043_v32, %v16667_v42 }
0x1cc1   : > { %v12049_v2 = vpop.permute.xlu1 %12048  ;;  %v12059_v14 = vpop.permute.xlu0 %12058 }
0x1cc2   : > { %v12051_v28 = vadd.f32 %v12049_v2, %v12045_v24 }
0x1cc4   : > { %v12052_v3 = vmax.f32 %v12051_v28, 0.0 }
0x1cc6   : > { %v12053_v34 = vpack.c.bf16 %v12052_v3, %v12052_v3 }
0x1cc8   : > { %v12065_v55 = vsel %vm9089_vm6, %v12053_v34, 0 }
0x1cc9   : > { %14046 = vmatpush3.bf16.msra.mxu0 %v12065_v55 }
0x1ccc   : > { %14048 = vmatmul.mubr.msk.bf16.vlgmr.msra.gmra.mrb[48].mxu0 %vm8156_vm5, %v12054_v51 }
0x1d9f   : > { %v12101_v26 = vpop.f32.mrb[48].mxu0 }
0x1da0   : > { %v12102_v8 = vadd.f32 %v12101_v26, %v12059_v14  ;;  %v14049_v31 = vpop.f32.mrb[49].mxu0 }
0x1da1   : > { %v12104_v5 = vpop.f32.mrb[50].mxu0 }
0x1da2   : > { %12107 = vst [vmem:[%s636_s21] sm:$0x1] %v12102_v8  ;;  %v14050_v54 = vpop.f32.mrb[51].mxu0 }
0x1da3   : > { %14956 = shalt.err (!%p14953_p3)
}
0x1da4   : > { %s14957_s30 = scalar_lea.hbm %s16737_s3, 16  ;;  %s14961_s25 = scalar_lea.hbm %s16799_s20, 32 }
0x1da5   : > { %p14958_p4 = scmp.ne.s32.totalorder %s16737_s3, %s14957_s30  ;;  %p14962_p9 = scmp.lt.u32.totalorder %s16737_s3, %s16799_s20 }
0x1da6   : > { %p14963_p10 = scmp.lt.u32.totalorder %s14961_s25, %s14957_s30  ;;  %p14965_p12 = scmp.lt.u32.totalorder %s14957_s30, %s16737_s3 }
0x1da7   : > { %p14959_p7 = pnand %p14958_p4, %p15154_p5 }
0x1da8   : > { %p14964_p11 = por %p14963_p10, %p14962_p9 }
0x1da9   : > { %p14960_p8 = pneg %p14959_p7 }
0x1daa   : > { %p14966_p13 = por %p14965_p12, %p14964_p11 }
0x1dac   : > { %p14967_p0 = pnand %p14966_p13, %p14960_p8 }
0x1dae   : > { %14970 = shalt.err (!%p14967_p0)
}
0x1daf   : > { %14838 = dma.vmem_to_hbm [thread:$0]  (%p15154_p5), %s16739_s23, 16, %s16737_s3, %s12109_s2  }
0x1db0 PF: > { %p14844_p1 = scmp.ge.s32.totalorder %s15005_s24, 2  ;;  %s12133_s28 = sand.u32 1, %s14993_s1  }
0x1db1   : > { %s12134_s0 = scalar_lea.sflag [#allocation3], %s12133_s28 }
0x1db2   : > { %p14841_p2 = pnand %p14844_p1, %p15158_p6 }
0x1db4   : > { %14988 = dma.done.wait (!%p14841_p2), %s12134_s0, 16  }
0x1db5   : > { %14990 = vsyncadd (!%p14841_p2), %s12134_s0, 4294967280  ;;  %s16928_s24 = sld [smem:[#allocation6_spill]]  ;;  %s16929_s30 = sld [smem:[#allocation5_spill]] }
0x1db6   : > { %s16930_s23 = sld [smem:[#allocation7_spill]]  ;;  %s16931_s1 = smov %s14997_s22 }
0x1dbb   : > { %p30_p3 = scmp.ge.s32.totalorder %s16928_s24, 4   ;;  %s16932_s22 = smov %s16929_s30 }
0x1dbd   :  { %32 = sbr.rel (!%p30_p3) target bundleno = 10 (0xa), region = 138 }
0x1dc4   :  { %12138 = vsyncpa [#allocation3], 1 }
0x1dc5   :  { %12140 = vsyncpa [#allocation3 + $0x1], 1 }

</bundles_post_ra>
